<compile_context>
chip_gen: v6e
topology: v6e:2x2x1
jax: 0.10.0
libtpu: 0.0.40
codegen_flags: <defaults>
</compile_context>

<pallas_src>
import functools

import jax
import jax.numpy as jnp
from jax.experimental import pallas as pl
from jax.experimental.pallas import tpu as pltpu

EPS = 1e-5
EXPANSION = 4
LANE = 128                      # channel dims padded to multiples of the lane width
# 32 MiB scoped VMEM is safe on every generation (v7x physical VMEM is 64 MiB).
# Production kernels would pick this (and the M tiles) per chip generation.
VMEM_LIMIT = 32 * 1024 * 1024


# ------------------------------ small helpers ------------------------------ #

def _round_up(x, m):
    return (x + m - 1) // m * m


def _pick_tile(m, target=512):
    """Largest divisor of m that is a multiple of 8 and <= target (fallback m).

    Target raised to 512 (from 256) for the mem-bound sweeps: measured HBM
    roofline fraction goes ~63% -> ~85%+ and per-grid-step overhead amortizes.
    """
    if m <= target or m % 8 != 0:
        return m
    t = (target // 8) * 8
    while t >= 8:
        if m % t == 0:
            return t
        t -= 8
    return m


def _pad_mat(w, rows, cols):
    return jnp.pad(w, ((0, rows - w.shape[0]), (0, cols - w.shape[1])))


def _pad_vec(v, n, value=0.0):
    return jnp.pad(v, (0, n - v.shape[0]), constant_values=value)


def _bn_scale_bias(col_sum, col_ssq, gamma, beta, count):
    """Fold BN-train stats into per-channel (scale, bias): out = y*scale + bias.

    TODO(synk): E[y^2]-E[y]^2 in f32 can catastrophically cancel at production
    N*H*W; a shifted / Welford-merge accumulation would be safer there.
    """
    mean = col_sum / count
    var = jnp.maximum(col_ssq / count - mean * mean, 0.0)   # biased variance
    scale = gamma.reshape(1, -1).astype(jnp.float32) * jax.lax.rsqrt(var + EPS)
    bias = beta.reshape(1, -1).astype(jnp.float32) - mean * scale
    return scale, bias


# ----------------------------- Pallas kernels ------------------------------ #

def _conv1x1_stats_kernel(x_ref, w_ref, y_ref, sum_ref, ssq_ref):
    """block1 sweep: y = x @ w (bf16 in, f32 acc); write the y tile (bf16) and
    emit *per-tile* BN partial sums (reduced in JAX) -> grid axis is parallel."""
    y = jnp.dot(x_ref[...], w_ref[...], preferred_element_type=jnp.float32)
    y_ref[...] = y.astype(y_ref.dtype)
    sum_ref[...] = jnp.sum(y, axis=0, keepdims=True)
    ssq_ref[...] = jnp.sum(y * y, axis=0, keepdims=True)


def _conv3x3_fused_kernel(y1_ref, sc_ref, bi_ref, w_ref,
                          y_ref, sum_ref, ssq_ref, pbuf,
                          *, s, pad, H, W, Ho, Wo, C):
    """block2 sweep for one image.

    Fuses BN1+ReLU onto the raw block-1 output, builds the zero-halo'd,
    stride-phase-split activation in a VMEM scratch (no HBM pad / gather
    passes), then accumulates the 3x3 taps as 3 MXU dots with K = 3*C.

    y1_ref: (H//s, s, W//s, s*C)  raw block-1 output, W-phase packed in lanes
    pbuf:   (s, s, Hq, Wq, C)     padded activation, [h-phase, w-phase, r, q, c]
    w_ref:  (3, 3*C, Cout)        kernel-row-packed taps (dx-major along K)
    """
    # Halo must be zero for every image (scratch is per-core; zero it each step).
    # TODO(synk): zero only the halo + row-tile the accumulation at production
    # spatial sizes; a bf16 pbuf would additionally halve the pad-buffer VMEM.
    pbuf[...] = jnp.zeros_like(pbuf)

    # BN1 + ReLU fused on the fly (scale/bias lane-tiled to s*C by the caller).
    a = y1_ref[...].astype(jnp.float32) * sc_ref[...] + bi_ref[...]
    a = jnp.maximum(a, 0.0)                                  # (H//s, s, W//s, s*C)

    Hs, Ws = H // s, W // s
    for hp in range(s):                 # input row parity
        for wp in range(s):             # input col parity (lane block of y1_ref)
            tph, roff = (hp + pad) % s, (hp + pad) // s      # padded H phase/offset
            tpw, coff = (wp + pad) % s, (wp + pad) // s      # padded W phase/offset
            pbuf[tph, tpw, roff:roff + Hs, coff:coff + Ws, :] = (
                a[:, hp, :, wp * C:(wp + 1) * C])

    # One MXU dot per kernel row: patch lanes are [dx=0 | dx=1 | dx=2] channels,
    # matching w_ref[dy] = w2[dy].reshape(3*C, Cout).  K = 3*C >= 256.
    cout = w_ref.shape[-1]
    acc = jnp.zeros((Ho * Wo, cout), jnp.float32)
    for dy in range(3):
        pieces = []
        for dx in range(3):
            pieces.append(pbuf[dy % s, dx % s,
                               dy // s:dy // s + Ho,
                               dx // s:dx // s + Wo, :])
        patch = jnp.concatenate(pieces, axis=-1).reshape(Ho * Wo, 3 * C)
        acc = acc + jnp.dot(patch.astype(jnp.bfloat16), w_ref[dy],
                            preferred_element_type=jnp.float32)

    y_ref[...] = acc.astype(y_ref.dtype)
    sum_ref[...] = jnp.sum(acc, axis=0, keepdims=True)
    ssq_ref[...] = jnp.sum(acc * acc, axis=0, keepdims=True)


def _block3_shortcut_kernel(y2_ref, sc_ref, bi_ref, w3_ref, xs_ref, wsc_ref,
                            y3_ref, ysc_ref, s3_ref, q3_ref, ss_ref, qs_ref,
                            *, cin):
    """block3 + projection shortcut for one image.

    Fuses BN2+ReLU onto the raw block-2 output; the shortcut's strided
    subsample arrived via the BlockSpec (phase-(0,0) of a free reshape of x)."""
    a2 = jnp.maximum(
        y2_ref[...].astype(jnp.float32) * sc_ref[...] + bi_ref[...], 0.0
    ).astype(jnp.bfloat16)
    y3 = jnp.dot(a2, w3_ref[...], preferred_element_type=jnp.float32)

    xs = xs_ref[...][:, :, :cin].astype(jnp.float32)         # (Ho, Wo, cin)
    xs = xs.reshape(-1, cin).astype(jnp.bfloat16)            # (Ho*Wo, cin)
    ysc = jnp.dot(xs, wsc_ref[...], preferred_element_type=jnp.float32)

    y3_ref[...] = y3.astype(y3_ref.dtype)
    ysc_ref[...] = ysc.astype(ysc_ref.dtype)
    s3_ref[...] = jnp.sum(y3, axis=0, keepdims=True)
    q3_ref[...] = jnp.sum(y3 * y3, axis=0, keepdims=True)
    ss_ref[...] = jnp.sum(ysc, axis=0, keepdims=True)
    qs_ref[...] = jnp.sum(ysc * ysc, axis=0, keepdims=True)


def _block3_plain_kernel(y2_ref, sc_ref, bi_ref, w3_ref, y3_ref, s3_ref, q3_ref):
    """block3 only (identity-shortcut variant), BN2+ReLU fused on the input."""
    a2 = jnp.maximum(
        y2_ref[...].astype(jnp.float32) * sc_ref[...] + bi_ref[...], 0.0
    ).astype(jnp.bfloat16)
    y3 = jnp.dot(a2, w3_ref[...], preferred_element_type=jnp.float32)
    y3_ref[...] = y3.astype(y3_ref.dtype)
    s3_ref[...] = jnp.sum(y3, axis=0, keepdims=True)
    q3_ref[...] = jnp.sum(y3 * y3, axis=0, keepdims=True)


def _norm_add_relu_kernel(ya_ref, sa_ref, ba_ref, yb_ref, sb_ref, bb_ref, o_ref):
    """Final epilogue (true output): o = relu(BN(y3) + BN(y_shortcut))."""
    a = ya_ref[...].astype(jnp.float32) * sa_ref[...] + ba_ref[...]
    b = yb_ref[...].astype(jnp.float32) * sb_ref[...] + bb_ref[...]
    o_ref[...] = jnp.maximum(a + b, 0.0).astype(o_ref.dtype)


# ----------------------------- Pallas wrappers ------------------------------ #

def conv1x1_stats(x, w, *, tm):
    M, K = x.shape
    N = w.shape[1]
    nt = M // tm
    return pl.pallas_call(
        _conv1x1_stats_kernel,
        grid=(nt,),
        in_specs=[
            pl.BlockSpec((tm, K), lambda i: (i, 0)),
            pl.BlockSpec((K, N), lambda i: (0, 0)),
        ],
        out_specs=[
            pl.BlockSpec((tm, N), lambda i: (i, 0)),
            pl.BlockSpec((None, 1, N), lambda i: (i, 0, 0)),
            pl.BlockSpec((None, 1, N), lambda i: (i, 0, 0)),
        ],
        out_shape=[
            jax.ShapeDtypeStruct((M, N), jnp.bfloat16),
            jax.ShapeDtypeStruct((nt, 1, N), jnp.float32),
            jax.ShapeDtypeStruct((nt, 1, N), jnp.float32),
        ],
        compiler_params=pltpu.CompilerParams(
            dimension_semantics=("parallel",), vmem_limit_bytes=VMEM_LIMIT),
    )(x, w)


def conv3x3_fused(y1r, sc1t, bi1t, w2p, *, s, pad, H, W, Ho, Wo, C):
    Nb = y1r.shape[0]
    Hq = (H + 2 * pad + s - 1) // s
    Wq = (W + 2 * pad + s - 1) // s
    kern = functools.partial(_conv3x3_fused_kernel, s=s, pad=pad,
                             H=H, W=W, Ho=Ho, Wo=Wo, C=C)
    return pl.pallas_call(
        kern,
        grid=(Nb,),
        in_specs=[
            pl.BlockSpec((None, H // s, s, W // s, s * C),
                         lambda n: (n, 0, 0, 0, 0)),
            pl.BlockSpec((1, s * C), lambda n: (0, 0)),
            pl.BlockSpec((1, s * C), lambda n: (0, 0)),
            pl.BlockSpec((3, 3 * C, C), lambda n: (0, 0, 0)),
        ],
        out_specs=[
            pl.BlockSpec((None, Ho * Wo, C), lambda n: (n, 0, 0)),
            pl.BlockSpec((None, 1, C), lambda n: (n, 0, 0)),
            pl.BlockSpec((None, 1, C), lambda n: (n, 0, 0)),
        ],
        out_shape=[
            jax.ShapeDtypeStruct((Nb, Ho * Wo, C), jnp.bfloat16),
            jax.ShapeDtypeStruct((Nb, 1, C), jnp.float32),
            jax.ShapeDtypeStruct((Nb, 1, C), jnp.float32),
        ],
        scratch_shapes=[pltpu.VMEM((s, s, Hq, Wq, C), jnp.float32)],
        compiler_params=pltpu.CompilerParams(
            dimension_semantics=("parallel",), vmem_limit_bytes=VMEM_LIMIT),
    )(y1r, sc1t, bi1t, w2p)


def block3_shortcut(y2, sc2, bi2, w3, x6, wsc, *, cin):
    Nb, m_img, cmid = y2.shape
    cexp = w3.shape[1]
    _, Ho, _, Wo, sc_in = x6.shape
    kern = functools.partial(_block3_shortcut_kernel, cin=cin)
    stat_spec = pl.BlockSpec((None, 1, cexp), lambda n: (n, 0, 0))
    stat_shape = jax.ShapeDtypeStruct((Nb, 1, cexp), jnp.float32)
    return pl.pallas_call(
        kern,
        grid=(Nb,),
        in_specs=[
            pl.BlockSpec((None, m_img, cmid), lambda n: (n, 0, 0)),
            pl.BlockSpec((1, cmid), lambda n: (0, 0)),
            pl.BlockSpec((1, cmid), lambda n: (0, 0)),
            pl.BlockSpec((cmid, cexp), lambda n: (0, 0)),
            pl.BlockSpec((None, Ho, None, Wo, sc_in), lambda n: (n, 0, 0, 0, 0)),
            pl.BlockSpec((cin, cexp), lambda n: (0, 0)),
        ],
        out_specs=[
            pl.BlockSpec((None, m_img, cexp), lambda n: (n, 0, 0)),
            pl.BlockSpec((None, m_img, cexp), lambda n: (n, 0, 0)),
            stat_spec, stat_spec, stat_spec, stat_spec,
        ],
        out_shape=[
            jax.ShapeDtypeStruct((Nb, m_img, cexp), jnp.bfloat16),
            jax.ShapeDtypeStruct((Nb, m_img, cexp), jnp.bfloat16),
            stat_shape, stat_shape, stat_shape, stat_shape,
        ],
        compiler_params=pltpu.CompilerParams(
            dimension_semantics=("parallel",), vmem_limit_bytes=VMEM_LIMIT),
    )(y2, sc2, bi2, w3, x6, wsc)


def block3_plain(y2, sc2, bi2, w3):
    Nb, m_img, cmid = y2.shape
    cexp = w3.shape[1]
    stat_spec = pl.BlockSpec((None, 1, cexp), lambda n: (n, 0, 0))
    stat_shape = jax.ShapeDtypeStruct((Nb, 1, cexp), jnp.float32)
    return pl.pallas_call(
        _block3_plain_kernel,
        grid=(Nb,),
        in_specs=[
            pl.BlockSpec((None, m_img, cmid), lambda n: (n, 0, 0)),
            pl.BlockSpec((1, cmid), lambda n: (0, 0)),
            pl.BlockSpec((1, cmid), lambda n: (0, 0)),
            pl.BlockSpec((cmid, cexp), lambda n: (0, 0)),
        ],
        out_specs=[
            pl.BlockSpec((None, m_img, cexp), lambda n: (n, 0, 0)),
            stat_spec, stat_spec,
        ],
        out_shape=[
            jax.ShapeDtypeStruct((Nb, m_img, cexp), jnp.bfloat16),
            stat_shape, stat_shape,
        ],
        compiler_params=pltpu.CompilerParams(
            dimension_semantics=("parallel",), vmem_limit_bytes=VMEM_LIMIT),
    )(y2, sc2, bi2, w3)


def norm_add_relu(ya, sa, ba, yb, sb, bb, *, tm, out_dtype=jnp.float32):
    M, N = ya.shape
    return pl.pallas_call(
        _norm_add_relu_kernel,
        grid=(M // tm,),
        in_specs=[
            pl.BlockSpec((tm, N), lambda i: (i, 0)),
            pl.BlockSpec((1, N), lambda i: (0, 0)),
            pl.BlockSpec((1, N), lambda i: (0, 0)),
            pl.BlockSpec((tm, N), lambda i: (i, 0)),
            pl.BlockSpec((1, N), lambda i: (0, 0)),
            pl.BlockSpec((1, N), lambda i: (0, 0)),
        ],
        out_specs=pl.BlockSpec((tm, N), lambda i: (i, 0)),
        out_shape=jax.ShapeDtypeStruct((M, N), out_dtype),
        compiler_params=pltpu.CompilerParams(
            dimension_semantics=("parallel",), vmem_limit_bytes=VMEM_LIMIT),
    )(ya, sa, ba, yb, sb, bb)


# ------------------------------- parameters -------------------------------- #

def init_params(key, in_channels, out_channels):
    cexp = EXPANSION * out_channels
    ks = jax.random.split(key, 12)

    def w_init(k, shape):
        return jax.random.normal(k, shape, jnp.float32) * 0.1

    def bn_init(kg, kb, c):
        return (jax.random.uniform(kg, (c,), jnp.float32, 0.5, 1.5),
                jax.random.normal(kb, (c,), jnp.float32) * 0.1)

    p = {}
    p["w1"] = w_init(ks[0], (in_channels, out_channels))            # 1x1, in->mid
    p["g1"], p["b1"] = bn_init(ks[1], ks[2], out_channels)
    p["w2"] = w_init(ks[3], (3, 3, out_channels, out_channels))     # 3x3, HWIO
    p["g2"], p["b2"] = bn_init(ks[4], ks[5], out_channels)
    p["w3"] = w_init(ks[6], (out_channels, cexp))                   # 1x1, mid->4*mid
    p["g3"], p["b3"] = bn_init(ks[7], ks[8], cexp)
    p["wsc"] = w_init(ks[9], (in_channels, cexp))                   # shortcut 1x1
    p["gsc"], p["bsc"] = bn_init(ks[10], ks[11], cexp)
    return p


# --------------------------------- forward --------------------------------- #

def bottleneck_forward(x_nchw, params, *, in_channels, out_channels, stride):
    cexp = EXPANSION * out_channels
    cin_p = _round_up(in_channels, LANE)
    cmid_p = _round_up(out_channels, LANE)
    cexp_p = _round_up(cexp, LANE)

    # Boundary layout change: NCHW (PyTorch) -> NHWC; pad channels; bf16.
    # (When bottleneck blocks are chained, activations would stay NHWC / bf16 /
    #  channel-padded between blocks and these transposes / pads disappear.)
    x = jnp.transpose(x_nchw, (0, 2, 3, 1))
    Nb, H, W, Cin = x.shape
    assert Cin == in_channels
    x = jnp.pad(x, ((0, 0), (0, 0), (0, 0), (0, cin_p - Cin))).astype(jnp.bfloat16)

    # Pad / cast parameters (production code would pre-pad these once, offline).
    w1 = _pad_mat(params["w1"], cin_p, cmid_p).astype(jnp.bfloat16)
    g1, b1 = _pad_vec(params["g1"], cmid_p, 1.0), _pad_vec(params["b1"], cmid_p)
    w2 = jnp.pad(params["w2"], ((0, 0), (0, 0),
                                (0, cmid_p - out_channels), (0, cmid_p - out_channels)))
    w2p = w2.reshape(3, 3 * cmid_p, cmid_p).astype(jnp.bfloat16)     # row-packed taps
    g2, b2 = _pad_vec(params["g2"], cmid_p, 1.0), _pad_vec(params["b2"], cmid_p)
    w3 = _pad_mat(params["w3"], cmid_p, cexp_p).astype(jnp.bfloat16)
    g3, b3 = _pad_vec(params["g3"], cexp_p, 1.0), _pad_vec(params["b3"], cexp_p)

    k, pad_, s = 3, 1, stride
    Ho = (H + 2 * pad_ - k) // s + 1
    Wo = (W + 2 * pad_ - k) // s + 1
    # TODO(synk): odd spatial sizes with stride>1 need a cropped fallback path.
    assert H % s == 0 and W % s == 0 and H == Ho * s and W == Wo * s

    # ---- block1: 1x1 conv + per-tile BN partial stats (one HBM pass) ----
    M1 = Nb * H * W
    tm1 = _pick_tile(M1)
    y1, s1p, q1p = conv1x1_stats(x.reshape(M1, cin_p), w1, tm=tm1)
    sc1, bi1 = _bn_scale_bias(s1p.sum(axis=0), q1p.sum(axis=0), g1, b1, M1)

    # ---- block2: 3x3 conv fused with BN1+ReLU, in-kernel pad + phase split ----
    # Free reshape: pack the W stride-phase into lanes so the kernel never needs
    # strided slicing; the halo padding lives only in VMEM scratch.
    y1r = y1.reshape(Nb, H // s, s, W // s, s * cmid_p)
    sc1t = jnp.tile(sc1, (1, s))
    bi1t = jnp.tile(bi1, (1, s))
    y2, s2p, q2p = conv3x3_fused(y1r, sc1t, bi1t, w2p, s=s, pad=pad_,
                                 H=H, W=W, Ho=Ho, Wo=Wo, C=cmid_p)
    M2 = Nb * Ho * Wo
    sc2, bi2 = _bn_scale_bias(s2p.sum(axis=0), q2p.sum(axis=0), g2, b2, M2)

    tm2 = _pick_tile(M2)
    # ---- block3 (+ shortcut), BN2+ReLU fused on input; final fused epilogue ----
    if stride != 1 or in_channels != cexp:
        wsc = _pad_mat(params["wsc"], cin_p, cexp_p).astype(jnp.bfloat16)
        gsc, bsc = _pad_vec(params["gsc"], cexp_p, 1.0), _pad_vec(params["bsc"], cexp_p)
        # Free reshape: the shortcut's strided subsample becomes "select stride
        # phase (0,0)" inside the block-3 kernel's BlockSpec (no XLA gather).
        x6 = x.reshape(Nb, Ho, s, Wo, s * cin_p)
        y3, ysc, s3p, q3p, ssp, qsp = block3_shortcut(
            y2, sc2, bi2, w3, x6, wsc, cin=cin_p)
        sc3, bi3 = _bn_scale_bias(s3p.sum(axis=0), q3p.sum(axis=0), g3, b3, M2)
        scs, bis = _bn_scale_bias(ssp.sum(axis=0), qsp.sum(axis=0), gsc, bsc, M2)
        out3 = norm_add_relu(y3.reshape(M2, cexp_p), sc3, bi3,
                             ysc.reshape(M2, cexp_p), scs, bis, tm=tm2)
    else:
        y3, s3p, q3p = block3_plain(y2, sc2, bi2, w3)
        sc3, bi3 = _bn_scale_bias(s3p.sum(axis=0), q3p.sum(axis=0), g3, b3, M2)
        res = x.reshape(M2, cin_p)                      # identity (cin_p == cexp_p)
        unit = jnp.ones((1, cexp_p), jnp.float32)
        zero = jnp.zeros((1, cexp_p), jnp.float32)
        out3 = norm_add_relu(y3.reshape(M2, cexp_p), sc3, bi3, res, unit, zero, tm=tm2)

    out3 = out3.reshape(Nb, Ho, Wo, cexp_p)[..., :cexp]  # drop channel padding
    return jnp.transpose(out3, (0, 3, 1, 2))             # NHWC -> NCHW boundary


# ---------------------------------- main ----------------------------------- #

if __name__ == "__main__":
    key = jax.random.PRNGKey(0)
    k_x, k_p = jax.random.split(key)

    in_channels, out_channels, stride = 4, 8, 2
    x = jax.random.normal(k_x, (2, in_channels, 16, 16), jnp.float32)  # NCHW
    params = init_params(k_p, in_channels, out_channels)

    fwd = jax.jit(functools.partial(bottleneck_forward,
                                    in_channels=in_channels,
                                    out_channels=out_channels,
                                    stride=stride))
    y = jax.block_until_ready(fwd(x, params))

    expected = (2, EXPANSION * out_channels, 16 // stride, 16 // stride)
    assert y.shape == expected, (y.shape, expected)
    assert y.dtype == jnp.float32
    assert bool(jnp.all(jnp.isfinite(y))), "output must be finite"
    assert bool(jnp.all(y >= 0.0)), "ReLU output must be non-negative"
    print("KERNEL_OK")
</pallas_src>

<mosaic_0001>
module attributes {stable_mosaic.version = 11 : i64} {
  func.func @_conv1x1_stats_kernel(%arg0: i32, %arg1: memref<512x128xbf16, #tpu.memory_space<vmem>>, %arg2: memref<128x128xbf16, #tpu.memory_space<vmem>>, %arg3: memref<512x128xbf16, #tpu.memory_space<vmem>>, %arg4: memref<1x1x128xf32, #tpu.memory_space<vmem>>, %arg5: memref<1x1x128xf32, #tpu.memory_space<vmem>>) attributes {dimension_semantics = [#tpu.dimension_semantics<parallel>], iteration_bounds = array<i64: 1>, scalar_prefetch = 0 : i64, scratch_operands = 0 : i64, tpu.core_type = #tpu.core_type<tc>, window_params = [{transform_indices = @transform_0, window_bounds = array<i64: 512, 128>}, {pipeline_mode = #tpu.pipeline_mode<synchronous>, transform_indices = @transform_1, window_bounds = array<i64: 128, 128>}, {transform_indices = @transform_2, window_bounds = array<i64: 512, 128>}, {transform_indices = @transform_3, window_bounds = array<i64: 1, 1, 128>}, {transform_indices = @transform_4, window_bounds = array<i64: 1, 1, 128>}]} {
    %c0 = arith.constant 0 : index
    %c0_0 = arith.constant 0 : index
    %0 = vector.load %arg1[%c0, %c0_0] : memref<512x128xbf16, #tpu.memory_space<vmem>>, vector<512x128xbf16>
    %c0_1 = arith.constant 0 : index
    %c0_2 = arith.constant 0 : index
    %1 = vector.load %arg2[%c0_1, %c0_2] : memref<128x128xbf16, #tpu.memory_space<vmem>>, vector<128x128xbf16>
    %cst = arith.constant dense<0.000000e+00> : vector<512x128xf32>
    %2 = tpu.matmul %0, %1, %cst {dimension_numbers = #tpu.dot_dimension_numbers<[1], [0], [0], [1], [0, 0, 1, 1], [], []>} : vector<512x128xbf16>, vector<128x128xbf16>, vector<512x128xf32> -> vector<512x128xf32>
    %3 = arith.truncf %2 : vector<512x128xf32> to vector<512x128xbf16>
    %c0_3 = arith.constant 0 : index
    %c0_4 = arith.constant 0 : index
    %4 = vector.load %arg3[%c0_3, %c0_4] : memref<512x128xbf16, #tpu.memory_space<vmem>>, vector<512x128xbf16>
    tpu.vector_store %arg3[%c0_3, %c0_4], %3 {strides = array<i32>} : memref<512x128xbf16, #tpu.memory_space<vmem>>, vector<512x128xbf16>,
    %cst_5 = arith.constant dense<0.000000e+00> : vector<128xf32>
    %5 = vector.multi_reduction <add>, %2, %cst_5 [0] : vector<512x128xf32> to vector<128xf32>
    %6 = vector.shape_cast %5 : vector<128xf32> to vector<1x128xf32>
    %c0_6 = arith.constant 0 : index
    %c0_7 = arith.constant 0 : index
    %c0_8 = arith.constant 0 : index
    %7 = vector.load %arg4[%c0_6, %c0_7, %c0_8] : memref<1x1x128xf32, #tpu.memory_space<vmem>>, vector<1x1x128xf32>
    %8 = vector.shape_cast %7 : vector<1x1x128xf32> to vector<1x128xf32>
    %9 = vector.shape_cast %6 : vector<1x128xf32> to vector<1x1x128xf32>
    tpu.vector_store %arg4[%c0_6, %c0_7, %c0_8], %9 {strides = array<i32>} : memref<1x1x128xf32, #tpu.memory_space<vmem>>, vector<1x1x128xf32>,
    %10 = arith.mulf %2, %2 : vector<512x128xf32>
    %cst_9 = arith.constant dense<0.000000e+00> : vector<128xf32>
    %11 = vector.multi_reduction <add>, %10, %cst_9 [0] : vector<512x128xf32> to vector<128xf32>
    %12 = vector.shape_cast %11 : vector<128xf32> to vector<1x128xf32>
    %c0_10 = arith.constant 0 : index
    %c0_11 = arith.constant 0 : index
    %c0_12 = arith.constant 0 : index
    %13 = vector.load %arg5[%c0_10, %c0_11, %c0_12] : memref<1x1x128xf32, #tpu.memory_space<vmem>>, vector<1x1x128xf32>
    %14 = vector.shape_cast %13 : vector<1x1x128xf32> to vector<1x128xf32>
    %15 = vector.shape_cast %12 : vector<1x128xf32> to vector<1x1x128xf32>
    tpu.vector_store %arg5[%c0_10, %c0_11, %c0_12], %15 {strides = array<i32>} : memref<1x1x128xf32, #tpu.memory_space<vmem>>, vector<1x1x128xf32>,
    return
  }
  func.func @transform_0(%arg0: i32) -> (i32, i32) {
    %c0_i32 = arith.constant 0 : i32
    %c0_i32_0 = arith.constant 0 : i32
    return %arg0, %c0_i32 : i32, i32
  }
  func.func @transform_1(%arg0: i32) -> (i32, i32) {
    %c0_i32 = arith.constant 0 : i32
    %c0_i32_0 = arith.constant 0 : i32
    %c0_i32_1 = arith.constant 0 : i32
    return %c0_i32, %c0_i32_0 : i32, i32
  }
  func.func @transform_2(%arg0: i32) -> (i32, i32) {
    %c0_i32 = arith.constant 0 : i32
    %c0_i32_0 = arith.constant 0 : i32
    return %arg0, %c0_i32 : i32, i32
  }
  func.func @transform_3(%arg0: i32) -> (i32, i32, i32) {
    %c0_i32 = arith.constant 0 : i32
    %c0_i32_0 = arith.constant 0 : i32
    %c0_i32_1 = arith.constant 0 : i32
    return %arg0, %c0_i32, %c0_i32_0 : i32, i32, i32
  }
  func.func @transform_4(%arg0: i32) -> (i32, i32, i32) {
    %c0_i32 = arith.constant 0 : i32
    %c0_i32_0 = arith.constant 0 : i32
    %c0_i32_1 = arith.constant 0 : i32
    return %arg0, %c0_i32, %c0_i32_0 : i32, i32, i32
  }
}

module attributes {stable_mosaic.version = 11 : i64} {
  func.func @_conv3x3_fused_kernel(%arg0: i32, %arg1: memref<1x8x2x8x256xbf16, #tpu.memory_space<vmem>>, %arg2: memref<1x256xf32, #tpu.memory_space<vmem>>, %arg3: memref<1x256xf32, #tpu.memory_space<vmem>>, %arg4: memref<3x384x128xbf16, #tpu.memory_space<vmem>>, %arg5: memref<1x64x128xbf16, #tpu.memory_space<vmem>>, %arg6: memref<1x1x128xf32, #tpu.memory_space<vmem>>, %arg7: memref<1x1x128xf32, #tpu.memory_space<vmem>>, %arg8: memref<2x2x9x9x128xf32, #tpu.memory_space<vmem>>) attributes {dimension_semantics = [#tpu.dimension_semantics<parallel>], iteration_bounds = array<i64: 2>, scalar_prefetch = 0 : i64, scratch_operands = 1 : i64, tpu.core_type = #tpu.core_type<tc>, window_params = [{transform_indices = @transform_0, window_bounds = array<i64: 1, 8, 2, 8, 256>}, {pipeline_mode = #tpu.pipeline_mode<synchronous>, transform_indices = @transform_1, window_bounds = array<i64: 1, 256>}, {pipeline_mode = #tpu.pipeline_mode<synchronous>, transform_indices = @transform_2, window_bounds = array<i64: 1, 256>}, {pipeline_mode = #tpu.pipeline_mode<synchronous>, transform_indices = @transform_3, window_bounds = array<i64: 3, 384, 128>}, {transform_indices = @transform_4, window_bounds = array<i64: 1, 64, 128>}, {transform_indices = @transform_5, window_bounds = array<i64: 1, 1, 128>}, {transform_indices = @transform_6, window_bounds = array<i64: 1, 1, 128>}]} {
    %cst = arith.constant 0.000000e+00 : f32
    %0 = vector.broadcast %cst : f32 to vector<2x2x9x9x128xf32>
    %c0 = arith.constant 0 : index
    %c0_0 = arith.constant 0 : index
    %c0_1 = arith.constant 0 : index
    %c0_2 = arith.constant 0 : index
    %c0_3 = arith.constant 0 : index
    %1 = vector.load %arg8[%c0, %c0_0, %c0_1, %c0_2, %c0_3] : memref<2x2x9x9x128xf32, #tpu.memory_space<vmem>>, vector<2x2x9x9x128xf32>
    tpu.vector_store %arg8[%c0, %c0_0, %c0_1, %c0_2, %c0_3], %0 {strides = array<i32>} : memref<2x2x9x9x128xf32, #tpu.memory_space<vmem>>, vector<2x2x9x9x128xf32>,
    %c0_4 = arith.constant 0 : index
    %c0_5 = arith.constant 0 : index
    %c0_6 = arith.constant 0 : index
    %c0_7 = arith.constant 0 : index
    %c0_8 = arith.constant 0 : index
    %2 = vector.load %arg1[%c0_4, %c0_5, %c0_6, %c0_7, %c0_8] : memref<1x8x2x8x256xbf16, #tpu.memory_space<vmem>>, vector<1x8x2x8x256xbf16>
    %3 = vector.shape_cast %2 : vector<1x8x2x8x256xbf16> to vector<8x2x8x256xbf16>
    %4 = arith.extf %3 : vector<8x2x8x256xbf16> to vector<8x2x8x256xf32>
    %c0_9 = arith.constant 0 : index
    %c0_10 = arith.constant 0 : index
    %5 = vector.load %arg2[%c0_9, %c0_10] : memref<1x256xf32, #tpu.memory_space<vmem>>, vector<1x256xf32>
    %6 = vector.shape_cast %5 : vector<1x256xf32> to vector<1x1x1x256xf32>
    %7 = vector.broadcast %6 : vector<1x1x1x256xf32> to vector<8x2x8x256xf32>
    %8 = arith.mulf %4, %7 : vector<8x2x8x256xf32>
    %c0_11 = arith.constant 0 : index
    %c0_12 = arith.constant 0 : index
    %9 = vector.load %arg3[%c0_11, %c0_12] : memref<1x256xf32, #tpu.memory_space<vmem>>, vector<1x256xf32>
    %10 = vector.shape_cast %9 : vector<1x256xf32> to vector<1x1x1x256xf32>
    %11 = vector.broadcast %10 : vector<1x1x1x256xf32> to vector<8x2x8x256xf32>
    %12 = arith.addf %8, %11 : vector<8x2x8x256xf32>
    %cst_13 = arith.constant 0.000000e+00 : f32
    %13 = vector.broadcast %cst_13 : f32 to vector<8x2x8x256xf32>
    %14 = arith.maximumf %12, %13 : vector<8x2x8x256xf32>
    %15 = vector.extract_strided_slice %14 {offsets = [0, 0, 0, 0], sizes = [8, 1, 8, 128], strides = [1, 1, 1, 1]} : vector<8x2x8x256xf32> to vector<8x1x8x128xf32>
    %16 = vector.shape_cast %15 : vector<8x1x8x128xf32> to vector<8x8x128xf32>
    %c1 = arith.constant 1 : index
    %c1_14 = arith.constant 1 : index
    %c0_15 = arith.constant 0 : index
    %c0_16 = arith.constant 0 : index
    %c0_17 = arith.constant 0 : index
    %17 = vector.load %arg8[%c1, %c1_14, %c0_15, %c0_16, %c0_17] : memref<2x2x9x9x128xf32, #tpu.memory_space<vmem>>, vector<1x1x8x8x128xf32>
    %18 = vector.shape_cast %17 : vector<1x1x8x8x128xf32> to vector<8x8x128xf32>
    %19 = vector.shape_cast %16 : vector<8x8x128xf32> to vector<1x1x8x8x128xf32>
    tpu.vector_store %arg8[%c1, %c1_14, %c0_15, %c0_16, %c0_17], %19 {strides = array<i32>} : memref<2x2x9x9x128xf32, #tpu.memory_space<vmem>>, vector<1x1x8x8x128xf32>,
    %20 = vector.extract_strided_slice %14 {offsets = [0, 0, 0, 128], sizes = [8, 1, 8, 128], strides = [1, 1, 1, 1]} : vector<8x2x8x256xf32> to vector<8x1x8x128xf32>
    %21 = vector.shape_cast %20 : vector<8x1x8x128xf32> to vector<8x8x128xf32>
    %c1_18 = arith.constant 1 : index
    %c0_19 = arith.constant 0 : index
    %c0_20 = arith.constant 0 : index
    %c1_21 = arith.constant 1 : index
    %c0_22 = arith.constant 0 : index
    %22 = vector.load %arg8[%c1_18, %c0_19, %c0_20, %c1_21, %c0_22] : memref<2x2x9x9x128xf32, #tpu.memory_space<vmem>>, vector<1x1x8x8x128xf32>
    %23 = vector.shape_cast %22 : vector<1x1x8x8x128xf32> to vector<8x8x128xf32>
    %24 = vector.shape_cast %21 : vector<8x8x128xf32> to vector<1x1x8x8x128xf32>
    tpu.vector_store %arg8[%c1_18, %c0_19, %c0_20, %c1_21, %c0_22], %24 {strides = array<i32>} : memref<2x2x9x9x128xf32, #tpu.memory_space<vmem>>, vector<1x1x8x8x128xf32>,
    %25 = vector.extract_strided_slice %14 {offsets = [0, 1, 0, 0], sizes = [8, 1, 8, 128], strides = [1, 1, 1, 1]} : vector<8x2x8x256xf32> to vector<8x1x8x128xf32>
    %26 = vector.shape_cast %25 : vector<8x1x8x128xf32> to vector<8x8x128xf32>
    %c0_23 = arith.constant 0 : index
    %c1_24 = arith.constant 1 : index
    %c1_25 = arith.constant 1 : index
    %c0_26 = arith.constant 0 : index
    %c0_27 = arith.constant 0 : index
    %27 = vector.load %arg8[%c0_23, %c1_24, %c1_25, %c0_26, %c0_27] : memref<2x2x9x9x128xf32, #tpu.memory_space<vmem>>, vector<1x1x8x8x128xf32>
    %28 = vector.shape_cast %27 : vector<1x1x8x8x128xf32> to vector<8x8x128xf32>
    %29 = vector.shape_cast %26 : vector<8x8x128xf32> to vector<1x1x8x8x128xf32>
    tpu.vector_store %arg8[%c0_23, %c1_24, %c1_25, %c0_26, %c0_27], %29 {strides = array<i32>} : memref<2x2x9x9x128xf32, #tpu.memory_space<vmem>>, vector<1x1x8x8x128xf32>,
    %30 = vector.extract_strided_slice %14 {offsets = [0, 1, 0, 128], sizes = [8, 1, 8, 128], strides = [1, 1, 1, 1]} : vector<8x2x8x256xf32> to vector<8x1x8x128xf32>
    %31 = vector.shape_cast %30 : vector<8x1x8x128xf32> to vector<8x8x128xf32>
    %c0_28 = arith.constant 0 : index
    %c0_29 = arith.constant 0 : index
    %c1_30 = arith.constant 1 : index
    %c1_31 = arith.constant 1 : index
    %c0_32 = arith.constant 0 : index
    %32 = vector.load %arg8[%c0_28, %c0_29, %c1_30, %c1_31, %c0_32] : memref<2x2x9x9x128xf32, #tpu.memory_space<vmem>>, vector<1x1x8x8x128xf32>
    %33 = vector.shape_cast %32 : vector<1x1x8x8x128xf32> to vector<8x8x128xf32>
    %34 = vector.shape_cast %31 : vector<8x8x128xf32> to vector<1x1x8x8x128xf32>
    tpu.vector_store %arg8[%c0_28, %c0_29, %c1_30, %c1_31, %c0_32], %34 {strides = array<i32>} : memref<2x2x9x9x128xf32, #tpu.memory_space<vmem>>, vector<1x1x8x8x128xf32>,
    %cst_33 = arith.constant 0.000000e+00 : f32
    %35 = vector.broadcast %cst_33 : f32 to vector<64x128xf32>
    %c0_34 = arith.constant 0 : index
    %c0_35 = arith.constant 0 : index
    %c0_36 = arith.constant 0 : index
    %c0_37 = arith.constant 0 : index
    %c0_38 = arith.constant 0 : index
    %36 = vector.load %arg8[%c0_34, %c0_35, %c0_36, %c0_37, %c0_38] : memref<2x2x9x9x128xf32, #tpu.memory_space<vmem>>, vector<1x1x8x8x128xf32>
    %37 = vector.shape_cast %36 : vector<1x1x8x8x128xf32> to vector<8x8x128xf32>
    %c0_39 = arith.constant 0 : index
    %c1_40 = arith.constant 1 : index
    %c0_41 = arith.constant 0 : index
    %c0_42 = arith.constant 0 : index
    %c0_43 = arith.constant 0 : index
    %38 = vector.load %arg8[%c0_39, %c1_40, %c0_41, %c0_42, %c0_43] : memref<2x2x9x9x128xf32, #tpu.memory_space<vmem>>, vector<1x1x8x8x128xf32>
    %39 = vector.shape_cast %38 : vector<1x1x8x8x128xf32> to vector<8x8x128xf32>
    %c0_44 = arith.constant 0 : index
    %c0_45 = arith.constant 0 : index
    %c0_46 = arith.constant 0 : index
    %c1_47 = arith.constant 1 : index
    %c0_48 = arith.constant 0 : index
    %40 = vector.load %arg8[%c0_44, %c0_45, %c0_46, %c1_47, %c0_48] : memref<2x2x9x9x128xf32, #tpu.memory_space<vmem>>, vector<1x1x8x8x128xf32>
    %41 = vector.shape_cast %40 : vector<1x1x8x8x128xf32> to vector<8x8x128xf32>
    %42 = tpu.concatenate %37, %39, %41 in 2 : vector<8x8x128xf32>, vector<8x8x128xf32>, vector<8x8x128xf32> -> vector<8x8x384xf32>
    %43 = vector.shape_cast %42 : vector<8x8x384xf32> to vector<64x384xf32>
    %44 = arith.truncf %43 : vector<64x384xf32> to vector<64x384xbf16>
    %c0_49 = arith.constant 0 : index
    %c0_50 = arith.constant 0 : index
    %c0_51 = arith.constant 0 : index
    %45 = vector.load %arg4[%c0_49, %c0_50, %c0_51] : memref<3x384x128xbf16, #tpu.memory_space<vmem>>, vector<1x384x128xbf16>
    %46 = vector.shape_cast %45 : vector<1x384x128xbf16> to vector<384x128xbf16>
    %cst_52 = arith.constant dense<0.000000e+00> : vector<64x128xf32>
    %47 = tpu.matmul %44, %46, %cst_52 {dimension_numbers = #tpu.dot_dimension_numbers<[1], [0], [0], [1], [0, 0, 1, 1], [], []>} : vector<64x384xbf16>, vector<384x128xbf16>, vector<64x128xf32> -> vector<64x128xf32>
    %48 = arith.addf %35, %47 : vector<64x128xf32>
    %c1_53 = arith.constant 1 : index
    %c0_54 = arith.constant 0 : index
    %c0_55 = arith.constant 0 : index
    %c0_56 = arith.constant 0 : index
    %c0_57 = arith.constant 0 : index
    %49 = vector.load %arg8[%c1_53, %c0_54, %c0_55, %c0_56, %c0_57] : memref<2x2x9x9x128xf32, #tpu.memory_space<vmem>>, vector<1x1x8x8x128xf32>
    %50 = vector.shape_cast %49 : vector<1x1x8x8x128xf32> to vector<8x8x128xf32>
    %c1_58 = arith.constant 1 : index
    %c1_59 = arith.constant 1 : index
    %c0_60 = arith.constant 0 : index
    %c0_61 = arith.constant 0 : index
    %c0_62 = arith.constant 0 : index
    %51 = vector.load %arg8[%c1_58, %c1_59, %c0_60, %c0_61, %c0_62] : memref<2x2x9x9x128xf32, #tpu.memory_space<vmem>>, vector<1x1x8x8x128xf32>
    %52 = vector.shape_cast %51 : vector<1x1x8x8x128xf32> to vector<8x8x128xf32>
    %c1_63 = arith.constant 1 : index
    %c0_64 = arith.constant 0 : index
    %c0_65 = arith.constant 0 : index
    %c1_66 = arith.constant 1 : index
    %c0_67 = arith.constant 0 : index
    %53 = vector.load %arg8[%c1_63, %c0_64, %c0_65, %c1_66, %c0_67] : memref<2x2x9x9x128xf32, #tpu.memory_space<vmem>>, vector<1x1x8x8x128xf32>
    %54 = vector.shape_cast %53 : vector<1x1x8x8x128xf32> to vector<8x8x128xf32>
    %55 = tpu.concatenate %50, %52, %54 in 2 : vector<8x8x128xf32>, vector<8x8x128xf32>, vector<8x8x128xf32> -> vector<8x8x384xf32>
    %56 = vector.shape_cast %55 : vector<8x8x384xf32> to vector<64x384xf32>
    %57 = arith.truncf %56 : vector<64x384xf32> to vector<64x384xbf16>
    %c1_68 = arith.constant 1 : index
    %c0_69 = arith.constant 0 : index
    %c0_70 = arith.constant 0 : index
    %58 = vector.load %arg4[%c1_68, %c0_69, %c0_70] : memref<3x384x128xbf16, #tpu.memory_space<vmem>>, vector<1x384x128xbf16>
    %59 = vector.shape_cast %58 : vector<1x384x128xbf16> to vector<384x128xbf16>
    %cst_71 = arith.constant dense<0.000000e+00> : vector<64x128xf32>
    %60 = tpu.matmul %57, %59, %cst_71 {dimension_numbers = #tpu.dot_dimension_numbers<[1], [0], [0], [1], [0, 0, 1, 1], [], []>} : vector<64x384xbf16>, vector<384x128xbf16>, vector<64x128xf32> -> vector<64x128xf32>
    %61 = arith.addf %48, %60 : vector<64x128xf32>
    %c0_72 = arith.constant 0 : index
    %c0_73 = arith.constant 0 : index
    %c1_74 = arith.constant 1 : index
    %c0_75 = arith.constant 0 : index
    %c0_76 = arith.constant 0 : index
    %62 = vector.load %arg8[%c0_72, %c0_73, %c1_74, %c0_75, %c0_76] : memref<2x2x9x9x128xf32, #tpu.memory_space<vmem>>, vector<1x1x8x8x128xf32>
    %63 = vector.shape_cast %62 : vector<1x1x8x8x128xf32> to vector<8x8x128xf32>
    %c0_77 = arith.constant 0 : index
    %c1_78 = arith.constant 1 : index
    %c1_79 = arith.constant 1 : index
    %c0_80 = arith.constant 0 : index
    %c0_81 = arith.constant 0 : index
    %64 = vector.load %arg8[%c0_77, %c1_78, %c1_79, %c0_80, %c0_81] : memref<2x2x9x9x128xf32, #tpu.memory_space<vmem>>, vector<1x1x8x8x128xf32>
    %65 = vector.shape_cast %64 : vector<1x1x8x8x128xf32> to vector<8x8x128xf32>
    %c0_82 = arith.constant 0 : index
    %c0_83 = arith.constant 0 : index
    %c1_84 = arith.constant 1 : index
    %c1_85 = arith.constant 1 : index
    %c0_86 = arith.constant 0 : index
    %66 = vector.load %arg8[%c0_82, %c0_83, %c1_84, %c1_85, %c0_86] : memref<2x2x9x9x128xf32, #tpu.memory_space<vmem>>, vector<1x1x8x8x128xf32>
    %67 = vector.shape_cast %66 : vector<1x1x8x8x128xf32> to vector<8x8x128xf32>
    %68 = tpu.concatenate %63, %65, %67 in 2 : vector<8x8x128xf32>, vector<8x8x128xf32>, vector<8x8x128xf32> -> vector<8x8x384xf32>
    %69 = vector.shape_cast %68 : vector<8x8x384xf32> to vector<64x384xf32>
    %70 = arith.truncf %69 : vector<64x384xf32> to vector<64x384xbf16>
    %c2 = arith.constant 2 : index
    %c0_87 = arith.constant 0 : index
    %c0_88 = arith.constant 0 : index
    %71 = vector.load %arg4[%c2, %c0_87, %c0_88] : memref<3x384x128xbf16, #tpu.memory_space<vmem>>, vector<1x384x128xbf16>
    %72 = vector.shape_cast %71 : vector<1x384x128xbf16> to vector<384x128xbf16>
    %cst_89 = arith.constant dense<0.000000e+00> : vector<64x128xf32>
    %73 = tpu.matmul %70, %72, %cst_89 {dimension_numbers = #tpu.dot_dimension_numbers<[1], [0], [0], [1], [0, 0, 1, 1], [], []>} : vector<64x384xbf16>, vector<384x128xbf16>, vector<64x128xf32> -> vector<64x128xf32>
    %74 = arith.addf %61, %73 : vector<64x128xf32>
    %75 = arith.truncf %74 : vector<64x128xf32> to vector<64x128xbf16>
    %c0_90 = arith.constant 0 : index
    %c0_91 = arith.constant 0 : index
    %c0_92 = arith.constant 0 : index
    %76 = vector.load %arg5[%c0_90, %c0_91, %c0_92] : memref<1x64x128xbf16, #tpu.memory_space<vmem>>, vector<1x64x128xbf16>
    %77 = vector.shape_cast %76 : vector<1x64x128xbf16> to vector<64x128xbf16>
    %78 = vector.shape_cast %75 : vector<64x128xbf16> to vector<1x64x128xbf16>
    tpu.vector_store %arg5[%c0_90, %c0_91, %c0_92], %78 {strides = array<i32>} : memref<1x64x128xbf16, #tpu.memory_space<vmem>>, vector<1x64x128xbf16>,
    %cst_93 = arith.constant dense<0.000000e+00> : vector<128xf32>
    %79 = vector.multi_reduction <add>, %74, %cst_93 [0] : vector<64x128xf32> to vector<128xf32>
    %80 = vector.shape_cast %79 : vector<128xf32> to vector<1x128xf32>
    %c0_94 = arith.constant 0 : index
    %c0_95 = arith.constant 0 : index
    %c0_96 = arith.constant 0 : index
    %81 = vector.load %arg6[%c0_94, %c0_95, %c0_96] : memref<1x1x128xf32, #tpu.memory_space<vmem>>, vector<1x1x128xf32>
    %82 = vector.shape_cast %81 : vector<1x1x128xf32> to vector<1x128xf32>
    %83 = vector.shape_cast %80 : vector<1x128xf32> to vector<1x1x128xf32>
    tpu.vector_store %arg6[%c0_94, %c0_95, %c0_96], %83 {strides = array<i32>} : memref<1x1x128xf32, #tpu.memory_space<vmem>>, vector<1x1x128xf32>,
    %84 = arith.mulf %74, %74 : vector<64x128xf32>
    %cst_97 = arith.constant dense<0.000000e+00> : vector<128xf32>
    %85 = vector.multi_reduction <add>, %84, %cst_97 [0] : vector<64x128xf32> to vector<128xf32>
    %86 = vector.shape_cast %85 : vector<128xf32> to vector<1x128xf32>
    %c0_98 = arith.constant 0 : index
    %c0_99 = arith.constant 0 : index
    %c0_100 = arith.constant 0 : index
    %87 = vector.load %arg7[%c0_98, %c0_99, %c0_100] : memref<1x1x128xf32, #tpu.memory_space<vmem>>, vector<1x1x128xf32>
    %88 = vector.shape_cast %87 : vector<1x1x128xf32> to vector<1x128xf32>
    %89 = vector.shape_cast %86 : vector<1x128xf32> to vector<1x1x128xf32>
    tpu.vector_store %arg7[%c0_98, %c0_99, %c0_100], %89 {strides = array<i32>} : memref<1x1x128xf32, #tpu.memory_space<vmem>>, vector<1x1x128xf32>,
    return
  }
  func.func @transform_0(%arg0: i32) -> (i32, i32, i32, i32, i32) {
    %c0_i32 = arith.constant 0 : i32
    %c0_i32_0 = arith.constant 0 : i32
    %c0_i32_1 = arith.constant 0 : i32
    %c0_i32_2 = arith.constant 0 : i32
    %c0_i32_3 = arith.constant 0 : i32
    return %arg0, %c0_i32, %c0_i32_0, %c0_i32_1, %c0_i32_2 : i32, i32, i32, i32, i32
  }
  func.func @transform_1(%arg0: i32) -> (i32, i32) {
    %c0_i32 = arith.constant 0 : i32
    %c0_i32_0 = arith.constant 0 : i32
    %c0_i32_1 = arith.constant 0 : i32
    return %c0_i32, %c0_i32_0 : i32, i32
  }
  func.func @transform_2(%arg0: i32) -> (i32, i32) {
    %c0_i32 = arith.constant 0 : i32
    %c0_i32_0 = arith.constant 0 : i32
    %c0_i32_1 = arith.constant 0 : i32
    return %c0_i32, %c0_i32_0 : i32, i32
  }
  func.func @transform_3(%arg0: i32) -> (i32, i32, i32) {
    %c0_i32 = arith.constant 0 : i32
    %c0_i32_0 = arith.constant 0 : i32
    %c0_i32_1 = arith.constant 0 : i32
    %c0_i32_2 = arith.constant 0 : i32
    return %c0_i32, %c0_i32_0, %c0_i32_1 : i32, i32, i32
  }
  func.func @transform_4(%arg0: i32) -> (i32, i32, i32) {
    %c0_i32 = arith.constant 0 : i32
    %c0_i32_0 = arith.constant 0 : i32
    %c0_i32_1 = arith.constant 0 : i32
    return %arg0, %c0_i32, %c0_i32_0 : i32, i32, i32
  }
  func.func @transform_5(%arg0: i32) -> (i32, i32, i32) {
    %c0_i32 = arith.constant 0 : i32
    %c0_i32_0 = arith.constant 0 : i32
    %c0_i32_1 = arith.constant 0 : i32
    return %arg0, %c0_i32, %c0_i32_0 : i32, i32, i32
  }
  func.func @transform_6(%arg0: i32) -> (i32, i32, i32) {
    %c0_i32 = arith.constant 0 : i32
    %c0_i32_0 = arith.constant 0 : i32
    %c0_i32_1 = arith.constant 0 : i32
    return %arg0, %c0_i32, %c0_i32_0 : i32, i32, i32
  }
}

module attributes {stable_mosaic.version = 11 : i64} {
  func.func @_block3_shortcut_kernel(%arg0: i32, %arg1: memref<1x64x128xbf16, #tpu.memory_space<vmem>>, %arg2: memref<1x128xf32, #tpu.memory_space<vmem>>, %arg3: memref<1x128xf32, #tpu.memory_space<vmem>>, %arg4: memref<128x128xbf16, #tpu.memory_space<vmem>>, %arg5: memref<1x8x1x8x256xbf16, #tpu.memory_space<vmem>>, %arg6: memref<128x128xbf16, #tpu.memory_space<vmem>>, %arg7: memref<1x64x128xbf16, #tpu.memory_space<vmem>>, %arg8: memref<1x64x128xbf16, #tpu.memory_space<vmem>>, %arg9: memref<1x1x128xf32, #tpu.memory_space<vmem>>, %arg10: memref<1x1x128xf32, #tpu.memory_space<vmem>>, %arg11: memref<1x1x128xf32, #tpu.memory_space<vmem>>, %arg12: memref<1x1x128xf32, #tpu.memory_space<vmem>>) attributes {dimension_semantics = [#tpu.dimension_semantics<parallel>], iteration_bounds = array<i64: 2>, scalar_prefetch = 0 : i64, scratch_operands = 0 : i64, tpu.core_type = #tpu.core_type<tc>, window_params = [{transform_indices = @transform_0, window_bounds = array<i64: 1, 64, 128>}, {pipeline_mode = #tpu.pipeline_mode<synchronous>, transform_indices = @transform_1, window_bounds = array<i64: 1, 128>}, {pipeline_mode = #tpu.pipeline_mode<synchronous>, transform_indices = @transform_2, window_bounds = array<i64: 1, 128>}, {pipeline_mode = #tpu.pipeline_mode<synchronous>, transform_indices = @transform_3, window_bounds = array<i64: 128, 128>}, {transform_indices = @transform_4, window_bounds = array<i64: 1, 8, 1, 8, 256>}, {pipeline_mode = #tpu.pipeline_mode<synchronous>, transform_indices = @transform_5, window_bounds = array<i64: 128, 128>}, {transform_indices = @transform_6, window_bounds = array<i64: 1, 64, 128>}, {transform_indices = @transform_7, window_bounds = array<i64: 1, 64, 128>}, {transform_indices = @transform_8, window_bounds = array<i64: 1, 1, 128>}, {transform_indices = @transform_9, window_bounds = array<i64: 1, 1, 128>}, {transform_indices = @transform_10, window_bounds = array<i64: 1, 1, 128>}, {transform_indices = @transform_11, window_bounds = array<i64: 1, 1, 128>}]} {
    %c0 = arith.constant 0 : index
    %c0_0 = arith.constant 0 : index
    %c0_1 = arith.constant 0 : index
    %0 = vector.load %arg1[%c0, %c0_0, %c0_1] : memref<1x64x128xbf16, #tpu.memory_space<vmem>>, vector<1x64x128xbf16>
    %1 = vector.shape_cast %0 : vector<1x64x128xbf16> to vector<64x128xbf16>
    %2 = arith.extf %1 : vector<64x128xbf16> to vector<64x128xf32>
    %c0_2 = arith.constant 0 : index
    %c0_3 = arith.constant 0 : index
    %3 = vector.load %arg2[%c0_2, %c0_3] : memref<1x128xf32, #tpu.memory_space<vmem>>, vector<1x128xf32>
    %4 = vector.broadcast %3 : vector<1x128xf32> to vector<64x128xf32>
    %5 = arith.mulf %2, %4 : vector<64x128xf32>
    %c0_4 = arith.constant 0 : index
    %c0_5 = arith.constant 0 : index
    %6 = vector.load %arg3[%c0_4, %c0_5] : memref<1x128xf32, #tpu.memory_space<vmem>>, vector<1x128xf32>
    %7 = vector.broadcast %6 : vector<1x128xf32> to vector<64x128xf32>
    %8 = arith.addf %5, %7 : vector<64x128xf32>
    %cst = arith.constant 0.000000e+00 : f32
    %9 = vector.broadcast %cst : f32 to vector<64x128xf32>
    %10 = arith.maximumf %8, %9 : vector<64x128xf32>
    %11 = arith.truncf %10 : vector<64x128xf32> to vector<64x128xbf16>
    %c0_6 = arith.constant 0 : index
    %c0_7 = arith.constant 0 : index
    %12 = vector.load %arg4[%c0_6, %c0_7] : memref<128x128xbf16, #tpu.memory_space<vmem>>, vector<128x128xbf16>
    %cst_8 = arith.constant dense<0.000000e+00> : vector<64x128xf32>
    %13 = tpu.matmul %11, %12, %cst_8 {dimension_numbers = #tpu.dot_dimension_numbers<[1], [0], [0], [1], [0, 0, 1, 1], [], []>} : vector<64x128xbf16>, vector<128x128xbf16>, vector<64x128xf32> -> vector<64x128xf32>
    %c0_9 = arith.constant 0 : index
    %c0_10 = arith.constant 0 : index
    %c0_11 = arith.constant 0 : index
    %c0_12 = arith.constant 0 : index
    %c0_13 = arith.constant 0 : index
    %14 = vector.load %arg5[%c0_9, %c0_10, %c0_11, %c0_12, %c0_13] : memref<1x8x1x8x256xbf16, #tpu.memory_space<vmem>>, vector<1x8x1x8x256xbf16>
    %15 = vector.shape_cast %14 : vector<1x8x1x8x256xbf16> to vector<8x8x256xbf16>
    %16 = vector.extract_strided_slice %15 {offsets = [0, 0, 0], sizes = [8, 8, 128], strides = [1, 1, 1]} : vector<8x8x256xbf16> to vector<8x8x128xbf16>
    %17 = arith.extf %16 : vector<8x8x128xbf16> to vector<8x8x128xf32>
    %18 = vector.shape_cast %17 : vector<8x8x128xf32> to vector<64x128xf32>
    %19 = arith.truncf %18 : vector<64x128xf32> to vector<64x128xbf16>
    %c0_14 = arith.constant 0 : index
    %c0_15 = arith.constant 0 : index
    %20 = vector.load %arg6[%c0_14, %c0_15] : memref<128x128xbf16, #tpu.memory_space<vmem>>, vector<128x128xbf16>
    %cst_16 = arith.constant dense<0.000000e+00> : vector<64x128xf32>
    %21 = tpu.matmul %19, %20, %cst_16 {dimension_numbers = #tpu.dot_dimension_numbers<[1], [0], [0], [1], [0, 0, 1, 1], [], []>} : vector<64x128xbf16>, vector<128x128xbf16>, vector<64x128xf32> -> vector<64x128xf32>
    %22 = arith.truncf %13 : vector<64x128xf32> to vector<64x128xbf16>
    %c0_17 = arith.constant 0 : index
    %c0_18 = arith.constant 0 : index
    %c0_19 = arith.constant 0 : index
    %23 = vector.load %arg7[%c0_17, %c0_18, %c0_19] : memref<1x64x128xbf16, #tpu.memory_space<vmem>>, vector<1x64x128xbf16>
    %24 = vector.shape_cast %23 : vector<1x64x128xbf16> to vector<64x128xbf16>
    %25 = vector.shape_cast %22 : vector<64x128xbf16> to vector<1x64x128xbf16>
    tpu.vector_store %arg7[%c0_17, %c0_18, %c0_19], %25 {strides = array<i32>} : memref<1x64x128xbf16, #tpu.memory_space<vmem>>, vector<1x64x128xbf16>,
    %26 = arith.truncf %21 : vector<64x128xf32> to vector<64x128xbf16>
    %c0_20 = arith.constant 0 : index
    %c0_21 = arith.constant 0 : index
    %c0_22 = arith.constant 0 : index
    %27 = vector.load %arg8[%c0_20, %c0_21, %c0_22] : memref<1x64x128xbf16, #tpu.memory_space<vmem>>, vector<1x64x128xbf16>
    %28 = vector.shape_cast %27 : vector<1x64x128xbf16> to vector<64x128xbf16>
    %29 = vector.shape_cast %26 : vector<64x128xbf16> to vector<1x64x128xbf16>
    tpu.vector_store %arg8[%c0_20, %c0_21, %c0_22], %29 {strides = array<i32>} : memref<1x64x128xbf16, #tpu.memory_space<vmem>>, vector<1x64x128xbf16>,
    %cst_23 = arith.constant dense<0.000000e+00> : vector<128xf32>
    %30 = vector.multi_reduction <add>, %13, %cst_23 [0] : vector<64x128xf32> to vector<128xf32>
    %31 = vector.shape_cast %30 : vector<128xf32> to vector<1x128xf32>
    %c0_24 = arith.constant 0 : index
    %c0_25 = arith.constant 0 : index
    %c0_26 = arith.constant 0 : index
    %32 = vector.load %arg9[%c0_24, %c0_25, %c0_26] : memref<1x1x128xf32, #tpu.memory_space<vmem>>, vector<1x1x128xf32>
    %33 = vector.shape_cast %32 : vector<1x1x128xf32> to vector<1x128xf32>
    %34 = vector.shape_cast %31 : vector<1x128xf32> to vector<1x1x128xf32>
    tpu.vector_store %arg9[%c0_24, %c0_25, %c0_26], %34 {strides = array<i32>} : memref<1x1x128xf32, #tpu.memory_space<vmem>>, vector<1x1x128xf32>,
    %35 = arith.mulf %13, %13 : vector<64x128xf32>
    %cst_27 = arith.constant dense<0.000000e+00> : vector<128xf32>
    %36 = vector.multi_reduction <add>, %35, %cst_27 [0] : vector<64x128xf32> to vector<128xf32>
    %37 = vector.shape_cast %36 : vector<128xf32> to vector<1x128xf32>
    %c0_28 = arith.constant 0 : index
    %c0_29 = arith.constant 0 : index
    %c0_30 = arith.constant 0 : index
    %38 = vector.load %arg10[%c0_28, %c0_29, %c0_30] : memref<1x1x128xf32, #tpu.memory_space<vmem>>, vector<1x1x128xf32>
    %39 = vector.shape_cast %38 : vector<1x1x128xf32> to vector<1x128xf32>
    %40 = vector.shape_cast %37 : vector<1x128xf32> to vector<1x1x128xf32>
    tpu.vector_store %arg10[%c0_28, %c0_29, %c0_30], %40 {strides = array<i32>} : memref<1x1x128xf32, #tpu.memory_space<vmem>>, vector<1x1x128xf32>,
    %cst_31 = arith.constant dense<0.000000e+00> : vector<128xf32>
    %41 = vector.multi_reduction <add>, %21, %cst_31 [0] : vector<64x128xf32> to vector<128xf32>
    %42 = vector.shape_cast %41 : vector<128xf32> to vector<1x128xf32>
    %c0_32 = arith.constant 0 : index
    %c0_33 = arith.constant 0 : index
    %c0_34 = arith.constant 0 : index
    %43 = vector.load %arg11[%c0_32, %c0_33, %c0_34] : memref<1x1x128xf32, #tpu.memory_space<vmem>>, vector<1x1x128xf32>
    %44 = vector.shape_cast %43 : vector<1x1x128xf32> to vector<1x128xf32>
    %45 = vector.shape_cast %42 : vector<1x128xf32> to vector<1x1x128xf32>
    tpu.vector_store %arg11[%c0_32, %c0_33, %c0_34], %45 {strides = array<i32>} : memref<1x1x128xf32, #tpu.memory_space<vmem>>, vector<1x1x128xf32>,
    %46 = arith.mulf %21, %21 : vector<64x128xf32>
    %cst_35 = arith.constant dense<0.000000e+00> : vector<128xf32>
    %47 = vector.multi_reduction <add>, %46, %cst_35 [0] : vector<64x128xf32> to vector<128xf32>
    %48 = vector.shape_cast %47 : vector<128xf32> to vector<1x128xf32>
    %c0_36 = arith.constant 0 : index
    %c0_37 = arith.constant 0 : index
    %c0_38 = arith.constant 0 : index
    %49 = vector.load %arg12[%c0_36, %c0_37, %c0_38] : memref<1x1x128xf32, #tpu.memory_space<vmem>>, vector<1x1x128xf32>
    %50 = vector.shape_cast %49 : vector<1x1x128xf32> to vector<1x128xf32>
    %51 = vector.shape_cast %48 : vector<1x128xf32> to vector<1x1x128xf32>
    tpu.vector_store %arg12[%c0_36, %c0_37, %c0_38], %51 {strides = array<i32>} : memref<1x1x128xf32, #tpu.memory_space<vmem>>, vector<1x1x128xf32>,
    return
  }
  func.func @transform_0(%arg0: i32) -> (i32, i32, i32) {
    %c0_i32 = arith.constant 0 : i32
    %c0_i32_0 = arith.constant 0 : i32
    %c0_i32_1 = arith.constant 0 : i32
    return %arg0, %c0_i32, %c0_i32_0 : i32, i32, i32
  }
  func.func @transform_1(%arg0: i32) -> (i32, i32) {
    %c0_i32 = arith.constant 0 : i32
    %c0_i32_0 = arith.constant 0 : i32
    %c0_i32_1 = arith.constant 0 : i32
    return %c0_i32, %c0_i32_0 : i32, i32
  }
  func.func @transform_2(%arg0: i32) -> (i32, i32) {
    %c0_i32 = arith.constant 0 : i32
    %c0_i32_0 = arith.constant 0 : i32
    %c0_i32_1 = arith.constant 0 : i32
    return %c0_i32, %c0_i32_0 : i32, i32
  }
  func.func @transform_3(%arg0: i32) -> (i32, i32) {
    %c0_i32 = arith.constant 0 : i32
    %c0_i32_0 = arith.constant 0 : i32
    %c0_i32_1 = arith.constant 0 : i32
    return %c0_i32, %c0_i32_0 : i32, i32
  }
  func.func @transform_4(%arg0: i32) -> (i32, i32, i32, i32, i32) {
    %c0_i32 = arith.constant 0 : i32
    %c0_i32_0 = arith.constant 0 : i32
    %c0_i32_1 = arith.constant 0 : i32
    %c0_i32_2 = arith.constant 0 : i32
    %c0_i32_3 = arith.constant 0 : i32
    return %arg0, %c0_i32, %c0_i32_0, %c0_i32_1, %c0_i32_2 : i32, i32, i32, i32, i32
  }
  func.func @transform_5(%arg0: i32) -> (i32, i32) {
    %c0_i32 = arith.constant 0 : i32
    %c0_i32_0 = arith.constant 0 : i32
    %c0_i32_1 = arith.constant 0 : i32
    return %c0_i32, %c0_i32_0 : i32, i32
  }
  func.func @transform_6(%arg0: i32) -> (i32, i32, i32) {
    %c0_i32 = arith.constant 0 : i32
    %c0_i32_0 = arith.constant 0 : i32
    %c0_i32_1 = arith.constant 0 : i32
    return %arg0, %c0_i32, %c0_i32_0 : i32, i32, i32
  }
  func.func @transform_7(%arg0: i32) -> (i32, i32, i32) {
    %c0_i32 = arith.constant 0 : i32
    %c0_i32_0 = arith.constant 0 : i32
    %c0_i32_1 = arith.constant 0 : i32
    return %arg0, %c0_i32, %c0_i32_0 : i32, i32, i32
  }
  func.func @transform_8(%arg0: i32) -> (i32, i32, i32) {
    %c0_i32 = arith.constant 0 : i32
    %c0_i32_0 = arith.constant 0 : i32
    %c0_i32_1 = arith.constant 0 : i32
    return %arg0, %c0_i32, %c0_i32_0 : i32, i32, i32
  }
  func.func @transform_9(%arg0: i32) -> (i32, i32, i32) {
    %c0_i32 = arith.constant 0 : i32
    %c0_i32_0 = arith.constant 0 : i32
    %c0_i32_1 = arith.constant 0 : i32
    return %arg0, %c0_i32, %c0_i32_0 : i32, i32, i32
  }
  func.func @transform_10(%arg0: i32) -> (i32, i32, i32) {
    %c0_i32 = arith.constant 0 : i32
    %c0_i32_0 = arith.constant 0 : i32
    %c0_i32_1 = arith.constant 0 : i32
    return %arg0, %c0_i32, %c0_i32_0 : i32, i32, i32
  }
  func.func @transform_11(%arg0: i32) -> (i32, i32, i32) {
    %c0_i32 = arith.constant 0 : i32
    %c0_i32_0 = arith.constant 0 : i32
    %c0_i32_1 = arith.constant 0 : i32
    return %arg0, %c0_i32, %c0_i32_0 : i32, i32, i32
  }
}

module attributes {stable_mosaic.version = 11 : i64} {
  func.func @_norm_add_relu_kernel(%arg0: i32, %arg1: memref<128x128xbf16, #tpu.memory_space<vmem>>, %arg2: memref<1x128xf32, #tpu.memory_space<vmem>>, %arg3: memref<1x128xf32, #tpu.memory_space<vmem>>, %arg4: memref<128x128xbf16, #tpu.memory_space<vmem>>, %arg5: memref<1x128xf32, #tpu.memory_space<vmem>>, %arg6: memref<1x128xf32, #tpu.memory_space<vmem>>, %arg7: memref<128x128xf32, #tpu.memory_space<vmem>>) attributes {dimension_semantics = [#tpu.dimension_semantics<parallel>], iteration_bounds = array<i64: 1>, scalar_prefetch = 0 : i64, scratch_operands = 0 : i64, tpu.core_type = #tpu.core_type<tc>, window_params = [{transform_indices = @transform_0, window_bounds = array<i64: 128, 128>}, {pipeline_mode = #tpu.pipeline_mode<synchronous>, transform_indices = @transform_1, window_bounds = array<i64: 1, 128>}, {pipeline_mode = #tpu.pipeline_mode<synchronous>, transform_indices = @transform_2, window_bounds = array<i64: 1, 128>}, {transform_indices = @transform_3, window_bounds = array<i64: 128, 128>}, {pipeline_mode = #tpu.pipeline_mode<synchronous>, transform_indices = @transform_4, window_bounds = array<i64: 1, 128>}, {pipeline_mode = #tpu.pipeline_mode<synchronous>, transform_indices = @transform_5, window_bounds = array<i64: 1, 128>}, {transform_indices = @transform_6, window_bounds = array<i64: 128, 128>}]} {
    %c0 = arith.constant 0 : index
    %c0_0 = arith.constant 0 : index
    %0 = vector.load %arg1[%c0, %c0_0] : memref<128x128xbf16, #tpu.memory_space<vmem>>, vector<128x128xbf16>
    %1 = arith.extf %0 : vector<128x128xbf16> to vector<128x128xf32>
    %c0_1 = arith.constant 0 : index
    %c0_2 = arith.constant 0 : index
    %2 = vector.load %arg2[%c0_1, %c0_2] : memref<1x128xf32, #tpu.memory_space<vmem>>, vector<1x128xf32>
    %3 = vector.broadcast %2 : vector<1x128xf32> to vector<128x128xf32>
    %4 = arith.mulf %1, %3 : vector<128x128xf32>
    %c0_3 = arith.constant 0 : index
    %c0_4 = arith.constant 0 : index
    %5 = vector.load %arg3[%c0_3, %c0_4] : memref<1x128xf32, #tpu.memory_space<vmem>>, vector<1x128xf32>
    %6 = vector.broadcast %5 : vector<1x128xf32> to vector<128x128xf32>
    %7 = arith.addf %4, %6 : vector<128x128xf32>
    %c0_5 = arith.constant 0 : index
    %c0_6 = arith.constant 0 : index
    %8 = vector.load %arg4[%c0_5, %c0_6] : memref<128x128xbf16, #tpu.memory_space<vmem>>, vector<128x128xbf16>
    %9 = arith.extf %8 : vector<128x128xbf16> to vector<128x128xf32>
    %c0_7 = arith.constant 0 : index
    %c0_8 = arith.constant 0 : index
    %10 = vector.load %arg5[%c0_7, %c0_8] : memref<1x128xf32, #tpu.memory_space<vmem>>, vector<1x128xf32>
    %11 = vector.broadcast %10 : vector<1x128xf32> to vector<128x128xf32>
    %12 = arith.mulf %9, %11 : vector<128x128xf32>
    %c0_9 = arith.constant 0 : index
    %c0_10 = arith.constant 0 : index
    %13 = vector.load %arg6[%c0_9, %c0_10] : memref<1x128xf32, #tpu.memory_space<vmem>>, vector<1x128xf32>
    %14 = vector.broadcast %13 : vector<1x128xf32> to vector<128x128xf32>
    %15 = arith.addf %12, %14 : vector<128x128xf32>
    %16 = arith.addf %7, %15 : vector<128x128xf32>
    %cst = arith.constant 0.000000e+00 : f32
    %17 = vector.broadcast %cst : f32 to vector<128x128xf32>
    %18 = arith.maximumf %16, %17 : vector<128x128xf32>
    %c0_11 = arith.constant 0 : index
    %c0_12 = arith.constant 0 : index
    %19 = vector.load %arg7[%c0_11, %c0_12] : memref<128x128xf32, #tpu.memory_space<vmem>>, vector<128x128xf32>
    tpu.vector_store %arg7[%c0_11, %c0_12], %18 {strides = array<i32>} : memref<128x128xf32, #tpu.memory_space<vmem>>, vector<128x128xf32>,
    return
  }
  func.func @transform_0(%arg0: i32) -> (i32, i32) {
    %c0_i32 = arith.constant 0 : i32
    %c0_i32_0 = arith.constant 0 : i32
    return %arg0, %c0_i32 : i32, i32
  }
  func.func @transform_1(%arg0: i32) -> (i32, i32) {
    %c0_i32 = arith.constant 0 : i32
    %c0_i32_0 = arith.constant 0 : i32
    %c0_i32_1 = arith.constant 0 : i32
    return %c0_i32, %c0_i32_0 : i32, i32
  }
  func.func @transform_2(%arg0: i32) -> (i32, i32) {
    %c0_i32 = arith.constant 0 : i32
    %c0_i32_0 = arith.constant 0 : i32
    %c0_i32_1 = arith.constant 0 : i32
    return %c0_i32, %c0_i32_0 : i32, i32
  }
  func.func @transform_3(%arg0: i32) -> (i32, i32) {
    %c0_i32 = arith.constant 0 : i32
    %c0_i32_0 = arith.constant 0 : i32
    return %arg0, %c0_i32 : i32, i32
  }
  func.func @transform_4(%arg0: i32) -> (i32, i32) {
    %c0_i32 = arith.constant 0 : i32
    %c0_i32_0 = arith.constant 0 : i32
    %c0_i32_1 = arith.constant 0 : i32
    return %c0_i32, %c0_i32_0 : i32, i32
  }
  func.func @transform_5(%arg0: i32) -> (i32, i32) {
    %c0_i32 = arith.constant 0 : i32
    %c0_i32_0 = arith.constant 0 : i32
    %c0_i32_1 = arith.constant 0 : i32
    return %c0_i32, %c0_i32_0 : i32, i32
  }
  func.func @transform_6(%arg0: i32) -> (i32, i32) {
    %c0_i32 = arith.constant 0 : i32
    %c0_i32_0 = arith.constant 0 : i32
    return %arg0, %c0_i32 : i32, i32
  }
}

</mosaic_0001>

<bundles_post_ra>
// kernel: bottleneck_forward.4
= control target key start
LH: loop header
LB: loop body
LE: loop exit
PB: predicated region body
PF: predicated region fallthrough
CT: control target
= control target key end

     0   :  { %s2134_s1 = inlined_call_operand.vmem [shape: bf16[128,128], index: 1, kind: input, shape index: {}]   ;;  %s2135_s0 = inlined_call_operand.vmem [shape: bf16[512,128], index: 0, kind: input, shape index: {}]   ;;  %s2136_s2 = inlined_call_operand.vmem [shape: bf16[512,128], index: 2, kind: output, shape index: {0}]   ;;  %s2137_s3 = inlined_call_operand.vmem [shape: f32[1,1,128], index: 3, kind: output, shape index: {1}]   ;;  %s2138_s4 = inlined_call_operand.vmem [shape: f32[1,1,128], index: 4, kind: output, shape index: {2}]  }
   0x1   :  { %v1655_v0 = vld [vmem:[%s2134_s1 + $0x38] sm:$0xff]   ;;  %v1656_v1 = vld [vmem:[%s2134_s1 + $0x30] sm:$0xff]   ;;  %v1657_v2 = vld [vmem:[%s2134_s1 + $0x28] sm:$0xff]  }
   0x2   :  { %1559 = vmatprep.subr.bf16.mxu0 %v1655_v0  ;;  %1639 = vmatprep.subr.bf16.mxu1 %v1655_v0  ;;  %v1658_v3 = vld [vmem:[%s2134_s1 + $0x20] sm:$0xff]   ;;  %v1659_v5 = vld [vmem:[%s2134_s1 + $0x18] sm:$0xff]   ;;  %v1660_v6 = vld [vmem:[%s2134_s1 + $0x10] sm:$0xff]  }
   0x3   :  { %1560 = vmatpush3.bf16.msra.mxu0 %v1655_v0  ;;  %1647 = vmatpush3.bf16.msra.mxu1 %v1655_v0  ;;  %v1663_v4 = vld [vmem:[%s2135_s0] sm:$0xff]   ;;  %v1661_v7 = vld [vmem:[%s2134_s1 + $0x8] sm:$0xff]   ;;  %v1665_v11 = vld [vmem:[%s2135_s0 + $0x10] sm:$0xff]  }
   0x4   :  { %1561 = vmatprep.subr.bf16.mxu0 %v1656_v1  ;;  %1640 = vmatprep.subr.bf16.mxu1 %v1656_v1  ;;  %v1662_v8 = vld [vmem:[%s2134_s1] sm:$0xff]   ;;  %v1664_v10 = vld [vmem:[%s2135_s0 + $0x8] sm:$0xff]   ;;  %v1681_v13 = vld [vmem:[%s2135_s0 + $0x90] sm:$0xff]  }
   0x5   :  { %1575 = vmatprep.mubr.bf16.mxu0 %v1663_v4  ;;  %v1679_v9 = vld [vmem:[%s2135_s0 + $0x80] sm:$0xff]   ;;  %v1680_v12 = vld [vmem:[%s2135_s0 + $0x88] sm:$0xff]   ;;  %v1666_v14 = vld [vmem:[%s2135_s0 + $0x18] sm:$0xff]  }
   0x6   :  { %1607 = vmatprep.mubr.bf16.mxu1 %v1679_v9  ;;  %v1667_v15 = vld [vmem:[%s2135_s0 + $0x20] sm:$0xff]   ;;  %v1682_v16 = vld [vmem:[%s2135_s0 + $0x98] sm:$0xff]   ;;  %v1668_v18 = vld [vmem:[%s2135_s0 + $0x28] sm:$0xff]  }
   0x7   :  { %1562 = vmatpush3.bf16.msra.mxu0 %v1656_v1  ;;  %1648 = vmatpush3.bf16.msra.mxu1 %v1656_v1  ;;  %v1683_v17 = vld [vmem:[%s2135_s0 + $0xa0] sm:$0xff]   ;;  %v1684_v19 = vld [vmem:[%s2135_s0 + $0xa8] sm:$0xff]   ;;  %v1669_v20 = vld [vmem:[%s2135_s0 + $0x30] sm:$0xff]  }
   0x8   :  { %1563 = vmatprep.subr.bf16.mxu0 %v1657_v2  ;;  %1641 = vmatprep.subr.bf16.mxu1 %v1657_v2  ;;  %v1685_v21 = vld [vmem:[%s2135_s0 + $0xb0] sm:$0xff]   ;;  %v1670_v22 = vld [vmem:[%s2135_s0 + $0x38] sm:$0xff]   ;;  %v1671_v24 = vld [vmem:[%s2135_s0 + $0x40] sm:$0xff]  }
   0x9   :  { %v1686_v23 = vld [vmem:[%s2135_s0 + $0xb8] sm:$0xff]   ;;  %v1687_v25 = vld [vmem:[%s2135_s0 + $0xc0] sm:$0xff]   ;;  %v1672_v26 = vld [vmem:[%s2135_s0 + $0x48] sm:$0xff]  }
   0xa   :  { %v1688_v27 = vld [vmem:[%s2135_s0 + $0xc8] sm:$0xff]   ;;  %v1673_v28 = vld [vmem:[%s2135_s0 + $0x50] sm:$0xff]   ;;  %v1674_v30 = vld [vmem:[%s2135_s0 + $0x58] sm:$0xff]  }
   0xb   :  { %1564 = vmatpush3.bf16.msra.mxu0 %v1657_v2  ;;  %1649 = vmatpush3.bf16.msra.mxu1 %v1657_v2  ;;  %v1689_v29 = vld [vmem:[%s2135_s0 + $0xd0] sm:$0xff]   ;;  %v1690_v31 = vld [vmem:[%s2135_s0 + $0xd8] sm:$0xff]   ;;  %v1675_v32 = vld [vmem:[%s2135_s0 + $0x60] sm:$0xff]  }
   0xc   :  { %1565 = vmatprep.subr.bf16.mxu0 %v1658_v3  ;;  %1642 = vmatprep.subr.bf16.mxu1 %v1658_v3  ;;  %v1691_v33 = vld [vmem:[%s2135_s0 + $0xe0] sm:$0xff]   ;;  %v1676_v34 = vld [vmem:[%s2135_s0 + $0x68] sm:$0xff]   ;;  %v1677_v36 = vld [vmem:[%s2135_s0 + $0x70] sm:$0xff]  }
   0xd   :  { %v1692_v35 = vld [vmem:[%s2135_s0 + $0xe8] sm:$0xff]   ;;  %v1693_v37 = vld [vmem:[%s2135_s0 + $0xf0] sm:$0xff]   ;;  %v1678_v38 = vld [vmem:[%s2135_s0 + $0x78] sm:$0xff]  }
   0xe   :  { %v1694_v39 = vld [vmem:[%s2135_s0 + $0xf8] sm:$0xff]  }
   0xf   :  { %1566 = vmatpush3.bf16.msra.mxu0 %v1658_v3  ;;  %1650 = vmatpush3.bf16.msra.mxu1 %v1658_v3 }
  0x10   :  { %1567 = vmatprep.subr.bf16.mxu0 %v1659_v5  ;;  %1643 = vmatprep.subr.bf16.mxu1 %v1659_v5 }
  0x13   :  { %1568 = vmatpush3.bf16.msra.mxu0 %v1659_v5  ;;  %1651 = vmatpush3.bf16.msra.mxu1 %v1659_v5 }
  0x14   :  { %1569 = vmatprep.subr.bf16.mxu0 %v1660_v6  ;;  %1644 = vmatprep.subr.bf16.mxu1 %v1660_v6 }
  0x17   :  { %1570 = vmatpush3.bf16.msra.mxu0 %v1660_v6  ;;  %1652 = vmatpush3.bf16.msra.mxu1 %v1660_v6 }
  0x18   :  { %1571 = vmatprep.subr.bf16.mxu0 %v1661_v7  ;;  %1645 = vmatprep.subr.bf16.mxu1 %v1661_v7 }
  0x1b   :  { %1572 = vmatpush3.bf16.msra.mxu0 %v1661_v7  ;;  %1653 = vmatpush3.bf16.msra.mxu1 %v1661_v7 }
  0x1c   :  { %1573 = vmatprep.subr.bf16.mxu0 %v1662_v8  ;;  %1646 = vmatprep.subr.bf16.mxu1 %v1662_v8 }
  0x1f   :  { %1574 = vmatpush3.bf16.msra.mxu0 %v1662_v8  ;;  %1654 = vmatpush3.bf16.msra.mxu1 %v1662_v8 }
  0x22   :  { %1576 = vmatmul.mubr.bf16.vlgmr.msra.gmra.mxu0 %v1664_v10  ;;  %1608 = vmatmul.mubr.bf16.vlgmr.msra.gmra.mxu1 %v1680_v12 }
  0x23   :  { %1579 = vmatprep.mubr.bf16.mxu0 %v1665_v11  ;;  %1611 = vmatprep.mubr.bf16.mxu1 %v1681_v13 }
  0x2a   :  { %1580 = vmatmul.mubr.bf16.gmra.mxu0 %v1666_v14  ;;  %1612 = vmatmul.mubr.bf16.gmra.mxu1 %v1682_v16 }
  0x2b   :  { %1583 = vmatprep.mubr.bf16.mxu0 %v1667_v15  ;;  %1615 = vmatprep.mubr.bf16.mxu1 %v1683_v17 }
  0x32   :  { %1584 = vmatmul.mubr.bf16.gmra.mxu0 %v1668_v18  ;;  %1616 = vmatmul.mubr.bf16.gmra.mxu1 %v1684_v19 }
  0x33   :  { %1587 = vmatprep.mubr.bf16.mxu0 %v1669_v20  ;;  %1619 = vmatprep.mubr.bf16.mxu1 %v1685_v21 }
  0x3a   :  { %1588 = vmatmul.mubr.bf16.gmra.mxu0 %v1670_v22  ;;  %1620 = vmatmul.mubr.bf16.gmra.mxu1 %v1686_v23 }
  0x3b   :  { %1591 = vmatprep.mubr.bf16.mxu0 %v1671_v24  ;;  %1623 = vmatprep.mubr.bf16.mxu1 %v1687_v25 }
  0x42   :  { %1592 = vmatmul.mubr.bf16.gmra.mxu0 %v1672_v26  ;;  %1624 = vmatmul.mubr.bf16.gmra.mxu1 %v1688_v27 }
  0x43   :  { %1595 = vmatprep.mubr.bf16.mxu0 %v1673_v28  ;;  %1627 = vmatprep.mubr.bf16.mxu1 %v1689_v29 }
  0x4a   :  { %1596 = vmatmul.mubr.bf16.gmra.mxu0 %v1674_v30  ;;  %1628 = vmatmul.mubr.bf16.gmra.mxu1 %v1690_v31 }
  0x4b   :  { %1599 = vmatprep.mubr.bf16.mxu0 %v1675_v32  ;;  %1631 = vmatprep.mubr.bf16.mxu1 %v1691_v33 }
  0x52   :  { %1600 = vmatmul.mubr.bf16.gmra.mxu0 %v1676_v34  ;;  %1632 = vmatmul.mubr.bf16.gmra.mxu1 %v1692_v35 }
  0x53   :  { %1603 = vmatprep.mubr.bf16.mxu0 %v1677_v36  ;;  %1635 = vmatprep.mubr.bf16.mxu1 %v1693_v37 }
  0x5a   :  { %1604 = vmatmul.mubr.bf16.gmra.mxu0 %v1678_v38  ;;  %1636 = vmatmul.mubr.bf16.gmra.mxu1 %v1694_v39 }
  0xe2   :  { %v1577_v40 = vpop.f32.mrf.mxu0  ;;  %v1840_v41 = vpop.f32.mrf.mxu1 }
  0xe3   :  { %v1016_v57 = vmul.f32 %v1577_v40, %v1577_v40 }
  0xe4   :  { %v369_v42 = vpop.f32.mrf.mxu0  ;;  %v1842_v43 = vpop.f32.mrf.mxu1 }
  0xe5   :  { %v1014_v48 = vmul.f32 %v369_v42, %v369_v42 }
  0xe6   :  { %v1578_v44 = vpop.f32.mrf.mxu0  ;;  %v1844_v45 = vpop.f32.mrf.mxu1 }
  0xe7   :  { %v1336_v46 = vpack.c.bf16 %v1578_v44, %v1577_v40  ;;  %v1416_v47 = vpack.c.bf16 %v1844_v45, %v1840_v41  ;;  %v1017_v62 = vmul.f32 %v1578_v44, %v1578_v44 }
  0xe8   :  { %v372_v49 = vpop.f32.mrf.mxu0  ;;  %v1848_v50 = vpop.f32.mrf.mxu1 }
  0xe9   :  { %1488 = vst [vmem:[%s2136_s2 + $0x8] sm:$0xff] %v1336_v46   ;;  %v1331_v51 = vpack.c.bf16 %v372_v49, %v369_v42  ;;  %v944_v52 = vadd.f32 %v372_v49, %v369_v42  ;;  %v1015_v53 = vmul.f32 %v372_v49, %v372_v49  ;;  %1504 = vst [vmem:[%s2136_s2 + $0x88] sm:$0xff] %v1416_v47  }
  0xea   :  { %v1411_v54 = vpack.c.bf16 %v1848_v50, %v1842_v43  ;;  %v1581_v55 = vpop.f32.mrf.mxu0  ;;  %v1858_v56 = vpop.f32.mrf.mxu1 }
  0xeb   :  { %1332 = vst [vmem:[%s2136_s2] sm:$0xff] %v1331_v51   ;;  %v945_v58 = vadd.f32 %v1577_v40, %v944_v52  ;;  %v1078_v59 = vadd.f32 %v1015_v53, %v1014_v48  ;;  %v1020_v17 = vmul.f32 %v1581_v55, %v1581_v55 }
  0xec   :  { %1503 = vst [vmem:[%s2136_s2 + $0x80] sm:$0xff] %v1411_v54   ;;  %v385_v60 = vpop.f32.mrf.mxu0  ;;  %v1866_v61 = vpop.f32.mrf.mxu1 }
  0xed   :  { %v1079_v63 = vadd.f32 %v1078_v59, %v1016_v57  ;;  %v946_v0 = vadd.f32 %v1578_v44, %v945_v58  ;;  %v1018_v4 = vmul.f32 %v385_v60, %v385_v60 }
  0xee   :  { %v1582_v1 = vpop.f32.mrf.mxu0  ;;  %v1868_v2 = vpop.f32.mrf.mxu1 }
  0xef   :  { %v947_v3 = vadd.f32 %v946_v0, %v385_v60  ;;  %v1080_v5 = vadd.f32 %v1079_v63, %v1017_v62  ;;  %v1346_v6 = vpack.c.bf16 %v1582_v1, %v1581_v55  ;;  %v1426_v8 = vpack.c.bf16 %v1868_v2, %v1858_v56 }
  0xf0   :  { %v388_v7 = vpop.f32.mrf.mxu0  ;;  %v1872_v9 = vpop.f32.mrf.mxu1  ;;  %v1021_v22 = vmul.f32 %v1582_v1, %v1582_v1 }
  0xf1   :  { %v1081_v10 = vadd.f32 %v1080_v5, %v1018_v4  ;;  %1490 = vst [vmem:[%s2136_s2 + $0x18] sm:$0xff] %v1346_v6   ;;  %v1341_v11 = vpack.c.bf16 %v388_v7, %v385_v60  ;;  %v948_v12 = vadd.f32 %v947_v3, %v388_v7  ;;  %v1019_v13 = vmul.f32 %v388_v7, %v388_v7 }
  0xf2   :  { %v1585_v14 = vpop.f32.mrf.mxu0  ;;  %1506 = vst [vmem:[%s2136_s2 + $0x98] sm:$0xff] %v1426_v8   ;;  %v1421_v15 = vpack.c.bf16 %v1872_v9, %v1866_v61  ;;  %v1882_v16 = vpop.f32.mrf.mxu1 }
  0xf3   :  { %1489 = vst [vmem:[%s2136_s2 + $0x10] sm:$0xff] %v1341_v11   ;;  %v949_v18 = vadd.f32 %v1581_v55, %v948_v12  ;;  %v1082_v19 = vadd.f32 %v1081_v10, %v1019_v13  ;;  %v1024_v42 = vmul.f32 %v1585_v14, %v1585_v14 }
  0xf4   :  { %v401_v20 = vpop.f32.mrf.mxu0  ;;  %1505 = vst [vmem:[%s2136_s2 + $0x90] sm:$0xff] %v1421_v15   ;;  %v1890_v21 = vpop.f32.mrf.mxu1 }
  0xf5   :  { %v1083_v23 = vadd.f32 %v1082_v19, %v1020_v17  ;;  %v950_v24 = vadd.f32 %v1582_v1, %v949_v18  ;;  %v1022_v28 = vmul.f32 %v401_v20, %v401_v20 }
  0xf6   :  { %v1586_v25 = vpop.f32.mrf.mxu0  ;;  %v1892_v26 = vpop.f32.mrf.mxu1 }
  0xf7   :  { %v951_v27 = vadd.f32 %v950_v24, %v401_v20  ;;  %v1084_v29 = vadd.f32 %v1083_v23, %v1021_v22  ;;  %v1356_v30 = vpack.c.bf16 %v1586_v25, %v1585_v14  ;;  %v1436_v32 = vpack.c.bf16 %v1892_v26, %v1882_v16 }
  0xf8   :  { %v404_v31 = vpop.f32.mrf.mxu0  ;;  %v1896_v33 = vpop.f32.mrf.mxu1  ;;  %v1025_v49 = vmul.f32 %v1586_v25, %v1586_v25 }
  0xf9   :  { %v1085_v34 = vadd.f32 %v1084_v29, %v1022_v28  ;;  %1492 = vst [vmem:[%s2136_s2 + $0x28] sm:$0xff] %v1356_v30   ;;  %v1351_v35 = vpack.c.bf16 %v404_v31, %v401_v20  ;;  %v952_v36 = vadd.f32 %v951_v27, %v404_v31  ;;  %v1023_v37 = vmul.f32 %v404_v31, %v404_v31 }
  0xfa   :  { %v1589_v38 = vpop.f32.mrf.mxu0  ;;  %1508 = vst [vmem:[%s2136_s2 + $0xa8] sm:$0xff] %v1436_v32   ;;  %v1431_v39 = vpack.c.bf16 %v1896_v33, %v1890_v21  ;;  %v1906_v40 = vpop.f32.mrf.mxu1 }
  0xfb   :  { %1491 = vst [vmem:[%s2136_s2 + $0x20] sm:$0xff] %v1351_v35   ;;  %v953_v44 = vadd.f32 %v1585_v14, %v952_v36  ;;  %v1086_v46 = vadd.f32 %v1085_v34, %v1023_v37  ;;  %v1028_v8 = vmul.f32 %v1589_v38, %v1589_v38 }
  0xfc   :  { %v417_v47 = vpop.f32.mrf.mxu0  ;;  %1507 = vst [vmem:[%s2136_s2 + $0xa0] sm:$0xff] %v1431_v39   ;;  %v1914_v48 = vpop.f32.mrf.mxu1 }
  0xfd   :  { %v1087_v51 = vadd.f32 %v1086_v46, %v1024_v42  ;;  %v954_v52 = vadd.f32 %v1586_v25, %v953_v44  ;;  %v1026_v57 = vmul.f32 %v417_v47, %v417_v47 }
  0xfe   :  { %v1590_v53 = vpop.f32.mrf.mxu0  ;;  %v1916_v54 = vpop.f32.mrf.mxu1 }
  0xff   :  { %v955_v55 = vadd.f32 %v954_v52, %v417_v47  ;;  %v1088_v58 = vadd.f32 %v1087_v51, %v1025_v49  ;;  %v1366_v59 = vpack.c.bf16 %v1590_v53, %v1589_v38  ;;  %v1446_v62 = vpack.c.bf16 %v1916_v54, %v1906_v40 }
 0x100   :  { %v420_v60 = vpop.f32.mrf.mxu0  ;;  %v1920_v63 = vpop.f32.mrf.mxu1  ;;  %v1029_v14 = vmul.f32 %v1590_v53, %v1590_v53 }
 0x101   :  { %v1089_v0 = vadd.f32 %v1088_v58, %v1026_v57  ;;  %1494 = vst [vmem:[%s2136_s2 + $0x38] sm:$0xff] %v1366_v59   ;;  %v1361_v1 = vpack.c.bf16 %v420_v60, %v417_v47  ;;  %v956_v3 = vadd.f32 %v955_v55, %v420_v60  ;;  %v1027_v4 = vmul.f32 %v420_v60, %v420_v60 }
 0x102   :  { %v1593_v5 = vpop.f32.mrf.mxu0  ;;  %1510 = vst [vmem:[%s2136_s2 + $0xb8] sm:$0xff] %v1446_v62   ;;  %v1441_v6 = vpack.c.bf16 %v1920_v63, %v1914_v48  ;;  %v1930_v7 = vpop.f32.mrf.mxu1 }
 0x103   :  { %1493 = vst [vmem:[%s2136_s2 + $0x30] sm:$0xff] %v1361_v1   ;;  %v957_v10 = vadd.f32 %v1589_v38, %v956_v3  ;;  %v1090_v11 = vadd.f32 %v1089_v0, %v1027_v4  ;;  %v1032_v37 = vmul.f32 %v1593_v5, %v1593_v5 }
 0x104   :  { %v433_v12 = vpop.f32.mrf.mxu0  ;;  %1509 = vst [vmem:[%s2136_s2 + $0xb0] sm:$0xff] %v1441_v6   ;;  %v1938_v13 = vpop.f32.mrf.mxu1 }
 0x105   :  { %v1091_v15 = vadd.f32 %v1090_v11, %v1028_v8  ;;  %v958_v17 = vadd.f32 %v1590_v53, %v957_v10  ;;  %v1030_v22 = vmul.f32 %v433_v12, %v433_v12 }
 0x106   :  { %v1594_v18 = vpop.f32.mrf.mxu0  ;;  %v1940_v19 = vpop.f32.mrf.mxu1 }
 0x107   :  { %v959_v20 = vadd.f32 %v958_v17, %v433_v12  ;;  %v1092_v23 = vadd.f32 %v1091_v15, %v1029_v14  ;;  %v1376_v24 = vpack.c.bf16 %v1594_v18, %v1593_v5  ;;  %v1456_v27 = vpack.c.bf16 %v1940_v19, %v1930_v7 }
 0x108   :  { %v436_v25 = vpop.f32.mrf.mxu0  ;;  %v1944_v28 = vpop.f32.mrf.mxu1  ;;  %v1033_v46 = vmul.f32 %v1594_v18, %v1594_v18 }
 0x109   :  { %v1093_v29 = vadd.f32 %v1092_v23, %v1030_v22  ;;  %1496 = vst [vmem:[%s2136_s2 + $0x48] sm:$0xff] %v1376_v24   ;;  %v1371_v30 = vpack.c.bf16 %v436_v25, %v433_v12  ;;  %v960_v31 = vadd.f32 %v959_v20, %v436_v25  ;;  %v1031_v32 = vmul.f32 %v436_v25, %v436_v25 }
 0x10a   :  { %v1597_v34 = vpop.f32.mrf.mxu0  ;;  %1512 = vst [vmem:[%s2136_s2 + $0xc8] sm:$0xff] %v1456_v27   ;;  %v1451_v35 = vpack.c.bf16 %v1944_v28, %v1938_v13  ;;  %v1954_v36 = vpop.f32.mrf.mxu1 }
 0x10b   :  { %1495 = vst [vmem:[%s2136_s2 + $0x40] sm:$0xff] %v1371_v30   ;;  %v961_v38 = vadd.f32 %v1593_v5, %v960_v31  ;;  %v1094_v39 = vadd.f32 %v1093_v29, %v1031_v32  ;;  %v1036_v10 = vmul.f32 %v1597_v34, %v1597_v34 }
 0x10c   :  { %v449_v42 = vpop.f32.mrf.mxu0  ;;  %1511 = vst [vmem:[%s2136_s2 + $0xc0] sm:$0xff] %v1451_v35   ;;  %v1962_v44 = vpop.f32.mrf.mxu1 }
 0x10d   :  { %v1095_v47 = vadd.f32 %v1094_v39, %v1032_v37  ;;  %v962_v49 = vadd.f32 %v1594_v18, %v961_v38  ;;  %v1034_v55 = vmul.f32 %v449_v42, %v449_v42 }
 0x10e   :  { %v1598_v51 = vpop.f32.mrf.mxu0  ;;  %v1964_v52 = vpop.f32.mrf.mxu1 }
 0x10f   :  { %v963_v53 = vadd.f32 %v962_v49, %v449_v42  ;;  %v1096_v57 = vadd.f32 %v1095_v47, %v1033_v46  ;;  %v1386_v58 = vpack.c.bf16 %v1598_v51, %v1597_v34  ;;  %v1466_v60 = vpack.c.bf16 %v1964_v52, %v1954_v36 }
 0x110   :  { %v452_v59 = vpop.f32.mrf.mxu0  ;;  %v1968_v62 = vpop.f32.mrf.mxu1  ;;  %v1037_v17 = vmul.f32 %v1598_v51, %v1598_v51 }
 0x111   :  { %v1097_v0 = vadd.f32 %v1096_v57, %v1034_v55  ;;  %1498 = vst [vmem:[%s2136_s2 + $0x58] sm:$0xff] %v1386_v58   ;;  %v1381_v1 = vpack.c.bf16 %v452_v59, %v449_v42  ;;  %v964_v3 = vadd.f32 %v963_v53, %v452_v59  ;;  %v1035_v4 = vmul.f32 %v452_v59, %v452_v59 }
 0x112   :  { %v1601_v5 = vpop.f32.mrf.mxu0  ;;  %1514 = vst [vmem:[%s2136_s2 + $0xd8] sm:$0xff] %v1466_v60   ;;  %v1461_v6 = vpack.c.bf16 %v1968_v62, %v1962_v44  ;;  %v1978_v8 = vpop.f32.mrf.mxu1 }
 0x113   :  { %1497 = vst [vmem:[%s2136_s2 + $0x50] sm:$0xff] %v1381_v1   ;;  %v965_v11 = vadd.f32 %v1597_v34, %v964_v3  ;;  %v1098_v12 = vadd.f32 %v1097_v0, %v1035_v4  ;;  %v1040_v47 = vmul.f32 %v1601_v5, %v1601_v5 }
 0x114   :  { %v465_v14 = vpop.f32.mrf.mxu0  ;;  %1513 = vst [vmem:[%s2136_s2 + $0xd0] sm:$0xff] %v1461_v6   ;;  %v1986_v15 = vpop.f32.mrf.mxu1 }
 0x115   :  { %v1099_v18 = vadd.f32 %v1098_v12, %v1036_v10  ;;  %v966_v20 = vadd.f32 %v1598_v51, %v965_v11  ;;  %v1038_v25 = vmul.f32 %v465_v14, %v465_v14 }
 0x116   :  { %v1602_v22 = vpop.f32.mrf.mxu0  ;;  %v1988_v23 = vpop.f32.mrf.mxu1 }
 0x117   :  { %v967_v24 = vadd.f32 %v966_v20, %v465_v14  ;;  %v1100_v27 = vadd.f32 %v1099_v18, %v1037_v17  ;;  %v1396_v29 = vpack.c.bf16 %v1602_v22, %v1601_v5  ;;  %v1476_v31 = vpack.c.bf16 %v1988_v23, %v1978_v8 }
 0x118   :  { %v468_v30 = vpop.f32.mrf.mxu0  ;;  %v1992_v32 = vpop.f32.mrf.mxu1  ;;  %v1041_v57 = vmul.f32 %v1602_v22, %v1602_v22 }
 0x119   :  { %v1101_v34 = vadd.f32 %v1100_v27, %v1038_v25  ;;  %1500 = vst [vmem:[%s2136_s2 + $0x68] sm:$0xff] %v1396_v29   ;;  %v1391_v35 = vpack.c.bf16 %v468_v30, %v465_v14  ;;  %v968_v37 = vadd.f32 %v967_v24, %v468_v30  ;;  %v1039_v38 = vmul.f32 %v468_v30, %v468_v30 }
 0x11a   :  { %v1605_v39 = vpop.f32.mrf.mxu0  ;;  %1516 = vst [vmem:[%s2136_s2 + $0xe8] sm:$0xff] %v1476_v31   ;;  %v1471_v42 = vpack.c.bf16 %v1992_v32, %v1986_v15  ;;  %v2002_v46 = vpop.f32.mrf.mxu1  ;;  %v1046_v31 = vmul.f32 %v1842_v43, %v1842_v43 }
 0x11b   :  { %1499 = vst [vmem:[%s2136_s2 + $0x60] sm:$0xff] %v1391_v35   ;;  %v969_v49 = vadd.f32 %v1601_v5, %v968_v37  ;;  %v1102_v51 = vadd.f32 %v1101_v34, %v1039_v38  ;;  %v1047_v38 = vmul.f32 %v1848_v50, %v1848_v50 }
 0x11c   :  { %v481_v53 = vpop.f32.mrf.mxu0  ;;  %1515 = vst [vmem:[%s2136_s2 + $0xe0] sm:$0xff] %v1471_v42   ;;  %v2010_v55 = vpop.f32.mrf.mxu1  ;;  %v1048_v42 = vmul.f32 %v1840_v41, %v1840_v41 }
 0x11d   :  { %v1103_v58 = vadd.f32 %v1102_v51, %v1040_v47  ;;  %v970_v59 = vadd.f32 %v1602_v22, %v969_v49  ;;  %v1042_v3 = vmul.f32 %v481_v53, %v481_v53  ;;  %v1044_v22 = vmul.f32 %v1605_v39, %v1605_v39 }
 0x11e   :  { %v1606_v60 = vpop.f32.mrf.mxu0  ;;  %v2012_v0 = vpop.f32.mrf.mxu1  ;;  %v1049_v51 = vmul.f32 %v1844_v45, %v1844_v45 }
 0x11f   :  { %v971_v1 = vadd.f32 %v970_v59, %v481_v53  ;;  %v1104_v4 = vadd.f32 %v1103_v58, %v1041_v57  ;;  %v1406_v6 = vpack.c.bf16 %v1606_v60, %v1605_v39  ;;  %v1486_v5 = vpack.c.bf16 %v2012_v0, %v2002_v46 }
 0x120   :  { %v484_v10 = vpop.f32.mrf.mxu0  ;;  %v2016_v11 = vpop.f32.mrf.mxu1  ;;  %v1045_v27 = vmul.f32 %v1606_v60, %v1606_v60  ;;  %v1050_v58 = vmul.f32 %v1866_v61, %v1866_v61 }
 0x121   :  { %v1105_v12 = vadd.f32 %v1104_v4, %v1042_v3  ;;  %1502 = vst [vmem:[%s2136_s2 + $0x78] sm:$0xff] %v1406_v6   ;;  %v1401_v14 = vpack.c.bf16 %v484_v10, %v481_v53  ;;  %v972_v17 = vadd.f32 %v971_v1, %v484_v10  ;;  %v1043_v18 = vmul.f32 %v484_v10, %v484_v10 }
 0x122   :  { %1518 = vst [vmem:[%s2136_s2 + $0xf8] sm:$0xff] %v1486_v5   ;;  %v1481_v20 = vpack.c.bf16 %v2016_v11, %v2010_v55  ;;  %v1051_v1 = vmul.f32 %v1872_v9, %v1872_v9  ;;  %v1054_v5 = vmul.f32 %v1890_v21, %v1890_v21 }
 0x123   :  { %1501 = vst [vmem:[%s2136_s2 + $0x70] sm:$0xff] %v1401_v14   ;;  %v973_v24 = vadd.f32 %v1605_v39, %v972_v17  ;;  %v1106_v25 = vadd.f32 %v1105_v12, %v1043_v18  ;;  %v1055_v17 = vmul.f32 %v1896_v33, %v1896_v33 }
 0x124   :  { %1517 = vst [vmem:[%s2136_s2 + $0xf0] sm:$0xff] %v1481_v20  }
 0x125   :  { %v974_v29 = vadd.f32 %v1606_v60, %v973_v24  ;;  %v1107_v30 = vadd.f32 %v1106_v25, %v1044_v22  ;;  %v1058_v25 = vmul.f32 %v1914_v48, %v1914_v48 }
 0x127   :  { %v1108_v34 = vadd.f32 %v1107_v30, %v1045_v27  ;;  %v975_v35 = vadd.f32 %v974_v29, %v1842_v43  ;;  %v1059_v30 = vmul.f32 %v1920_v63, %v1920_v63 }
 0x129   :  { %v976_v37 = vadd.f32 %v975_v35, %v1848_v50  ;;  %v1109_v39 = vadd.f32 %v1108_v34, %v1046_v31 }
 0x12b   :  { %v977_v47 = vadd.f32 %v1840_v41, %v976_v37  ;;  %v1110_v49 = vadd.f32 %v1109_v39, %v1047_v38  ;;  %v1052_v41 = vmul.f32 %v1858_v56, %v1858_v56  ;;  %v1062_v38 = vmul.f32 %v1938_v13, %v1938_v13 }
 0x12d   :  { %v1111_v53 = vadd.f32 %v1110_v49, %v1048_v42  ;;  %v978_v57 = vadd.f32 %v1844_v45, %v977_v47  ;;  %v1053_v45 = vmul.f32 %v1868_v2, %v1868_v2  ;;  %v1063_v47 = vmul.f32 %v1944_v28, %v1944_v28 }
 0x12f   :  { %v979_v43 = vadd.f32 %v978_v57, %v1866_v61  ;;  %v1112_v59 = vadd.f32 %v1111_v53, %v1049_v51 }
 0x131   :  { %v1113_v50 = vadd.f32 %v1112_v59, %v1050_v58  ;;  %v980_v60 = vadd.f32 %v979_v43, %v1872_v9  ;;  %v1066_v43 = vmul.f32 %v1962_v44, %v1962_v44 }
 0x133   :  { %v981_v3 = vadd.f32 %v1858_v56, %v980_v60  ;;  %v1114_v4 = vadd.f32 %v1113_v50, %v1051_v1  ;;  %v1056_v56 = vmul.f32 %v1882_v16, %v1882_v16  ;;  %v1067_v50 = vmul.f32 %v1968_v62, %v1968_v62 }
 0x135   :  { %v1115_v6 = vadd.f32 %v1114_v4, %v1052_v41  ;;  %v982_v10 = vadd.f32 %v1868_v2, %v981_v3  ;;  %v1057_v2 = vmul.f32 %v1892_v26, %v1892_v26  ;;  %v1070_v4 = vmul.f32 %v1986_v15, %v1986_v15 }
 0x137   :  { %v983_v61 = vadd.f32 %v982_v10, %v1890_v21  ;;  %v1116_v12 = vadd.f32 %v1115_v6, %v1053_v45  ;;  %v1071_v10 = vmul.f32 %v1992_v32, %v1992_v32 }
 0x139   :  { %v1117_v14 = vadd.f32 %v1116_v12, %v1054_v5  ;;  %v984_v9 = vadd.f32 %v983_v61, %v1896_v33 }
 0x13b   :  { %v985_v18 = vadd.f32 %v1882_v16, %v984_v9  ;;  %v1118_v20 = vadd.f32 %v1117_v14, %v1055_v17  ;;  %v1060_v16 = vmul.f32 %v1906_v40, %v1906_v40  ;;  %v1074_v9 = vmul.f32 %v2010_v55, %v2010_v55 }
 0x13d   :  { %v1119_v22 = vadd.f32 %v1118_v20, %v1056_v56  ;;  %v986_v24 = vadd.f32 %v1892_v26, %v985_v18  ;;  %v1061_v26 = vmul.f32 %v1916_v54, %v1916_v54  ;;  %v1075_v18 = vmul.f32 %v2016_v11, %v2016_v11 }
 0x13f   :  { %v987_v21 = vadd.f32 %v986_v24, %v1914_v48  ;;  %v1120_v27 = vadd.f32 %v1119_v22, %v1057_v2 }
 0x141   :  { %v1121_v29 = vadd.f32 %v1120_v27, %v1058_v25  ;;  %v988_v33 = vadd.f32 %v987_v21, %v1920_v63 }
 0x143   :  { %v989_v31 = vadd.f32 %v1906_v40, %v988_v33  ;;  %v1122_v34 = vadd.f32 %v1121_v29, %v1059_v30  ;;  %v1064_v40 = vmul.f32 %v1930_v7, %v1930_v7 }
 0x145   :  { %v1123_v35 = vadd.f32 %v1122_v34, %v1060_v16  ;;  %v990_v37 = vadd.f32 %v1916_v54, %v989_v31  ;;  %v1065_v54 = vmul.f32 %v1940_v19, %v1940_v19 }
 0x147   :  { %v991_v48 = vadd.f32 %v990_v37, %v1938_v13  ;;  %v1124_v39 = vadd.f32 %v1123_v35, %v1061_v26 }
 0x149   :  { %v1125_v42 = vadd.f32 %v1124_v39, %v1062_v38  ;;  %v992_v63 = vadd.f32 %v991_v48, %v1944_v28 }
 0x14b   :  { %v993_v49 = vadd.f32 %v1930_v7, %v992_v63  ;;  %v1126_v51 = vadd.f32 %v1125_v42, %v1063_v47  ;;  %v1068_v7 = vmul.f32 %v1954_v36, %v1954_v36 }
 0x14d   :  { %v1127_v53 = vadd.f32 %v1126_v51, %v1064_v40  ;;  %v994_v57 = vadd.f32 %v1940_v19, %v993_v49  ;;  %v1069_v19 = vmul.f32 %v1964_v52, %v1964_v52 }
 0x14f   :  { %v995_v13 = vadd.f32 %v994_v57, %v1962_v44  ;;  %v1128_v58 = vadd.f32 %v1127_v53, %v1065_v54 }
 0x151   :  { %v1129_v59 = vadd.f32 %v1128_v58, %v1066_v43  ;;  %v996_v28 = vadd.f32 %v995_v13, %v1968_v62 }
 0x153   :  { %v997_v60 = vadd.f32 %v1954_v36, %v996_v28  ;;  %v1130_v1 = vadd.f32 %v1129_v59, %v1067_v50  ;;  %v1072_v36 = vmul.f32 %v1978_v8, %v1978_v8 }
 0x155   :  { %v1131_v41 = vadd.f32 %v1130_v1, %v1068_v7  ;;  %v998_v3 = vadd.f32 %v1964_v52, %v997_v60  ;;  %v1073_v52 = vmul.f32 %v1988_v23, %v1988_v23 }
 0x157   :  { %v999_v44 = vadd.f32 %v998_v3, %v1986_v15  ;;  %v1132_v45 = vadd.f32 %v1131_v41, %v1069_v19 }
 0x159   :  { %v1133_v6 = vadd.f32 %v1132_v45, %v1070_v4  ;;  %v1000_v62 = vadd.f32 %v999_v44, %v1992_v32 }
 0x15b   :  { %v1001_v61 = vadd.f32 %v1978_v8, %v1000_v62  ;;  %v1134_v5 = vadd.f32 %v1133_v6, %v1071_v10  ;;  %v1076_v8 = vmul.f32 %v2002_v46, %v2002_v46 }
 0x15d   :  { %v1135_v12 = vadd.f32 %v1134_v5, %v1072_v36  ;;  %v1002_v14 = vadd.f32 %v1988_v23, %v1001_v61  ;;  %v1077_v23 = vmul.f32 %v2012_v0, %v2012_v0 }
 0x15f   :  { %v1003_v15 = vadd.f32 %v1002_v14, %v2010_v55  ;;  %v1136_v17 = vadd.f32 %v1135_v12, %v1073_v52 }
 0x161   :  { %v1137_v56 = vadd.f32 %v1136_v17, %v1074_v9  ;;  %v1004_v32 = vadd.f32 %v1003_v15, %v2016_v11 }
 0x163   :  { %v1005_v20 = vadd.f32 %v2002_v46, %v1004_v32  ;;  %v1138_v2 = vadd.f32 %v1137_v56, %v1075_v18 }
 0x165   :  { %v1006_v22 = vadd.f32 %v2012_v0, %v1005_v20  ;;  %v1139_v24 = vadd.f32 %v1138_v2, %v1076_v8 }
 0x167   :  { %v1007_v55 = vrot.slane %v1006_v22, 4  ;;  %v1140_v21 = vadd.f32 %v1139_v24, %v1077_v23 }
 0x169   :  { %v1008_v25 = vadd.f32 %v1007_v55, %v1006_v22  ;;  %v1141_v27 = vrot.slane %v1140_v21, 4 }
 0x16b   :  { %v1009_v29 = vrot.slane %v1008_v25, 2  ;;  %v1142_v33 = vadd.f32 %v1141_v27, %v1140_v21 }
 0x16d   :  { %v1010_v30 = vadd.f32 %v1009_v29, %v1008_v25  ;;  %v1143_v11 = vrot.slane %v1142_v33, 2 }
 0x16f   :  { %v1011_v16 = vrot.slane %v1010_v30, 1  ;;  %v1144_v31 = vadd.f32 %v1143_v11, %v1142_v33 }
 0x171   :  { %v1012_v34 = vadd.f32 %v1011_v16, %v1010_v30  ;;  %v1145_v26 = vrot.slane %v1144_v31, 1 }
 0x173   :  { %1013 = vst [vmem:[%s2137_s3] sm:$0x1] %v1012_v34  ;;  %v1146_v46 = vadd.f32 %v1145_v26, %v1144_v31 }
 0x175   :  { %1147 = vst [vmem:[%s2138_s4] sm:$0x1] %v1146_v46 }

// kernel: bottleneck_forward.6
= control target key start
LH: loop header
LB: loop body
LE: loop exit
PB: predicated region body
PF: predicated region fallthrough
CT: control target
= control target key end

     0   :  { %s1551_s17 = smov 0   ;;  %s1553_s18 = smov 0   ;;  %s1707_s0 = inlined_call_operand.vmem [shape: bf16[2,64,128], index: 0, kind: input, shape index: {}]   ;;  %s1708_s1 = inlined_call_operand.vmem [shape: f32[1,128], index: 1, kind: input, shape index: {}]   ;;  %s1709_s2 = inlined_call_operand.vmem [shape: f32[1,128], index: 2, kind: input, shape index: {}]   ;;  %s1710_s3 = inlined_call_operand.vmem [shape: bf16[128,128], index: 3, kind: input, shape index: {}]   ;;  %s1711_s4 = inlined_call_operand.vmem [shape: bf16[2,8,2,8,256], index: 4, kind: input, shape index: {}]   ;;  %s1712_s5 = inlined_call_operand.vmem [shape: bf16[128,128], index: 5, kind: input, shape index: {}]   ;;  %s1713_s6 = inlined_call_operand.vmem [shape: bf16[2,64,128], index: 6, kind: output, shape index: {0}]   ;;  %s1714_s7 = inlined_call_operand.vmem [shape: bf16[2,64,128], index: 7, kind: output, shape index: {1}]   ;;  %s1715_s8 = inlined_call_operand.vmem [shape: f32[2,1,128], index: 8, kind: output, shape index: {2}]   ;;  %s1716_s9 = inlined_call_operand.vmem [shape: f32[2,1,128], index: 9, kind: output, shape index: {3}]   ;;  %s1717_s10 = inlined_call_operand.vmem [shape: f32[2,1,128], index: 10, kind: output, shape index: {4}]   ;;  %s1718_s11 = inlined_call_operand.vmem [shape: f32[2,1,128], index: 11, kind: output, shape index: {5}]  }
   0x1   :  { %s1555_s19 = smov 0  }
   0x2 LB: > { %s1211_s20 = sadd.s32 4294967295, %s1489_s19   ;;  %s1568_s21 = sadd.s32 1, %s1489_s19   ;;  %s1489_s19 = sphi %s1555_s19, %s1721_s19   ;;  %s1485_s18 = sphi %s1553_s18, %s1720_s18   ;;  %s1481_s17 = sphi %s1551_s17, %s1719_s17  }
   0x3   : > { %s115_s22 = ssub.s32 %s1489_s19, %s1568_s21  ;;  %s118_s23 = sadd.s32 1, %s1485_s18 }
   0x4   : > { %p116_p0 = scmp.eq.s32.totalorder %s115_s22, 0  ;;  %p125_p1 = scmp.ne.s32.totalorder %s1485_s18, %s1481_s17 }
   0x5   : > { %p126_p2 = scmp.eq.s32.totalorder %s1489_s19, 0  ;;  %p1214_p4 = scmp.ge.s32.totalorder %s1489_s19, 2 }
   0x6   : > { %s1577_s24 = scalar_select %p116_p0, %s1485_s18, %s118_s23  }
   0x7   : > { %p127_p3 = por %p126_p2, %p125_p1  ;;  %340 = sbr.rel (%p1214_p4) target bundleno = 20 (0x14), region = 32 }
   0xc   : > { %351 = sbr.rel (!%p127_p3) target bundleno = 20 (0x14), region = 40  ;;  %s353_s25 = sand.u32 (%p127_p3), 1, %s1485_s18  }
   0xd   : > { %s1266_s26 = sshll.u32 (%p127_p3), %s1489_s19, 7  ;;  %s1215_s27 = sshll.u32 (%p127_p3), %s353_s25, 6 }
   0xe   : > { %s358_s30 = scalar_lea.vmem (%p127_p3), %s1711_s4, %s1266_s26  ;;  %s355_s12 = scalar_lea.vmem (%p127_p3), [#allocation2], %s1215_s27 }
   0xf   : > { %v401_v0 = vld [vmem:[%s358_s30] sm:$0xff] (%p127_p3)  ;;  %v403_v1 = vld [vmem:[%s358_s30 + $0x10] sm:$0xff] (%p127_p3) }
  0x10   : > { %v405_v2 = vld [vmem:[%s358_s30 + $0x20] sm:$0xff] (%p127_p3)  ;;  %402 = vst [vmem:[%s355_s12] sm:$0xff] (%p127_p3), %v401_v0  ;;  %404 = vst [vmem:[%s355_s12 + $0x8] sm:$0xff] (%p127_p3), %v403_v1  ;;  %v407_v3 = vld [vmem:[%s358_s30 + $0x30] sm:$0xff] (%p127_p3) }
  0x11   : > { %406 = vst [vmem:[%s355_s12 + $0x10] sm:$0xff] %v405_v2  ;;  %v409_v4 = vld [vmem:[%s358_s30 + $0x40] sm:$0xff]  ;;  %v411_v5 = vld [vmem:[%s358_s30 + $0x50] sm:$0xff]  ;;  %408 = vst [vmem:[%s355_s12 + $0x18] sm:$0xff] %v407_v3 }
  0x12   : > { %410 = vst [vmem:[%s355_s12 + $0x20] sm:$0xff] %v409_v4  ;;  %412 = vst [vmem:[%s355_s12 + $0x28] sm:$0xff] %v411_v5  ;;  %v413_v6 = vld [vmem:[%s358_s30 + $0x60] sm:$0xff]  ;;  %v415_v7 = vld [vmem:[%s358_s30 + $0x70] sm:$0xff] }
  0x13   : > { %414 = vst [vmem:[%s355_s12 + $0x30] sm:$0xff] %v413_v6  ;;  %416 = vst [vmem:[%s355_s12 + $0x38] sm:$0xff] %v415_v7 }
  0x14 PF: > { %p1218_p5 = scmp.ge.s32.totalorder %s1489_s19, 1  ;;  %p421_p6 = scmp.lt.s32.totalorder %s1489_s19, 3 }
  0x16   : > { %p422_p7 = pnand %p1218_p5, %p421_p6 }
  0x17   : > { %p489_p8 = scmp.lt.s32.totalorder (!%p422_p7), %s1211_s20, 1  ;;  %s428_s14 = sand.u32 (!%p422_p7), 1, %s1481_s17  }
  0x18   : > { %425 = sbr.rel (%p422_p7) target bundleno = 291 (0x123), region = 78  ;;  %s1219_s19 = sshll.u32 (!%p422_p7), %s428_s14, 6 }
  0x19   : > { %s1643_s26 = scalar_lea.vmem (!%p422_p7), [#allocation2], %s1219_s19 }
  0x1d   : > { %v1447_v8 = vld [vmem:[%s1710_s3 + $0x38] sm:$0xff]   ;;  %v1449_v10 = vld [vmem:[%s1710_s3 + $0x30] sm:$0xff]   ;;  %v1451_v12 = vld [vmem:[%s1710_s3 + $0x28] sm:$0xff]   ;;  %s1723_s20 = smov (!%p489_p8, %s1211_s20), 1 }
  0x1e   : > { %v1448_v9 = vld [vmem:[%s1712_s5 + $0x38] sm:$0xff]   ;;  %1375 = vmatprep.subr.bf16.mxu0 %v1447_v8  ;;  %v1450_v11 = vld [vmem:[%s1712_s5 + $0x30] sm:$0xff]   ;;  %v1452_v13 = vld [vmem:[%s1712_s5 + $0x28] sm:$0xff]   ;;  %s1619_s22 = sshll.u32 %s1723_s20, 5  ;;  %s506_s17 = scalar_lea.vmem %s1715_s8, %s1723_s20 }
  0x1f   : > { %1399 = vmatprep.subr.bf16.mxu1 %v1448_v9  ;;  %1376 = vmatpush3.bf16.msra.mxu0 %v1447_v8  ;;  %v1453_v14 = vld [vmem:[%s1710_s3 + $0x20] sm:$0xff]   ;;  %v1455_v16 = vld [vmem:[%s1710_s3 + $0x18] sm:$0xff]   ;;  %s493_s29 = scalar_lea.vmem %s1707_s0, %s1619_s22  ;;  %v1457_v18 = vld [vmem:[%s1710_s3 + $0x10] sm:$0xff]   ;;  %s1665_s16 = scalar_lea.vmem %s1713_s6, %s1619_s22 }
  0x20   : > { %1400 = vmatpush3.bf16.msra.mxu1 %v1448_v9  ;;  %1377 = vmatprep.subr.bf16.mxu0 %v1449_v10  ;;  %v1454_v15 = vld [vmem:[%s1712_s5 + $0x20] sm:$0xff]   ;;  %v1456_v17 = vld [vmem:[%s1712_s5 + $0x18] sm:$0xff]   ;;  %v1458_v19 = vld [vmem:[%s1712_s5 + $0x10] sm:$0xff]   ;;  %s1671_s27 = scalar_lea.vmem %s1714_s7, %s1619_s22  ;;  %s509_s13 = scalar_lea.vmem %s1716_s9, %s1723_s20 }
  0x21   : > { %1401 = vmatprep.subr.bf16.mxu1 %v1450_v11  ;;  %v1287_v20 = vld [vmem:[%s493_s29] sm:$0xff]   ;;  %v1342_v26 = vld [vmem:[%s493_s29 + $0x8] sm:$0xff]   ;;  %v1343_v31 = vld [vmem:[%s493_s29 + $0x10] sm:$0xff]  }
  0x22   : > { %v1226_v21 = vld [vmem:[%s1708_s1] ss:$0 sm:$0xff]  ;;  %v1288_v23 = vunpack.c.l.bf16 %v1287_v20  ;;  %v1289_v24 = vunpack.c.h.bf16 %v1287_v20  ;;  %v1292_v29 = vunpack.c.l.bf16 %v1342_v26  ;;  %v1293_v30 = vunpack.c.h.bf16 %v1342_v26  ;;  %v1459_v32 = vld [vmem:[%s1710_s3 + $0x8] sm:$0xff]   ;;  %v1344_v35 = vld [vmem:[%s493_s29 + $0x18] sm:$0xff]   ;;  %s512_s29 = scalar_lea.vmem %s1717_s10, %s1723_s20 }
  0x23   : > { %1378 = vmatpush3.bf16.msra.mxu0 %v1449_v10  ;;  %v1227_v22 = vld [vmem:[%s1709_s2] ss:$0 sm:$0xff]  ;;  %v1296_v33 = vunpack.c.l.bf16 %v1343_v31  ;;  %v1297_v34 = vunpack.c.h.bf16 %v1343_v31  ;;  %v1460_v36 = vld [vmem:[%s1712_s5 + $0x8] sm:$0xff]   ;;  %v1300_v43 = vunpack.c.l.bf16 %v1344_v35  ;;  %v1301_v44 = vunpack.c.h.bf16 %v1344_v35  ;;  %v1464_v63 = vld [vmem:[%s1643_s26 + $0x10] ss:$8 sps:$4 sm:$0xff]  }
  0x24   : > { %1402 = vmatpush3.bf16.msra.mxu1 %v1450_v11  ;;  %1379 = vmatprep.subr.bf16.mxu0 %v1451_v12  ;;  %v1463_v25 = vld [vmem:[%s1643_s26] ss:$8 sps:$4 sm:$0xff]   ;;  %v540_v27 = vmul.f32 %v1288_v23, %v1226_v21  ;;  %v541_v28 = vmul.f32 %v1289_v24, %v1226_v21  ;;  %v542_v39 = vmul.f32 %v1292_v29, %v1226_v21  ;;  %v1466_v5 = vld [vmem:[%s1643_s26 + $0x30] ss:$8 sps:$4 sm:$0xff]  }
  0x25   : > { %1403 = vmatprep.subr.bf16.mxu1 %v1452_v13  ;;  %1415 = vmatprep.mubr.bf16.mxu1 %v1463_v25  ;;  %v543_v40 = vmul.f32 %v1293_v30, %v1226_v21  ;;  %v544_v41 = vmul.f32 %v1296_v33, %v1226_v21  ;;  %v545_v42 = vmul.f32 %v1297_v34, %v1226_v21  ;;  %v1461_v49 = vld [vmem:[%s1710_s3] sm:$0xff]  }
  0x26   : > { %v555_v37 = vadd.f32 %v1227_v22, %v540_v27  ;;  %v556_v38 = vadd.f32 %v1227_v22, %v541_v28  ;;  %v557_v47 = vadd.f32 %v1227_v22, %v542_v39  ;;  %v1462_v52 = vld [vmem:[%s1712_s5] sm:$0xff]   ;;  %v546_v56 = vmul.f32 %v1300_v43, %v1226_v21 }
  0x27   : > { %1380 = vmatpush3.bf16.msra.mxu0 %v1451_v12  ;;  %v558_v48 = vadd.f32 %v1227_v22, %v543_v40  ;;  %v559_v50 = vadd.f32 %v1227_v22, %v544_v41  ;;  %v560_v51 = vadd.f32 %v1227_v22, %v545_v42  ;;  %v547_v57 = vmul.f32 %v1301_v44, %v1226_v21  ;;  %v1465_v1 = vld [vmem:[%s1643_s26 + $0x20] ss:$8 sps:$4 sm:$0xff]  }
  0x28   : > { %1404 = vmatpush3.bf16.msra.mxu1 %v1452_v13  ;;  %1381 = vmatprep.subr.bf16.mxu0 %v1453_v14  ;;  %v563_v45 = vmax.f32 %v555_v37, 0.0  ;;  %v564_v46 = vmax.f32 %v556_v38, 0.0  ;;  %v565_v54 = vmax.f32 %v557_v47, 0.0  ;;  %v561_v61 = vadd.f32 %v1227_v22, %v546_v56 }
  0x29   : > { %1405 = vmatprep.subr.bf16.mxu1 %v1454_v15  ;;  %v566_v55 = vmax.f32 %v558_v48, 0.0  ;;  %v567_v58 = vmax.f32 %v559_v50, 0.0  ;;  %v568_v59 = vmax.f32 %v560_v51, 0.0  ;;  %v562_v62 = vadd.f32 %v1227_v22, %v547_v57 }
  0x2a   : > { %v571_v53 = vpack.c.bf16 %v564_v46, %v563_v45  ;;  %v569_v2 = vmax.f32 %v561_v61, 0.0 }
  0x2b   : > { %1382 = vmatpush3.bf16.msra.mxu0 %v1453_v14  ;;  %v572_v60 = vpack.c.bf16 %v566_v55, %v565_v54  ;;  %v573_v0 = vpack.c.bf16 %v568_v59, %v567_v58  ;;  %v570_v3 = vmax.f32 %v562_v62, 0.0 }
  0x2c   : > { %1406 = vmatpush3.bf16.msra.mxu1 %v1454_v15  ;;  %1383 = vmatprep.subr.bf16.mxu0 %v1455_v16 }
  0x2d   : > { %1407 = vmatprep.subr.bf16.mxu1 %v1456_v17  ;;  %1391 = vmatprep.mubr.bf16.mxu0 %v571_v53  ;;  %v574_v4 = vpack.c.bf16 %v570_v3, %v569_v2 }
  0x2f   : > { %1384 = vmatpush3.bf16.msra.mxu0 %v1455_v16 }
  0x30   : > { %1408 = vmatpush3.bf16.msra.mxu1 %v1456_v17  ;;  %1385 = vmatprep.subr.bf16.mxu0 %v1457_v18 }
  0x31   : > { %1409 = vmatprep.subr.bf16.mxu1 %v1458_v19 }
  0x33   : > { %1386 = vmatpush3.bf16.msra.mxu0 %v1457_v18 }
  0x34   : > { %1410 = vmatpush3.bf16.msra.mxu1 %v1458_v19  ;;  %1387 = vmatprep.subr.bf16.mxu0 %v1459_v32 }
  0x35   : > { %1411 = vmatprep.subr.bf16.mxu1 %v1460_v36 }
  0x37   : > { %1388 = vmatpush3.bf16.msra.mxu0 %v1459_v32 }
  0x38   : > { %1412 = vmatpush3.bf16.msra.mxu1 %v1460_v36  ;;  %1389 = vmatprep.subr.bf16.mxu0 %v1461_v49 }
  0x39   : > { %1413 = vmatprep.subr.bf16.mxu1 %v1462_v52 }
  0x3b   : > { %1390 = vmatpush3.bf16.msra.mxu0 %v1461_v49 }
  0x3c   : > { %1414 = vmatpush3.bf16.msra.mxu1 %v1462_v52 }
  0x3e   : > { %1392 = vmatmul.mubr.bf16.vlgmr.msra.gmra.mxu0 %v572_v60 }
  0x3f   : > { %1416 = vmatmul.mubr.bf16.vlgmr.msra.gmra.mxu1 %v1464_v63  ;;  %1395 = vmatprep.mubr.bf16.mxu0 %v573_v0 }
  0x40   : > { %1419 = vmatprep.mubr.bf16.mxu1 %v1465_v1 }
  0x46   : > { %1396 = vmatmul.mubr.bf16.gmra.mxu0 %v574_v4 }
  0x47   : > { %1420 = vmatmul.mubr.bf16.gmra.mxu1 %v1466_v5 }
  0xfe   : > { %v1393_v6 = vpop.f32.mrf.mxu0 }
  0xff   : > { %v1417_v7 = vpop.f32.mrf.mxu1  ;;  %v949_v25 = vmul.f32 %v1393_v6, %v1393_v6 }
 0x100   : > { %v673_v8 = vpop.f32.mrf.mxu0  ;;  %v985_v29 = vmul.f32 %v1417_v7, %v1417_v7 }
 0x101   : > { %v822_v9 = vpop.f32.mrf.mxu1  ;;  %v947_v15 = vmul.f32 %v673_v8, %v673_v8 }
 0x102   : > { %v1394_v10 = vpop.f32.mrf.mxu0  ;;  %v983_v20 = vmul.f32 %v822_v9, %v822_v9 }
 0x103   : > { %v1310_v11 = vpack.c.bf16 %v1394_v10, %v1393_v6  ;;  %v1418_v12 = vpop.f32.mrf.mxu1  ;;  %v950_v33 = vmul.f32 %v1394_v10, %v1394_v10 }
 0x104   : > { %v1330_v13 = vpack.c.bf16 %v1418_v12, %v1417_v7  ;;  %v676_v14 = vpop.f32.mrf.mxu0  ;;  %v986_v37 = vmul.f32 %v1418_v12, %v1418_v12 }
 0x105   : > { %1345 = vst [vmem:[%s1665_s16 + $0x8] sm:$0xff] %v1310_v11   ;;  %v1305_v16 = vpack.c.bf16 %v676_v14, %v673_v8  ;;  %v933_v17 = vadd.f32 %v676_v14, %v673_v8  ;;  %v948_v18 = vmul.f32 %v676_v14, %v676_v14  ;;  %v825_v19 = vpop.f32.mrf.mxu1 }
 0x106   : > { %1348 = vst [vmem:[%s1671_s27 + $0x8] sm:$0xff] %v1330_v13   ;;  %v1325_v21 = vpack.c.bf16 %v825_v19, %v822_v9  ;;  %v969_v22 = vadd.f32 %v825_v19, %v822_v9  ;;  %v984_v23 = vmul.f32 %v825_v19, %v825_v19  ;;  %v1397_v24 = vpop.f32.mrf.mxu0 }
 0x107   : > { %1306 = vst [vmem:[%s1665_s16] sm:$0xff] %v1305_v16   ;;  %v934_v26 = vadd.f32 %v1393_v6, %v933_v17  ;;  %v955_v27 = vadd.f32 %v948_v18, %v947_v15  ;;  %v1421_v28 = vpop.f32.mrf.mxu1  ;;  %v953_v60 = vmul.f32 %v1397_v24, %v1397_v24 }
 0x108   : > { %1326 = vst [vmem:[%s1671_s27] sm:$0xff] %v1325_v21   ;;  %v970_v30 = vadd.f32 %v1417_v7, %v969_v22  ;;  %v991_v31 = vadd.f32 %v984_v23, %v983_v20  ;;  %v689_v32 = vpop.f32.mrf.mxu0  ;;  %v989_v63 = vmul.f32 %v1421_v28, %v1421_v28 }
 0x109   : > { %v956_v34 = vadd.f32 %v955_v27, %v949_v25  ;;  %v935_v35 = vadd.f32 %v1394_v10, %v934_v26  ;;  %v838_v36 = vpop.f32.mrf.mxu1  ;;  %v951_v42 = vmul.f32 %v689_v32, %v689_v32 }
 0x10a   : > { %v992_v38 = vadd.f32 %v991_v31, %v985_v29  ;;  %v971_v39 = vadd.f32 %v1418_v12, %v970_v30  ;;  %v1398_v40 = vpop.f32.mrf.mxu0  ;;  %v987_v47 = vmul.f32 %v838_v36, %v838_v36 }
 0x10b   : > { %v936_v41 = vadd.f32 %v935_v35, %v689_v32  ;;  %v957_v43 = vadd.f32 %v956_v34, %v950_v33  ;;  %v1320_v44 = vpack.c.bf16 %v1398_v40, %v1397_v24  ;;  %v1422_v45 = vpop.f32.mrf.mxu1  ;;  %v954_v2 = vmul.f32 %v1398_v40, %v1398_v40 }
 0x10c   : > { %v972_v46 = vadd.f32 %v971_v39, %v838_v36  ;;  %v993_v48 = vadd.f32 %v992_v38, %v986_v37  ;;  %v1340_v49 = vpack.c.bf16 %v1422_v45, %v1421_v28  ;;  %v692_v50 = vpop.f32.mrf.mxu0  ;;  %v990_v5 = vmul.f32 %v1422_v45, %v1422_v45 }
 0x10d   : > { %v958_v51 = vadd.f32 %v957_v43, %v951_v42  ;;  %1347 = vst [vmem:[%s1665_s16 + $0x18] sm:$0xff] %v1320_v44   ;;  %v1315_v52 = vpack.c.bf16 %v692_v50, %v689_v32  ;;  %v937_v53 = vadd.f32 %v936_v41, %v692_v50  ;;  %v952_v54 = vmul.f32 %v692_v50, %v692_v50  ;;  %v841_v55 = vpop.f32.mrf.mxu1 }
 0x10e   : > { %v994_v56 = vadd.f32 %v993_v48, %v987_v47  ;;  %1350 = vst [vmem:[%s1671_s27 + $0x18] sm:$0xff] %v1340_v49   ;;  %v1335_v57 = vpack.c.bf16 %v841_v55, %v838_v36  ;;  %v973_v58 = vadd.f32 %v972_v46, %v841_v55  ;;  %v988_v59 = vmul.f32 %v841_v55, %v841_v55 }
 0x10f   : > { %1346 = vst [vmem:[%s1665_s16 + $0x10] sm:$0xff] %v1315_v52   ;;  %v938_v61 = vadd.f32 %v1397_v24, %v937_v53  ;;  %v959_v62 = vadd.f32 %v958_v51, %v952_v54  ;;  %s515_s16 = scalar_lea.vmem %s1718_s11, %s1723_s20 }
 0x110   : > { %1349 = vst [vmem:[%s1671_s27 + $0x10] sm:$0xff] %v1335_v57   ;;  %v974_v0 = vadd.f32 %v1421_v28, %v973_v58  ;;  %v995_v1 = vadd.f32 %v994_v56, %v988_v59 }
 0x111   : > { %v939_v3 = vadd.f32 %v1398_v40, %v938_v61  ;;  %v960_v4 = vadd.f32 %v959_v62, %v953_v60 }
 0x112   : > { %v975_v6 = vadd.f32 %v1422_v45, %v974_v0  ;;  %v996_v7 = vadd.f32 %v995_v1, %v989_v63 }
 0x113   : > { %v940_v8 = vrot.slane %v939_v3, 4  ;;  %v961_v9 = vadd.f32 %v960_v4, %v954_v2 }
 0x114   : > { %v976_v10 = vrot.slane %v975_v6, 4  ;;  %v997_v11 = vadd.f32 %v996_v7, %v990_v5 }
 0x115   : > { %v941_v12 = vadd.f32 %v940_v8, %v939_v3  ;;  %v962_v13 = vrot.slane %v961_v9, 4 }
 0x116   : > { %v977_v14 = vadd.f32 %v976_v10, %v975_v6  ;;  %v998_v15 = vrot.slane %v997_v11, 4 }
 0x117   : > { %v942_v16 = vrot.slane %v941_v12, 2  ;;  %v963_v17 = vadd.f32 %v962_v13, %v961_v9 }
 0x118   : > { %v978_v18 = vrot.slane %v977_v14, 2  ;;  %v999_v19 = vadd.f32 %v998_v15, %v997_v11 }
 0x119   : > { %v943_v20 = vadd.f32 %v942_v16, %v941_v12  ;;  %v964_v21 = vrot.slane %v963_v17, 2 }
 0x11a   : > { %v979_v22 = vadd.f32 %v978_v18, %v977_v14  ;;  %v1000_v23 = vrot.slane %v999_v19, 2 }
 0x11b   : > { %v944_v24 = vrot.slane %v943_v20, 1  ;;  %v965_v25 = vadd.f32 %v964_v21, %v963_v17 }
 0x11c   : > { %v980_v26 = vrot.slane %v979_v22, 1  ;;  %v1001_v27 = vadd.f32 %v1000_v23, %v999_v19 }
 0x11d   : > { %v945_v28 = vadd.f32 %v944_v24, %v943_v20  ;;  %v966_v29 = vrot.slane %v965_v25, 1 }
 0x11e   : > { %v981_v30 = vadd.f32 %v980_v26, %v979_v22  ;;  %v1002_v31 = vrot.slane %v1001_v27, 1 }
 0x11f   : > { %946 = vst [vmem:[%s506_s17] sm:$0x1] %v945_v28  ;;  %v967_v32 = vadd.f32 %v966_v29, %v965_v25 }
 0x120   : > { %982 = vst [vmem:[%s512_s29] sm:$0x1] %v981_v30  ;;  %v1003_v33 = vadd.f32 %v1002_v31, %v1001_v27 }
 0x121   : > { %968 = vst [vmem:[%s509_s13] sm:$0x1] %v967_v32 }
 0x122   : > { %1004 = vst [vmem:[%s515_s16] sm:$0x1] %v1003_v33 }
 0x123 PF: > { %p19_p9 = scmp.ge.s32.totalorder %s1568_s21, 4   ;;  %s1719_s17 = smov %s1485_s18 }
 0x124   : > { %s1720_s18 = smov %s1577_s24  ;;  %s1721_s19 = smov %s1568_s21 }
 0x125   :  { %21 = sbr.rel (!%p19_p9) target bundleno = 2 (0x2), region = 180 }

// kernel: bottleneck_forward.7
= control target key start
LH: loop header
LB: loop body
LE: loop exit
PB: predicated region body
PF: predicated region fallthrough
CT: control target
= control target key end

     0   :  { %s528_s0 = inlined_call_operand.vmem [shape: bf16[128,128], index: 0, kind: input, shape index: {}]   ;;  %s529_s1 = inlined_call_operand.vmem [shape: f32[1,128], index: 1, kind: input, shape index: {}]   ;;  %s530_s2 = inlined_call_operand.vmem [shape: f32[1,128], index: 2, kind: input, shape index: {}]   ;;  %s531_s3 = inlined_call_operand.vmem [shape: bf16[128,128], index: 3, kind: input, shape index: {}]   ;;  %s532_s4 = inlined_call_operand.vmem [shape: f32[1,128], index: 4, kind: input, shape index: {}]   ;;  %s533_s5 = inlined_call_operand.vmem [shape: f32[1,128], index: 5, kind: input, shape index: {}]   ;;  %s534_s6 = inlined_call_operand.vmem [shape: f32[128,128], index: 6, kind: output, shape index: {}]  }
   0x1   :  { %v236_v0 = vld [vmem:[%s528_s0] sm:$0xff]   ;;  %v299_v9 = vld [vmem:[%s528_s0 + $0x8] sm:$0xff]   ;;  %v300_v20 = vld [vmem:[%s528_s0 + $0x10] sm:$0xff]  }
   0x2   :  { %v354_v1 = vld [vmem:[%s529_s1] ss:$0 sm:$0xff]  ;;  %v237_v2 = vunpack.c.l.bf16 %v236_v0  ;;  %v238_v5 = vunpack.c.h.bf16 %v236_v0  ;;  %v306_v10 = vld [vmem:[%s531_s3 + $0x8] sm:$0xff]   ;;  %v241_v14 = vunpack.c.l.bf16 %v299_v9  ;;  %v242_v18 = vunpack.c.h.bf16 %v299_v9  ;;  %v307_v21 = vld [vmem:[%s531_s3 + $0x10] sm:$0xff]  }
   0x3   :  { %v268_v3 = vld [vmem:[%s531_s3] sm:$0xff]   ;;  %v273_v15 = vunpack.c.l.bf16 %v306_v10  ;;  %v274_v19 = vunpack.c.h.bf16 %v306_v10  ;;  %v245_v32 = vunpack.c.l.bf16 %v300_v20  ;;  %v277_v33 = vunpack.c.l.bf16 %v307_v21  ;;  %v301_v42 = vld [vmem:[%s528_s0 + $0x18] sm:$0xff]  }
   0x4   :  { %v362_v4 = vld [vmem:[%s532_s4] ss:$0 sm:$0xff]  ;;  %v269_v7 = vunpack.c.l.bf16 %v268_v3  ;;  %v270_v8 = vunpack.c.h.bf16 %v268_v3  ;;  %v62_v11 = vmul.f32 %v237_v2, %v354_v1  ;;  %v63_v13 = vmul.f32 %v238_v5, %v354_v1  ;;  %v308_v43 = vld [vmem:[%s531_s3 + $0x18] sm:$0xff]  }
   0x5   :  { %v367_v6 = vld [vmem:[%s530_s2] ss:$0 sm:$0xff]  ;;  %v64_v24 = vmul.f32 %v241_v14, %v354_v1  ;;  %v142_v25 = vmul.f32 %v273_v15, %v362_v4  ;;  %v65_v28 = vmul.f32 %v242_v18, %v354_v1  ;;  %v143_v29 = vmul.f32 %v274_v19, %v362_v4  ;;  %v303_v14 = vld [vmem:[%s528_s0 + $0x28] sm:$0xff]  }
   0x6   :  { %v379_v12 = vld [vmem:[%s533_s5] ss:$0 sm:$0xff]  ;;  %v140_v16 = vmul.f32 %v269_v7, %v362_v4  ;;  %v141_v17 = vmul.f32 %v270_v8, %v362_v4  ;;  %v85_v22 = vadd.f32 %v367_v6, %v62_v11  ;;  %v86_v23 = vadd.f32 %v367_v6, %v63_v13  ;;  %v310_v19 = vld [vmem:[%s531_s3 + $0x28] sm:$0xff]  }
   0x7   :  { %v87_v30 = vadd.f32 %v367_v6, %v64_v24  ;;  %v165_v31 = vadd.f32 %v379_v12, %v142_v25  ;;  %v88_v36 = vadd.f32 %v367_v6, %v65_v28  ;;  %v166_v37 = vadd.f32 %v379_v12, %v143_v29  ;;  %v302_v52 = vld [vmem:[%s528_s0 + $0x20] sm:$0xff]  }
   0x8   :  { %v163_v26 = vadd.f32 %v379_v12, %v140_v16  ;;  %v164_v27 = vadd.f32 %v379_v12, %v141_v17  ;;  %v66_v39 = vmul.f32 %v245_v32, %v354_v1  ;;  %v144_v40 = vmul.f32 %v277_v33, %v362_v4  ;;  %v309_v57 = vld [vmem:[%s531_s3 + $0x20] sm:$0xff]   ;;  %v304_v32 = vld [vmem:[%s528_s0 + $0x30] sm:$0xff]  }
   0x9   :  { %v181_v38 = vadd.f32 %v165_v31, %v87_v30  ;;  %v246_v41 = vunpack.c.h.bf16 %v300_v20  ;;  %v182_v46 = vadd.f32 %v166_v37, %v88_v36  ;;  %v278_v47 = vunpack.c.h.bf16 %v307_v21  ;;  %v311_v33 = vld [vmem:[%s531_s3 + $0x30] sm:$0xff]  }
   0xa   :  { %v179_v34 = vadd.f32 %v163_v26, %v85_v22  ;;  %v180_v35 = vadd.f32 %v164_v27, %v86_v23  ;;  %v89_v49 = vadd.f32 %v367_v6, %v66_v39  ;;  %v167_v50 = vadd.f32 %v379_v12, %v144_v40 }
   0xb   :  { %v197_v48 = vmax.f32 %v181_v38, 0.0  ;;  %v67_v51 = vmul.f32 %v246_v41, %v354_v1  ;;  %v198_v53 = vmax.f32 %v182_v46, 0.0  ;;  %v145_v54 = vmul.f32 %v278_v47, %v362_v4  ;;  %v305_v46 = vld [vmem:[%s528_s0 + $0x38] sm:$0xff]  }
   0xc   :  { %v195_v44 = vmax.f32 %v179_v34, 0.0  ;;  %v196_v45 = vmax.f32 %v180_v35, 0.0  ;;  %v249_v55 = vunpack.c.l.bf16 %v301_v42  ;;  %v281_v56 = vunpack.c.l.bf16 %v308_v43 }
   0xd   :  { %213 = vst [vmem:[%s534_s6 + $0x10] sm:$0xff] %v197_v48  ;;  %v183_v58 = vadd.f32 %v167_v50, %v89_v49  ;;  %v90_v59 = vadd.f32 %v367_v6, %v67_v51  ;;  %v250_v60 = vunpack.c.h.bf16 %v301_v42  ;;  %v282_v61 = vunpack.c.h.bf16 %v308_v43  ;;  %214 = vst [vmem:[%s534_s6 + $0x18] sm:$0xff] %v198_v53 }
   0xe   :  { %211 = vst [vmem:[%s534_s6] sm:$0xff] %v195_v44  ;;  %212 = vst [vmem:[%s534_s6 + $0x8] sm:$0xff] %v196_v45  ;;  %v168_v62 = vadd.f32 %v379_v12, %v145_v54  ;;  %v68_v63 = vmul.f32 %v249_v55, %v354_v1  ;;  %v146_v0 = vmul.f32 %v281_v56, %v362_v4  ;;  %v253_v2 = vunpack.c.l.bf16 %v302_v52  ;;  %v312_v55 = vld [vmem:[%s531_s3 + $0x38] sm:$0xff]  }
   0xf   :  { %v199_v3 = vmax.f32 %v183_v58, 0.0  ;;  %v69_v5 = vmul.f32 %v250_v60, %v354_v1  ;;  %v147_v7 = vmul.f32 %v282_v61, %v362_v4  ;;  %v285_v8 = vunpack.c.l.bf16 %v309_v57 }
  0x10   :  { %v184_v9 = vadd.f32 %v168_v62, %v90_v59  ;;  %v91_v10 = vadd.f32 %v367_v6, %v68_v63  ;;  %v169_v11 = vadd.f32 %v379_v12, %v146_v0  ;;  %v70_v13 = vmul.f32 %v253_v2, %v354_v1 }
  0x11   :  { %215 = vst [vmem:[%s534_s6 + $0x20] sm:$0xff] %v199_v3  ;;  %v92_v15 = vadd.f32 %v367_v6, %v69_v5  ;;  %v170_v16 = vadd.f32 %v379_v12, %v147_v7  ;;  %v148_v17 = vmul.f32 %v285_v8, %v362_v4  ;;  %v254_v18 = vunpack.c.h.bf16 %v302_v52 }
  0x12   :  { %v200_v20 = vmax.f32 %v184_v9, 0.0  ;;  %v185_v21 = vadd.f32 %v169_v11, %v91_v10  ;;  %v93_v22 = vadd.f32 %v367_v6, %v70_v13  ;;  %v286_v23 = vunpack.c.h.bf16 %v309_v57 }
  0x13   :  { %v186_v24 = vadd.f32 %v170_v16, %v92_v15  ;;  %v171_v25 = vadd.f32 %v379_v12, %v148_v17  ;;  %v71_v26 = vmul.f32 %v254_v18, %v354_v1  ;;  %v257_v27 = vunpack.c.l.bf16 %v303_v14 }
  0x14   :  { %216 = vst [vmem:[%s534_s6 + $0x28] sm:$0xff] %v200_v20  ;;  %v201_v28 = vmax.f32 %v185_v21, 0.0  ;;  %v149_v29 = vmul.f32 %v286_v23, %v362_v4  ;;  %v289_v30 = vunpack.c.l.bf16 %v310_v19  ;;  %v258_v31 = vunpack.c.h.bf16 %v303_v14 }
  0x15   :  { %v202_v34 = vmax.f32 %v186_v24, 0.0  ;;  %v187_v35 = vadd.f32 %v171_v25, %v93_v22  ;;  %v94_v36 = vadd.f32 %v367_v6, %v71_v26  ;;  %v72_v37 = vmul.f32 %v257_v27, %v354_v1 }
  0x16   :  { %217 = vst [vmem:[%s534_s6 + $0x30] sm:$0xff] %v201_v28  ;;  %v172_v38 = vadd.f32 %v379_v12, %v149_v29  ;;  %v150_v39 = vmul.f32 %v289_v30, %v362_v4  ;;  %v73_v40 = vmul.f32 %v258_v31, %v354_v1  ;;  %v290_v41 = vunpack.c.h.bf16 %v310_v19 }
  0x17   :  { %218 = vst [vmem:[%s534_s6 + $0x38] sm:$0xff] %v202_v34  ;;  %v203_v42 = vmax.f32 %v187_v35, 0.0  ;;  %v95_v43 = vadd.f32 %v367_v6, %v72_v37  ;;  %v261_v44 = vunpack.c.l.bf16 %v304_v32  ;;  %v293_v45 = vunpack.c.l.bf16 %v311_v33 }
  0x18   :  { %v188_v47 = vadd.f32 %v172_v38, %v94_v36  ;;  %v173_v48 = vadd.f32 %v379_v12, %v150_v39  ;;  %v96_v49 = vadd.f32 %v367_v6, %v73_v40  ;;  %v151_v50 = vmul.f32 %v290_v41, %v362_v4 }
  0x19   :  { %219 = vst [vmem:[%s534_s6 + $0x40] sm:$0xff] %v203_v42  ;;  %v74_v51 = vmul.f32 %v261_v44, %v354_v1  ;;  %v152_v52 = vmul.f32 %v293_v45, %v362_v4  ;;  %v262_v53 = vunpack.c.h.bf16 %v304_v32  ;;  %v294_v54 = vunpack.c.h.bf16 %v311_v33 }
  0x1a   :  { %v204_v56 = vmax.f32 %v188_v47, 0.0  ;;  %v189_v57 = vadd.f32 %v173_v48, %v95_v43  ;;  %v174_v58 = vadd.f32 %v379_v12, %v151_v50  ;;  %v265_v59 = vunpack.c.l.bf16 %v305_v46 }
  0x1b   :  { %v97_v60 = vadd.f32 %v367_v6, %v74_v51  ;;  %v175_v61 = vadd.f32 %v379_v12, %v152_v52  ;;  %v75_v62 = vmul.f32 %v262_v53, %v354_v1  ;;  %v153_v63 = vmul.f32 %v294_v54, %v362_v4 }
  0x1c   :  { %220 = vst [vmem:[%s534_s6 + $0x48] sm:$0xff] %v204_v56  ;;  %v205_v0 = vmax.f32 %v189_v57, 0.0  ;;  %v190_v2 = vadd.f32 %v174_v58, %v96_v49  ;;  %v76_v3 = vmul.f32 %v265_v59, %v354_v1  ;;  %v297_v5 = vunpack.c.l.bf16 %v312_v55 }
  0x1d   :  { %v191_v7 = vadd.f32 %v175_v61, %v97_v60  ;;  %v98_v8 = vadd.f32 %v367_v6, %v75_v62  ;;  %v176_v9 = vadd.f32 %v379_v12, %v153_v63  ;;  %v266_v10 = vunpack.c.h.bf16 %v305_v46 }
  0x1e   :  { %221 = vst [vmem:[%s534_s6 + $0x50] sm:$0xff] %v205_v0  ;;  %v206_v11 = vmax.f32 %v190_v2, 0.0  ;;  %v99_v13 = vadd.f32 %v367_v6, %v76_v3  ;;  %v154_v14 = vmul.f32 %v297_v5, %v362_v4  ;;  %v298_v15 = vunpack.c.h.bf16 %v312_v55 }
  0x1f   :  { %v207_v16 = vmax.f32 %v191_v7, 0.0  ;;  %v192_v17 = vadd.f32 %v176_v9, %v98_v8  ;;  %v77_v18 = vmul.f32 %v266_v10, %v354_v1 }
  0x20   :  { %222 = vst [vmem:[%s534_s6 + $0x58] sm:$0xff] %v206_v11  ;;  %v177_v19 = vadd.f32 %v379_v12, %v154_v14  ;;  %v155_v20 = vmul.f32 %v298_v15, %v362_v4 }
  0x21   :  { %223 = vst [vmem:[%s534_s6 + $0x60] sm:$0xff] %v207_v16  ;;  %v208_v21 = vmax.f32 %v192_v17, 0.0  ;;  %v100_v22 = vadd.f32 %v367_v6, %v77_v18 }
  0x22   :  { %v193_v23 = vadd.f32 %v177_v19, %v99_v13  ;;  %v178_v24 = vadd.f32 %v379_v12, %v155_v20 }
  0x23   :  { %224 = vst [vmem:[%s534_s6 + $0x68] sm:$0xff] %v208_v21 }
  0x24   :  { %v209_v1 = vmax.f32 %v193_v23, 0.0  ;;  %v194_v25 = vadd.f32 %v178_v24, %v100_v22 }
  0x26   :  { %225 = vst [vmem:[%s534_s6 + $0x70] sm:$0xff] %v209_v1  ;;  %v210_v4 = vmax.f32 %v194_v25, 0.0 }
  0x28   :  { %226 = vst [vmem:[%s534_s6 + $0x78] sm:$0xff] %v210_v4 }

// kernel: bottleneck_forward.5
= control target key start
LH: loop header
LB: loop body
LE: loop exit
PB: predicated region body
PF: predicated region fallthrough
CT: control target
= control target key end

     0   :  { %s2385_s21 = smov 0   ;;  %s2926_s0 = inlined_call_operand.vmem [shape: bf16[2,8,2,8,256], index: 0, kind: input, shape index: {}]   ;;  %s2927_s1 = inlined_call_operand.vmem [shape: f32[1,256], index: 1, kind: input, shape index: {}]   ;;  %s2928_s2 = inlined_call_operand.vmem [shape: f32[1,256], index: 2, kind: input, shape index: {}]   ;;  %s2929_s3 = inlined_call_operand.vmem [shape: bf16[3,384,128], index: 3, kind: input, shape index: {}]   ;;  %s2930_s4 = inlined_call_operand.vmem [shape: bf16[2,64,128], index: 4, kind: output, shape index: {0}]   ;;  %s2931_s5 = inlined_call_operand.vmem [shape: f32[2,1,128], index: 5, kind: output, shape index: {1}]   ;;  %s2932_s6 = inlined_call_operand.vmem [shape: f32[2,1,128], index: 6, kind: output, shape index: {2}]  }
   0x1 LB: > { %s1812_s22 = sadd.s32 4294967295, %s2347_s21   ;;  %p1816_p0 = scmp.ge.s32.totalorder %s2347_s21, 1  ;;  %s2347_s21 = sphi %s2385_s21, %s17_s21  }
   0x2   : > { %p217_p1 = scmp.lt.s32.totalorder %s2347_s21, 3 }
   0x4   : > { %p218_p2 = pnand %p1816_p0, %p217_p1 }
   0x6   : > { %221 = sbr.rel (%p218_p2) target bundleno = 354 (0x162), region = 36 }
   0xb   : > { %v2269_v0 = vld [vmem:[%s2929_s3 + $0x138] sm:$0xff]   ;;  %v2349_v3 = vmov 0.0   ;;  %v2272_v4 = vld [vmem:[%s2929_s3 + $0x130] sm:$0xff]   ;;  %v2275_v7 = vld [vmem:[%s2929_s3 + $0x128] sm:$0xff]   ;;  %p253_p3 = scmp.lt.s32.totalorder %s1812_s22, 1  ;;  %v392_v14 = vlaneseq }
   0xc   : > { %v2270_v1 = vld [vmem:[%s2929_s3 + $0xf8] sm:$0xff]   ;;  %2032 = vmatprep.subr.bf16.mxu0 %v2269_v0  ;;  %270 = vst [vmem:[#allocation2] sm:$0xff] %v2349_v3  ;;  %271 = vst [vmem:[#allocation2 + $0x8] sm:$0x1] %v2349_v3  ;;  %v2273_v5 = vld [vmem:[%s2929_s3 + $0xf0] sm:$0xff]  }
   0xd   : > { %v2271_v2 = vld [vmem:[%s2929_s3 + $0x178] sm:$0xff]   ;;  %272 = vst [vmem:[#allocation2 + $0x10] sm:$0xff] %v2349_v3  ;;  %274 = vst [vmem:[#allocation2 + $0x20] sm:$0xff] %v2349_v3  ;;  %2033 = vmatpush3.bf16.msra.mxu0 %v2270_v1  ;;  %v2274_v6 = vld [vmem:[%s2929_s3 + $0x170] sm:$0xff]   ;;  %s2936_s22 = smov (!%p253_p3, %s1812_s22), 1  ;;  %v393_v18 = vshrl.u32 %v392_v14, 7 }
   0xe   : > { %276 = vst [vmem:[#allocation2 + $0x30] sm:$0xff] %v2349_v3  ;;  %278 = vst [vmem:[#allocation2 + $0x40] sm:$0xff] %v2349_v3  ;;  %2188 = vmatprep.subr.bf16.mxu1 %v2271_v2  ;;  %2034 = vmatprep.subr.bf16.mxu0 %v2272_v4  ;;  %v2276_v8 = vld [vmem:[%s2929_s3 + $0xe8] sm:$0xff]   ;;  %v2278_v10 = vld [vmem:[%s2929_s3 + $0x120] sm:$0xff]   ;;  %s1999_s11 = sshll.u32 %s2936_s22, 7  ;;  %s2000_s25 = sshll.u32 %s2936_s22, 5 }
   0xf   : > { %280 = vst [vmem:[#allocation2 + $0x50] sm:$0xff] %v2349_v3  ;;  %282 = vst [vmem:[#allocation2 + $0x60] sm:$0xff] %v2349_v3  ;;  %2189 = vmatpush3.bf16.msra.mxu1 %v2271_v2  ;;  %v2277_v9 = vld [vmem:[%s2929_s3 + $0x168] sm:$0xff]   ;;  %v2279_v11 = vld [vmem:[%s2929_s3 + $0xe0] sm:$0xff]   ;;  %s2481_s20 = scalar_lea.vmem %s2926_s0, %s1999_s11  ;;  %v394_v23 = vsub.s32 0, %v393_v18  ;;  %v398_v25 = vsub.s32 1, %v393_v18  ;;  %s2889_s28 = scalar_lea.vmem %s2930_s4, %s2000_s25 }
  0x10   : > { %284 = vst [vmem:[#allocation2 + $0x70] sm:$0xff] %v2349_v3  ;;  %286 = vst [vmem:[#allocation2 + $0x80] sm:$0xff] %v2349_v3  ;;  %2190 = vmatprep.subr.bf16.mxu1 %v2274_v6  ;;  %v2280_v12 = vld [vmem:[%s2929_s3 + $0x160] sm:$0xff]   ;;  %v2281_v13 = vld [vmem:[%s2929_s3 + $0x118] sm:$0xff]   ;;  %s265_s30 = scalar_lea.vmem %s2931_s5, %s2936_s22  ;;  %s268_s9 = scalar_lea.vmem %s2932_s6, %s2936_s22 }
  0x11   : > { %306 = vst [vmem:[#allocation2 + $0x120] sm:$0xff] %v2349_v3  ;;  %308 = vst [vmem:[#allocation2 + $0x130] sm:$0xff] %v2349_v3  ;;  %2035 = vmatpush3.bf16.msra.mxu0 %v2273_v5  ;;  %v2283_v15 = vld [vmem:[%s2929_s3 + $0x158] sm:$0xff]   ;;  %v2284_v17 = vld [vmem:[%s2929_s3 + $0x110] sm:$0xff]  }
  0x12   : > { %310 = vst [vmem:[#allocation2 + $0x140] sm:$0xff] %v2349_v3  ;;  %312 = vst [vmem:[#allocation2 + $0x150] sm:$0xff] %v2349_v3  ;;  %2036 = vmatprep.subr.bf16.mxu0 %v2275_v7  ;;  %v2282_v16 = vld [vmem:[%s2929_s3 + $0xd8] sm:$0xff]   ;;  %v2286_v19 = vld [vmem:[%s2929_s3 + $0x150] sm:$0xff]  }
  0x13   : > { %314 = vst [vmem:[#allocation2 + $0x160] sm:$0xff] %v2349_v3  ;;  %316 = vst [vmem:[#allocation2 + $0x170] sm:$0xff] %v2349_v3  ;;  %2191 = vmatpush3.bf16.msra.mxu1 %v2274_v6  ;;  %v2285_v20 = vld [vmem:[%s2929_s3 + $0xd0] sm:$0xff]   ;;  %v2287_v21 = vld [vmem:[%s2929_s3 + $0x108] sm:$0xff]  }
  0x14   : > { %318 = vst [vmem:[#allocation2 + $0x180] sm:$0xff] %v2349_v3  ;;  %320 = vst [vmem:[#allocation2 + $0x190] sm:$0xff] %v2349_v3  ;;  %2192 = vmatprep.subr.bf16.mxu1 %v2277_v9  ;;  %v2288_v22 = vld [vmem:[%s2929_s3 + $0xc8] sm:$0xff]   ;;  %v2290_v26 = vld [vmem:[%s2929_s3 + $0x100] sm:$0xff]  }
  0x15   : > { %2037 = vmatpush3.bf16.msra.mxu0 %v2276_v8  ;;  %v2289_v24 = vld [vmem:[%s2929_s3 + $0x148] sm:$0xff]   ;;  %v342_v27 = vld [vmem:[%s2481_s20] sm:$0xff]  ;;  %v344_v28 = vld [vmem:[%s2481_s20 + $0x10] sm:$0xff] }
  0x16   : > { %2038 = vmatprep.subr.bf16.mxu0 %v2278_v10  ;;  %v390_v29 = vld [vmem:[%s2927_s1] sm:$0x3]  ;;  %v358_v30 = vunpack.c.l.bf16 %v342_v27  ;;  %v359_v31 = vunpack.c.h.bf16 %v342_v27  ;;  %v362_v32 = vunpack.c.l.bf16 %v344_v28  ;;  %v363_v33 = vunpack.c.h.bf16 %v344_v28  ;;  %v348_v42 = vld [vmem:[%s2481_s20 + $0x30] sm:$0xff]  ;;  %v2293_v47 = vld [vmem:[%s2929_s3 + $0x78] sm:$0xff]  }
  0x17   : > { %2193 = vmatpush3.bf16.msra.mxu1 %v2277_v9  ;;  %v434_v34 = vld [vmem:[%s2928_s2] sm:$0x3]  ;;  %v2500_v36 = vrot.slane %v390_v29, %v394_v23  ;;  %v2502_v37 = vrot.slane %v390_v29, %v398_v25  ;;  %v371_v49 = vunpack.c.h.bf16 %v348_v42  ;;  %v370_v51 = vunpack.c.l.bf16 %v348_v42  ;;  %v2295_v56 = vld [vmem:[%s2929_s3 + $0xb8] sm:$0xff]  }
  0x18   : > { %2194 = vmatprep.subr.bf16.mxu1 %v2280_v12  ;;  %v2292_v35 = vld [vmem:[%s2929_s3 + $0x140] sm:$0xff]   ;;  %v2504_v38 = vrot.slane %v434_v34, %v394_v23  ;;  %v2506_v39 = vrot.slane %v434_v34, %v398_v25  ;;  %v2294_v14 = vld [vmem:[%s2929_s3 + $0x38] sm:$0xff]  }
  0x19   : > { %2039 = vmatpush3.bf16.msra.mxu0 %v2279_v11  ;;  %v2291_v40 = vld [vmem:[%s2929_s3 + $0xc0] sm:$0xff]   ;;  %v402_v43 = vmul.f32 %v2500_v36, %v358_v30  ;;  %v403_v44 = vmul.f32 %v2502_v37, %v359_v31  ;;  %v406_v45 = vmul.f32 %v2500_v36, %v362_v32  ;;  %v407_v46 = vmul.f32 %v2502_v37, %v363_v33  ;;  %v356_v32 = vld [vmem:[%s2481_s20 + $0x70] sm:$0xff] }
  0x1a   : > { %2040 = vmatprep.subr.bf16.mxu0 %v2281_v13  ;;  %v346_v41 = vld [vmem:[%s2481_s20 + $0x20] sm:$0xff]  ;;  %v415_v58 = vmul.f32 %v2502_v37, %v371_v49  ;;  %v414_v60 = vmul.f32 %v2500_v36, %v370_v51  ;;  %v2298_v13 = vld [vmem:[%s2929_s3 + $0xb0] sm:$0xff]   ;;  %v386_v49 = vunpack.c.l.bf16 %v356_v32 }
  0x1b   : > { %2195 = vmatpush3.bf16.msra.mxu1 %v2280_v12  ;;  %v367_v48 = vunpack.c.h.bf16 %v346_v41  ;;  %v366_v50 = vunpack.c.l.bf16 %v346_v41  ;;  %v446_v52 = vadd.f32 %v2504_v38, %v402_v43  ;;  %v450_v53 = vadd.f32 %v2504_v38, %v406_v45  ;;  %v354_v30 = vld [vmem:[%s2481_s20 + $0x60] sm:$0xff] }
  0x1c   : > { %2196 = vmatprep.subr.bf16.mxu1 %v2283_v15  ;;  %v447_v54 = vadd.f32 %v2506_v39, %v403_v44  ;;  %v451_v55 = vadd.f32 %v2506_v39, %v407_v46  ;;  %v459_v2 = vadd.f32 %v2506_v39, %v415_v58  ;;  %v458_v5 = vadd.f32 %v2504_v38, %v414_v60  ;;  %v2304_v41 = vld [vmem:[%s2929_s3 + $0xa0] sm:$0xff]  }
  0x1d   : > { %2041 = vmatpush3.bf16.msra.mxu0 %v2282_v16  ;;  %v411_v57 = vmul.f32 %v2502_v37, %v367_v48  ;;  %v410_v59 = vmul.f32 %v2500_v36, %v366_v50  ;;  %v478_v61 = vmax.f32 %v446_v52, 0.0  ;;  %v482_v62 = vmax.f32 %v450_v53, 0.0  ;;  %v352_v16 = vld [vmem:[%s2481_s20 + $0x50] sm:$0xff]  ;;  %v2299_v50 = vld [vmem:[%s2929_s3 + $0x68] sm:$0xff]  }
  0x1e   : > { %2042 = vmatprep.subr.bf16.mxu0 %v2284_v17  ;;  %v479_v63 = vmax.f32 %v447_v54, 0.0  ;;  %v483_v0 = vmax.f32 %v451_v55, 0.0  ;;  %v491_v9 = vmax.f32 %v459_v2, 0.0  ;;  %v490_v11 = vmax.f32 %v458_v5, 0.0  ;;  %v2296_v17 = vld [vmem:[%s2929_s3 + $0x70] sm:$0xff]  }
  0x1f   : > { %2197 = vmatpush3.bf16.msra.mxu1 %v2283_v15  ;;  %v455_v1 = vadd.f32 %v2506_v39, %v411_v57  ;;  %v454_v4 = vadd.f32 %v2504_v38, %v410_v59  ;;  %v656_v6 = vpack.c.bf16 %v482_v62, %v478_v61  ;;  %v350_v15 = vld [vmem:[%s2481_s20 + $0x40] sm:$0xff]  ;;  %v383_v33 = vunpack.c.h.bf16 %v354_v30  ;;  %v2300_v62 = vld [vmem:[%s2929_s3 + $0x28] sm:$0xff]  }
  0x20   : > { %2198 = vmatprep.subr.bf16.mxu1 %v2286_v19  ;;  %520 = vst [vmem:[#allocation2 + $0x121] sm:$0xff] %v479_v63  ;;  %521 = vst [vmem:[#allocation2 + $0x131] sm:$0xff] %v483_v0  ;;  %v657_v7 = vpack.c.bf16 %v483_v0, %v479_v63  ;;  %v374_v18 = vunpack.c.l.bf16 %v350_v15  ;;  %v382_v34 = vunpack.c.l.bf16 %v354_v30  ;;  %v387_v45 = vunpack.c.h.bf16 %v356_v32  ;;  %v347_v32 = vld [vmem:[%s2481_s20 + $0x28] sm:$0xff] }
  0x21   : > { %2043 = vmatpush3.bf16.msra.mxu0 %v2285_v20  ;;  %v487_v8 = vmax.f32 %v455_v1, 0.0  ;;  %v486_v10 = vmax.f32 %v454_v4, 0.0  ;;  %892 = vmatprep.mubr.bf16.mxu0 %v656_v6  ;;  %523 = vst [vmem:[#allocation2 + $0x151] sm:$0xff] %v491_v9  ;;  %v378_v20 = vunpack.c.l.bf16 %v352_v16  ;;  %v427_v48 = vmul.f32 %v2502_v37, %v383_v33  ;;  %v2302_v4 = vld [vmem:[%s2929_s3 + $0x60] sm:$0xff]  }
  0x22   : > { %2044 = vmatprep.subr.bf16.mxu0 %v2287_v21  ;;  %2204 = vmatprep.mubr.bf16.mxu1 %v657_v7  ;;  %v379_v21 = vunpack.c.h.bf16 %v352_v16  ;;  %v418_v27 = vmul.f32 %v2500_v36, %v374_v18  ;;  %v431_v54 = vmul.f32 %v2502_v37, %v387_v45  ;;  %v426_v57 = vmul.f32 %v2500_v36, %v382_v34  ;;  %v2303_v6 = vld [vmem:[%s2929_s3 + $0x20] sm:$0xff]   ;;  %v2307_v7 = vld [vmem:[%s2929_s3 + $0x98] sm:$0xff]  }
  0x23   : > { %2199 = vmatpush3.bf16.msra.mxu1 %v2286_v19  ;;  %522 = vst [vmem:[#allocation2 + $0x141] sm:$0xff] %v487_v8  ;;  %v660_v12 = vpack.c.bf16 %v491_v9, %v487_v8  ;;  %v375_v19 = vunpack.c.h.bf16 %v350_v15  ;;  %v422_v28 = vmul.f32 %v2500_v36, %v378_v20  ;;  %v430_v58 = vmul.f32 %v2500_v36, %v386_v49  ;;  %v2306_v20 = vld [vmem:[%s2929_s3 + $0x18] sm:$0xff]  }
  0x24   : > { %2200 = vmatprep.subr.bf16.mxu1 %v2289_v24  ;;  %v423_v31 = vmul.f32 %v2502_v37, %v379_v21  ;;  %v462_v42 = vadd.f32 %v2504_v38, %v418_v27  ;;  %v475_v61 = vadd.f32 %v2506_v39, %v431_v54  ;;  %v470_v1 = vadd.f32 %v2504_v38, %v426_v57  ;;  %v2308_v21 = vld [vmem:[%s2929_s3 + $0x50] sm:$0xff]  }
  0x25   : > { %2045 = vmatpush3.bf16.msra.mxu0 %v2288_v22  ;;  %v419_v29 = vmul.f32 %v2502_v37, %v375_v19  ;;  %v466_v43 = vadd.f32 %v2504_v38, %v422_v28  ;;  %v474_v2 = vadd.f32 %v2504_v38, %v430_v58  ;;  %v2316_v28 = vld [vmem:[%s2929_s3 + $0x80] sm:$0xff]   ;;  %v2319_v58 = vld [vmem:[%s2929_s3 + $0x238] sm:$0xff]  }
  0x26   : > { %2046 = vmatprep.subr.bf16.mxu0 %v2290_v26  ;;  %v2301_v26 = vld [vmem:[%s2929_s3 + $0xa8] sm:$0xff]   ;;  %v494_v51 = vmax.f32 %v462_v42, 0.0  ;;  %v507_v5 = vmax.f32 %v475_v61, 0.0  ;;  %v502_v8 = vmax.f32 %v470_v1, 0.0 }
  0x27   : > { %2201 = vmatpush3.bf16.msra.mxu1 %v2289_v24  ;;  %v631_v22 = vld [vmem:[#allocation2 + $0x120] sm:$0xff]  ;;  %v632_v23 = vld [vmem:[#allocation2 + $0x130] sm:$0xff]  ;;  %v659_v24 = vpack.c.bf16 %v490_v11, %v486_v10  ;;  %v463_v44 = vadd.f32 %v2506_v39, %v419_v29  ;;  %v498_v52 = vmax.f32 %v466_v43, 0.0  ;;  %v506_v9 = vmax.f32 %v474_v2, 0.0 }
  0x28   : > { %2202 = vmatprep.subr.bf16.mxu1 %v2292_v35  ;;  %v655_v25 = vpack.c.bf16 %v632_v23, %v631_v22  ;;  %v634_v46 = vld [vmem:[#allocation2 + $0x150] sm:$0xff]  ;;  %527 = vst [vmem:[#allocation2 + $0x191] sm:$0xff] %v507_v5  ;;  %v368_v43 = vunpack.c.l.bf16 %v347_v32 }
  0x29   : > { %2047 = vmatpush3.bf16.msra.mxu0 %v2291_v40  ;;  %v495_v53 = vmax.f32 %v463_v44, 0.0  ;;  %v662_v60 = vpack.c.bf16 %v498_v52, %v494_v51  ;;  %v2310_v11 = vld [vmem:[%s2929_s3 + $0x90] sm:$0xff]   ;;  %v665_v18 = vpack.c.bf16 %v506_v9, %v502_v8  ;;  %v2311_v44 = vld [vmem:[%s2929_s3 + $0x48] sm:$0xff]   ;;  %v2318_v9 = vld [vmem:[%s2929_s3 + $0x1b8] sm:$0xff]  }
  0x2a   : > { %2084 = vmatprep.subr.bf16.mxu0 %v2293_v47  ;;  %v633_v40 = vld [vmem:[#allocation2 + $0x140] sm:$0xff]  ;;  %v467_v47 = vadd.f32 %v2506_v39, %v423_v31  ;;  %v345_v31 = vld [vmem:[%s2481_s20 + $0x18] sm:$0xff]  ;;  %v412_v49 = vmul.f32 %v2500_v36, %v368_v43  ;;  %v2312_v51 = vld [vmem:[%s2929_s3 + $0x8] sm:$0xff]  }
  0x2b   : > { %2203 = vmatpush3.bf16.msra.mxu1 %v2292_v35  ;;  %v2297_v35 = vld [vmem:[%s2929_s3 + $0x30] sm:$0xff]   ;;  %v658_v59 = vpack.c.bf16 %v634_v46, %v633_v40  ;;  %524 = vst [vmem:[#allocation2 + $0x161] sm:$0xff] %v495_v53  ;;  %v365_v34 = vunpack.c.h.bf16 %v345_v31  ;;  %v364_v40 = vunpack.c.l.bf16 %v345_v31 }
  0x2c   : > { %2212 = vmatprep.subr.bf16.mxu1 %v2295_v56  ;;  %893 = vmatmul.mubr.bf16.vlgmr.msra.gmra.mxu0 %v655_v25  ;;  %v499_v55 = vmax.f32 %v467_v47, 0.0  ;;  %v563_v25 = vld [vmem:[#allocation2 + $0x1] sm:$0xff]  ;;  %v2645_v57 = vadd.f32 %v2504_v38, %v412_v49  ;;  %v2322_v2 = vld [vmem:[%s2929_s3 + $0x230] sm:$0xff]  }
  0x2d   : > { %2085 = vmatpush3.bf16.msra.mxu0 %v2294_v14  ;;  %900 = vmatprep.mubr.bf16.mxu0 %v659_v24  ;;  %v2313_v24 = vld [vmem:[%s2929_s3 + $0x88] sm:$0xff]   ;;  %v409_v45 = vmul.f32 %v2502_v37, %v365_v34  ;;  %v408_v47 = vmul.f32 %v2500_v36, %v364_v40 }
  0x2e   : > { %2205 = vmatmul.mubr.bf16.vlgmr.msra.gmra.mxu1 %v660_v12  ;;  %2086 = vmatprep.subr.bf16.mxu0 %v2296_v17  ;;  %525 = vst [vmem:[#allocation2 + $0x171] sm:$0xff] %v499_v55  ;;  %v663_v63 = vpack.c.bf16 %v499_v55, %v495_v53  ;;  %v2305_v12 = vld [vmem:[%s2929_s3 + $0x58] sm:$0xff]   ;;  %v2314_v55 = vld [vmem:[%s2929_s3 + $0x40] sm:$0xff]  }
  0x2f   : > { %2213 = vmatpush3.bf16.msra.mxu1 %v2295_v56  ;;  %v471_v56 = vadd.f32 %v2506_v39, %v427_v48  ;;  %v638_v33 = vld [vmem:[#allocation2 + $0x190] sm:$0xff]  ;;  %v453_v52 = vadd.f32 %v2506_v39, %v409_v45  ;;  %v2636_v54 = vadd.f32 %v2504_v38, %v408_v47 }
  0x30   : > { %2214 = vmatprep.subr.bf16.mxu1 %v2298_v13  ;;  %2208 = vmatprep.mubr.bf16.mxu1 %v663_v63  ;;  %v488_v63 = vmax.f32 %v2645_v57, 0.0 }
  0x31   : > { %2087 = vmatpush3.bf16.msra.mxu0 %v2297_v35  ;;  %v503_v0 = vmax.f32 %v471_v56, 0.0  ;;  %v369_v35 = vunpack.c.h.bf16 %v347_v32  ;;  %v484_v61 = vmax.f32 %v2636_v54, 0.0  ;;  %v2323_v32 = vld [vmem:[%s2929_s3 + $0x1e8] sm:$0xff]  }
  0x32   : > { %2088 = vmatprep.subr.bf16.mxu0 %v2299_v50  ;;  %v635_v14 = vld [vmem:[#allocation2 + $0x160] sm:$0xff] }
  0x33   : > { %2215 = vmatpush3.bf16.msra.mxu1 %v2298_v13  ;;  %526 = vst [vmem:[#allocation2 + $0x181] sm:$0xff] %v503_v0  ;;  %v666_v10 = vpack.c.bf16 %v507_v5, %v503_v0  ;;  %v343_v13 = vld [vmem:[%s2481_s20 + $0x8] sm:$0xff]  ;;  %v413_v46 = vmul.f32 %v2502_v37, %v369_v35  ;;  %v2317_v0 = vld [vmem:[%s2929_s3 + $0x1f8] sm:$0xff]  }
  0x34   : > { %2216 = vmatprep.subr.bf16.mxu1 %v2301_v26  ;;  %901 = vmatmul.mubr.bf16.gmra.mxu0 %v658_v59  ;;  %v360_v15 = vunpack.c.l.bf16 %v343_v13  ;;  %v361_v16 = vunpack.c.h.bf16 %v343_v13  ;;  %v2650_v59 = vmax.f32 %v453_v52, 0.0  ;;  %v2320_v13 = vld [vmem:[%s2929_s3 + $0x1f0] sm:$0xff]  }
  0x35   : > { %2089 = vmatpush3.bf16.msra.mxu0 %v2300_v62  ;;  %908 = vmatprep.mubr.bf16.mxu0 %v662_v60  ;;  %v636_v17 = vld [vmem:[#allocation2 + $0x170] sm:$0xff]  ;;  %v457_v53 = vadd.f32 %v2506_v39, %v413_v46  ;;  %v2315_v62 = vld [vmem:[%s2929_s3] sm:$0xff]  }
  0x36   : > { %2090 = vmatprep.subr.bf16.mxu0 %v2302_v4  ;;  %2209 = vmatmul.mubr.bf16.gmra.mxu1 %v666_v10  ;;  %v661_v19 = vpack.c.bf16 %v636_v17, %v635_v14  ;;  %v404_v22 = vmul.f32 %v2500_v36, %v360_v15  ;;  %v405_v23 = vmul.f32 %v2502_v37, %v361_v16  ;;  %v349_v4 = vld [vmem:[%s2481_s20 + $0x38] sm:$0xff] }
  0x37   : > { %2217 = vmatpush3.bf16.msra.mxu1 %v2301_v26  ;;  %v2309_v26 = vld [vmem:[%s2929_s3 + $0x10] sm:$0xff]   ;;  %v2652_v60 = vmax.f32 %v457_v53, 0.0  ;;  %539 = vst [vmem:[#allocation2 + $0x21] sm:$0xff] %v2650_v59  ;;  %v373_v8 = vunpack.c.h.bf16 %v349_v4  ;;  %v575_v16 = vpack.c.bf16 %v488_v63, %v484_v61 }
  0x38   : > { %2218 = vmatprep.subr.bf16.mxu1 %v2304_v41  ;;  %v2613_v29 = vadd.f32 %v2504_v38, %v404_v22  ;;  %v449_v30 = vadd.f32 %v2506_v39, %v405_v23  ;;  %v355_v22 = vld [vmem:[%s2481_s20 + $0x68] sm:$0xff] }
  0x39   : > { %2091 = vmatpush3.bf16.msra.mxu0 %v2303_v6  ;;  %540 = vst [vmem:[#allocation2 + $0x31] sm:$0xff] %v2652_v60  ;;  %v576_v1 = vpack.c.bf16 %v2652_v60, %v2650_v59  ;;  %v351_v6 = vld [vmem:[%s2481_s20 + $0x48] sm:$0xff]  ;;  %v417_v15 = vmul.f32 %v2502_v37, %v373_v8  ;;  %v384_v31 = vunpack.c.l.bf16 %v355_v22 }
  0x3a   : > { %2092 = vmatprep.subr.bf16.mxu0 %v2305_v12  ;;  %v637_v27 = vld [vmem:[#allocation2 + $0x180] sm:$0xff]  ;;  %v2619_v42 = vmax.f32 %v449_v30, 0.0  ;;  %v376_v10 = vunpack.c.l.bf16 %v351_v6  ;;  %v385_v30 = vunpack.c.h.bf16 %v355_v22 }
  0x3b   : > { %2219 = vmatpush3.bf16.msra.mxu1 %v2304_v41  ;;  %v480_v41 = vmax.f32 %v2613_v29, 0.0  ;;  %v664_v50 = vpack.c.bf16 %v638_v33, %v637_v27  ;;  %v428_v49 = vmul.f32 %v2500_v36, %v384_v31  ;;  %v2339_v29 = vld [vmem:[%s2929_s3 + $0x180] sm:$0xff]  }
  0x3c   : > { %2220 = vmatprep.subr.bf16.mxu1 %v2307_v7  ;;  %909 = vmatmul.mubr.bf16.gmra.mxu0 %v661_v19  ;;  %538 = vst [vmem:[#allocation2 + $0x11] sm:$0xff] %v2619_v42  ;;  %v573_v48 = vpack.c.bf16 %v2619_v42, %v563_v25  ;;  %v420_v17 = vmul.f32 %v2500_v36, %v376_v10  ;;  %v353_v19 = vld [vmem:[%s2481_s20 + $0x58] sm:$0xff]  ;;  %v2321_v25 = vld [vmem:[%s2929_s3 + $0x1b0] sm:$0xff]   ;;  %v2327_v10 = vld [vmem:[%s2929_s3 + $0x1a0] sm:$0xff]  }
  0x3d   : > { %2093 = vmatpush3.bf16.msra.mxu0 %v2306_v20  ;;  %916 = vmatprep.mubr.bf16.mxu0 %v665_v18  ;;  %v572_v56 = vpack.c.bf16 %v480_v41, %v2349_v3  ;;  %v381_v23 = vunpack.c.h.bf16 %v353_v19  ;;  %v429_v46 = vmul.f32 %v2502_v37, %v385_v30  ;;  %v1290_v8 = vpack.c.bf16 %v2650_v59, %v2619_v42  ;;  %v2329_v42 = vld [vmem:[%s2929_s3 + $0x1d8] sm:$0xff]   ;;  %v2336_v30 = vld [vmem:[%s2929_s3 + $0x188] sm:$0xff]  }
  0x3e   : > { %2094 = vmatprep.subr.bf16.mxu0 %v2308_v21  ;;  %2228 = vmatprep.mubr.bf16.mxu1 %v573_v48  ;;  %v461_v21 = vadd.f32 %v2506_v39, %v417_v15  ;;  %v2705_v27 = vadd.f32 %v2504_v38, %v420_v17  ;;  %v2715_v40 = vld [vmem:[#allocation2 + $0x20] sm:$0xff]  ;;  %v2330_v17 = vld [vmem:[%s2929_s3 + $0x198] sm:$0xff]   ;;  %v1289_v31 = vpack.c.bf16 %v484_v61, %v480_v41 }
  0x3f   : > { %2221 = vmatpush3.bf16.msra.mxu1 %v2307_v7  ;;  %v372_v7 = vunpack.c.l.bf16 %v349_v4  ;;  %v425_v35 = vmul.f32 %v2502_v37, %v381_v23  ;;  %v2331_v4 = vld [vmem:[%s2929_s3 + $0x218] sm:$0xff]  }
  0x40   : > { %2222 = vmatprep.subr.bf16.mxu1 %v2310_v11  ;;  %v2712_v34 = vmax.f32 %v461_v21, 0.0  ;;  %v2717_v43 = vld [vmem:[#allocation2 + $0x30] sm:$0xff]  ;;  %v2337_v21 = vld [vmem:[%s2929_s3 + $0x208] sm:$0xff]  }
  0x41   : > { %2095 = vmatpush3.bf16.msra.mxu0 %v2309_v26  ;;  %v416_v14 = vmul.f32 %v2500_v36, %v372_v7  ;;  %v2328_v26 = vld [vmem:[%s2929_s3 + $0x220] sm:$0xff]   ;;  %v469_v48 = vadd.f32 %v2506_v39, %v425_v35  ;;  %v574_v53 = vpack.c.bf16 %v2717_v43, %v2715_v40 }
  0x42   : > { %2096 = vmatprep.subr.bf16.mxu0 %v2311_v44  ;;  %v496_v44 = vmax.f32 %v2705_v27, 0.0  ;;  %541 = vst [vmem:[#allocation2 + $0x41] sm:$0xff] %v2712_v34  ;;  %v1293_v35 = vpack.c.bf16 %v2712_v34, %v2652_v60 }
  0x43   : > { %2223 = vmatpush3.bf16.msra.mxu1 %v2310_v11  ;;  %v2670_v5 = vld [vmem:[#allocation2 + $0x10] sm:$0xff]  ;;  %v377_v11 = vunpack.c.h.bf16 %v351_v6  ;;  %v2694_v20 = vadd.f32 %v2504_v38, %v416_v14 }
  0x44   : > { %2224 = vmatprep.subr.bf16.mxu1 %v2313_v24  ;;  %917 = vmatmul.mubr.bf16.gmra.mxu0 %v664_v50  ;;  %v571_v12 = vpack.c.bf16 %v2670_v5, %v2349_v3  ;;  %v2325_v3 = vld [vmem:[%s2929_s3 + $0x228] sm:$0xff]   ;;  %v1288_v41 = vpack.c.bf16 %v2715_v40, %v2670_v5 }
  0x45   : > { %2097 = vmatpush3.bf16.msra.mxu0 %v2312_v51  ;;  %1166 = vmatprep.mubr.bf16.mxu0 %v572_v56  ;;  %v421_v18 = vmul.f32 %v2502_v37, %v377_v11  ;;  %v492_v33 = vmax.f32 %v2694_v20, 0.0  ;;  %v473_v51 = vadd.f32 %v2506_v39, %v429_v46  ;;  %v2739_v56 = vadd.f32 %v2504_v38, %v428_v49 }
  0x46   : > { %2098 = vmatprep.subr.bf16.mxu0 %v2314_v55  ;;  %v2736_v55 = vmax.f32 %v469_v48, 0.0 }
  0x47   : > { %2225 = vmatpush3.bf16.msra.mxu1 %v2313_v24  ;;  %v380_v24 = vunpack.c.l.bf16 %v353_v19  ;;  %v504_v6 = vmax.f32 %v2739_v56, 0.0  ;;  %v2332_v19 = vld [vmem:[%s2929_s3 + $0x1d0] sm:$0xff]   ;;  %v1292_v54 = vpack.c.bf16 %v492_v33, %v488_v63 }
  0x48   : > { %2226 = vmatprep.subr.bf16.mxu1 %v2316_v28  ;;  %543 = vst [vmem:[#allocation2 + $0x61] sm:$0xff] %v2736_v55 }
  0x49   : > { %2099 = vmatpush3.bf16.msra.mxu0 %v2315_v62  ;;  %v424_v47 = vmul.f32 %v2500_v36, %v380_v24  ;;  %v2326_v62 = vld [vmem:[%s2929_s3 + $0x1e0] sm:$0xff]   ;;  %v2333_v24 = vld [vmem:[%s2929_s3 + $0x190] sm:$0xff]  }
  0x4a   : > { %2136 = vmatprep.subr.bf16.mxu0 %v2317_v0  ;;  %v578_v0 = vpack.c.bf16 %v496_v44, %v492_v33  ;;  %v2768_v11 = vld [vmem:[#allocation2 + $0x40] sm:$0xff] }
  0x4b   : > { %2227 = vmatpush3.bf16.msra.mxu1 %v2316_v28  ;;  %v465_v28 = vadd.f32 %v2506_v39, %v421_v18  ;;  %v2732_v52 = vadd.f32 %v2504_v38, %v424_v47  ;;  %v1291_v61 = vpack.c.bf16 %v2768_v11, %v2717_v43 }
  0x4c   : > { %2236 = vmatprep.subr.bf16.mxu1 %v2319_v58  ;;  %1167 = vmatmul.mubr.bf16.vlgmr.msra.gmra.mxu0 %v571_v12  ;;  %v2334_v12 = vld [vmem:[%s2929_s3 + $0x210] sm:$0xff]  }
  0x4d   : > { %2137 = vmatpush3.bf16.msra.mxu0 %v2318_v9  ;;  %1174 = vmatprep.mubr.bf16.mxu0 %v575_v16  ;;  %v2720_v45 = vmax.f32 %v465_v28, 0.0  ;;  %v357_v9 = vld [vmem:[%s2481_s20 + $0x78] sm:$0xff] }
  0x4e   : > { %2229 = vmatmul.mubr.bf16.vlgmr.msra.gmra.mxu1 %v576_v1  ;;  %2138 = vmatprep.subr.bf16.mxu0 %v2320_v13  ;;  %v2751_v1 = vmax.f32 %v473_v51, 0.0  ;;  %v389_v13 = vunpack.c.h.bf16 %v357_v9  ;;  %v388_v14 = vunpack.c.l.bf16 %v357_v9 }
  0x4f   : > { %2237 = vmatpush3.bf16.msra.mxu1 %v2319_v58  ;;  %542 = vst [vmem:[#allocation2 + $0x51] sm:$0xff] %v2720_v45  ;;  %v579_v50 = vpack.c.bf16 %v2720_v45, %v2712_v34  ;;  %v2324_v58 = vld [vmem:[%s2929_s3 + $0x1a8] sm:$0xff]   ;;  %v1296_v46 = vpack.c.bf16 %v2736_v55, %v2720_v45 }
  0x50   : > { %2238 = vmatprep.subr.bf16.mxu1 %v2322_v2  ;;  %544 = vst [vmem:[#allocation2 + $0x71] sm:$0xff] %v2751_v1  ;;  %v582_v7 = vpack.c.bf16 %v2751_v1, %v2736_v55  ;;  %v433_v59 = vmul.f32 %v2502_v37, %v389_v13  ;;  %v432_v16 = vmul.f32 %v2500_v36, %v388_v14 }
  0x51   : > { %2139 = vmatpush3.bf16.msra.mxu0 %v2321_v25  ;;  %2232 = vmatprep.mubr.bf16.mxu1 %v579_v50  ;;  %v2340_v25 = vld [vmem:[%s2929_s3 + $0x200] sm:$0xff]  }
  0x52   : > { %2140 = vmatprep.subr.bf16.mxu0 %v2323_v32  ;;  %v477_v37 = vadd.f32 %v2506_v39, %v433_v59  ;;  %v476_v36 = vadd.f32 %v2504_v38, %v432_v16  ;;  %v552_v38 = vld [vmem:[#allocation2 + $0x60] sm:$0xff] }
  0x53   : > { %2239 = vmatpush3.bf16.msra.mxu1 %v2322_v2  ;;  %v500_v2 = vmax.f32 %v2732_v52, 0.0  ;;  %v2338_v32 = vld [vmem:[%s2929_s3 + $0x1c0] sm:$0xff]  }
  0x54   : > { %2240 = vmatprep.subr.bf16.mxu1 %v2325_v3  ;;  %1175 = vmatmul.mubr.bf16.gmra.mxu0 %v574_v53  ;;  %v509_v22 = vmax.f32 %v477_v37, 0.0  ;;  %v508_v23 = vmax.f32 %v476_v36, 0.0 }
  0x55   : > { %2141 = vmatpush3.bf16.msra.mxu0 %v2324_v58  ;;  %1182 = vmatprep.mubr.bf16.mxu0 %v578_v0  ;;  %v581_v18 = vpack.c.bf16 %v504_v6, %v500_v2  ;;  %v1295_v5 = vpack.c.bf16 %v500_v2, %v496_v44 }
  0x56   : > { %2142 = vmatprep.subr.bf16.mxu0 %v2326_v62  ;;  %v2773_v15 = vld [vmem:[#allocation2 + $0x50] sm:$0xff]  ;;  %2233 = vmatmul.mubr.bf16.gmra.mxu1 %v582_v7  ;;  %545 = vst [vmem:[#allocation2 + $0x81] sm:$0xff] %v509_v22  ;;  %v1299_v60 = vpack.c.bf16 %v509_v22, %v2751_v1  ;;  %v1298_v63 = vpack.c.bf16 %v508_v23, %v504_v6 }
  0x57   : > { %2241 = vmatpush3.bf16.msra.mxu1 %v2325_v3  ;;  %v577_v3 = vpack.c.bf16 %v2773_v15, %v2768_v11  ;;  %2252 = vmatprep.mubr.bf16.mxu1 %v1290_v8  ;;  %v553_v39 = vld [vmem:[#allocation2 + $0x70] sm:$0xff]  ;;  %v1294_v57 = vpack.c.bf16 %v552_v38, %v2773_v15 }
  0x58   : > { %2242 = vmatprep.subr.bf16.mxu1 %v2328_v26  ;;  %v580_v28 = vpack.c.bf16 %v553_v39, %v552_v38 }
  0x59   : > { %2143 = vmatpush3.bf16.msra.mxu0 %v2327_v10 }
  0x5a   : > { %2144 = vmatprep.subr.bf16.mxu0 %v2329_v42 }
  0x5b   : > { %2243 = vmatpush3.bf16.msra.mxu1 %v2328_v26  ;;  %v2335_v26 = vld [vmem:[%s2929_s3 + $0x1c8] sm:$0xff]  }
  0x5c   : > { %2244 = vmatprep.subr.bf16.mxu1 %v2331_v4  ;;  %1183 = vmatmul.mubr.bf16.gmra.mxu0 %v577_v3 }
  0x5d   : > { %2145 = vmatpush3.bf16.msra.mxu0 %v2330_v17  ;;  %1190 = vmatprep.mubr.bf16.mxu0 %v581_v18  ;;  %v1271_v20 = vld [vmem:[#allocation2 + $0x80] sm:$0xff] }
  0x5e   : > { %2146 = vmatprep.subr.bf16.mxu0 %v2332_v19  ;;  %v1297_v33 = vpack.c.bf16 %v1271_v20, %v553_v39 }
  0x5f   : > { %2245 = vmatpush3.bf16.msra.mxu1 %v2331_v4 }
  0x60   : > { %2246 = vmatprep.subr.bf16.mxu1 %v2334_v12 }
  0x61   : > { %2147 = vmatpush3.bf16.msra.mxu0 %v2333_v24 }
  0x62   : > { %2148 = vmatprep.subr.bf16.mxu0 %v2335_v26 }
  0x63   : > { %2247 = vmatpush3.bf16.msra.mxu1 %v2334_v12 }
  0x64   : > { %2248 = vmatprep.subr.bf16.mxu1 %v2337_v21  ;;  %1191 = vmatmul.mubr.bf16.gmra.mxu0 %v580_v28 }
  0x65   : > { %2149 = vmatpush3.bf16.msra.mxu0 %v2336_v30  ;;  %1525 = vmatprep.mubr.bf16.mxu0 %v1289_v31 }
  0x66   : > { %2150 = vmatprep.subr.bf16.mxu0 %v2338_v32 }
  0x67   : > { %2249 = vmatpush3.bf16.msra.mxu1 %v2337_v21 }
  0x68   : > { %2250 = vmatprep.subr.bf16.mxu1 %v2340_v25 }
  0x69   : > { %2151 = vmatpush3.bf16.msra.mxu0 %v2339_v29 }
  0x6b   : > { %2251 = vmatpush3.bf16.msra.mxu1 %v2340_v25 }
  0x6c   : > { %1526 = vmatmul.mubr.bf16.vlgmr.msra.gmra.mxu0 %v1288_v41 }
  0x6d   : > { %1533 = vmatprep.mubr.bf16.mxu0 %v1292_v54 }
  0x6e   : > { %2253 = vmatmul.mubr.bf16.vlgmr.msra.gmra.mxu1 %v1293_v35 }
  0x6f   : > { %2256 = vmatprep.mubr.bf16.mxu1 %v1296_v46 }
  0x74   : > { %1534 = vmatmul.mubr.bf16.gmra.mxu0 %v1291_v61 }
  0x75   : > { %1541 = vmatprep.mubr.bf16.mxu0 %v1295_v5 }
  0x76   : > { %2257 = vmatmul.mubr.bf16.gmra.mxu1 %v1299_v60 }
  0x7c   : > { %1542 = vmatmul.mubr.bf16.gmra.mxu0 %v1294_v57 }
  0x7d   : > { %1549 = vmatprep.mubr.bf16.mxu0 %v1298_v63 }
  0x84   : > { %1550 = vmatmul.mubr.bf16.gmra.mxu0 %v1297_v33 }
  0xec   : > { %v2048_v34 = vpop.f32.mrf.mxu0 }
  0xee   : > { %v2049_v40 = vpop.f32.mrf.mxu0  ;;  %v2839_v45 = vpop.f32.mrf.mxu1 }
  0xef   : > { %v2050_v43 = vadd.f32 %v2049_v40, %v2048_v34 }
  0xf0   : > { %v2051_v27 = vpop.f32.mrf.mxu0  ;;  %v959_v44 = vpop.f32.mrf.mxu1 }
  0xf1   : > { %v960_v5 = vadd.f32 %v2050_v43, %v959_v44 }
  0xf2   : > { %v2052_v47 = vpop.f32.mrf.mxu0  ;;  %v2841_v50 = vpop.f32.mrf.mxu1 }
  0xf3   : > { %v2053_v46 = vadd.f32 %v2052_v47, %v2051_v27 }
  0xf4   : > { %v2054_v48 = vpop.f32.mrf.mxu0  ;;  %v962_v55 = vpop.f32.mrf.mxu1 }
  0xf5   : > { %v963_v57 = vadd.f32 %v2053_v46, %v962_v55 }
  0xf6   : > { %v2055_v49 = vpop.f32.mrf.mxu0  ;;  %v2843_v58 = vpop.f32.mrf.mxu1 }
  0xf7   : > { %v2056_v51 = vadd.f32 %v2055_v49, %v2054_v48 }
  0xf8   : > { %v2057_v52 = vpop.f32.mrf.mxu0  ;;  %v2849_v2 = vpop.f32.mrf.mxu1 }
  0xfa   : > { %v2058_v53 = vpop.f32.mrf.mxu0  ;;  %v2855_v7 = vpop.f32.mrf.mxu1 }
  0xfb   : > { %v2059_v48 = vadd.f32 %v2058_v53, %v2057_v52 }
  0xfc   : > { %v2060_v56 = vpop.f32.mrf.mxu0  ;;  %v2861_v10 = vpop.f32.mrf.mxu1 }
  0xfd   : > { %v971_v44 = vadd.f32 %v2841_v50, %v2059_v48 }
  0xfe   : > { %v2061_v62 = vpop.f32.mrf.mxu0 }
  0xff   : > { %v2845_v0 = vadd.f32 %v2061_v62, %v2060_v56  ;;  %v968_v62 = vadd.f32 %v2839_v45, %v2056_v51 }
 0x100   : > { %v2847_v1 = vpop.f32.mrf.mxu0 }
 0x101   : > { %v976_v50 = vadd.f32 %v2845_v0, %v2849_v2 }
 0x102   : > { %v2851_v4 = vpop.f32.mrf.mxu0 }
 0x104   : > { %v2853_v6 = vpop.f32.mrf.mxu0 }
 0x106   : > { %v2857_v8 = vpop.f32.mrf.mxu0 }
 0x108   : > { %v2859_v9 = vpop.f32.mrf.mxu0 }
 0x10a   : > { %v2863_v11 = vpop.f32.mrf.mxu0 }
 0x10c   : > { %v2100_v13 = vpop.f32.mrf.mxu0 }
 0x10e   : > { %v2230_v12 = vpop.f32.mrf.mxu1  ;;  %v2101_v14 = vpop.f32.mrf.mxu0 }
 0x10f   : > { %v2102_v41 = vadd.f32 %v2101_v14, %v2100_v13 }
 0x110   : > { %v1233_v15 = vpop.f32.mrf.mxu1  ;;  %v2103_v42 = vpop.f32.mrf.mxu0 }
 0x111   : > { %v1169_v33 = vadd.f32 %v2102_v41, %v960_v5 }
 0x112   : > { %v2104_v59 = vpop.f32.mrf.mxu0  ;;  %v2865_v16 = vpop.f32.mrf.mxu1 }
 0x113   : > { %v2105_v54 = vadd.f32 %v2104_v59, %v2103_v42  ;;  %v1234_v14 = vadd.f32 %v1233_v15, %v1169_v33 }
 0x114   : > { %v2106_v3 = vpop.f32.mrf.mxu0  ;;  %v1236_v18 = vpop.f32.mrf.mxu1 }
 0x115   : > { %v1172_v40 = vadd.f32 %v2105_v54, %v963_v57 }
 0x116   : > { %v2107_v17 = vpop.f32.mrf.mxu0  ;;  %v2867_v36 = vpop.f32.mrf.mxu1 }
 0x117   : > { %v2108_v34 = vadd.f32 %v2107_v17, %v2106_v3  ;;  %v1237_v59 = vadd.f32 %v1236_v18, %v1172_v40 }
 0x118   : > { %v2109_v37 = vpop.f32.mrf.mxu0  ;;  %v2869_v22 = vpop.f32.mrf.mxu1 }
 0x119   : > { %v1177_v42 = vadd.f32 %v2108_v34, %v968_v62 }
 0x11a   : > { %v2110_v19 = vpop.f32.mrf.mxu0  ;;  %v2871_v38 = vpop.f32.mrf.mxu1 }
 0x11b   : > { %2933 = vst [vmem:[#allocation3_spill] sm:$0xff] %v2871_v38  ;;  %v2111_v47 = vadd.f32 %v2110_v19, %v2109_v37  ;;  %v1242_v15 = vadd.f32 %v2230_v12, %v1177_v42 }
 0x11c   : > { %v2112_v21 = vpop.f32.mrf.mxu0  ;;  %v2875_v26 = vpop.f32.mrf.mxu1 }
 0x11d   : > { %v1180_v52 = vadd.f32 %v2111_v47, %v971_v44 }
 0x11e   : > { %v2113_v23 = vpop.f32.mrf.mxu0 }
 0x11f   : > { %v2114_v53 = vadd.f32 %v2113_v23, %v2112_v21  ;;  %v1245_v54 = vadd.f32 %v2865_v16, %v1180_v52 }
 0x120   : > { %v2115_v24 = vpop.f32.mrf.mxu0 }
 0x121   : > { %v1185_v5 = vadd.f32 %v2114_v53, %v976_v50 }
 0x122   : > { %v2116_v39 = vpop.f32.mrf.mxu0 }
 0x124   : > { %v2873_v25 = vpop.f32.mrf.mxu0 }
 0x126   : > { %v2877_v28 = vpop.f32.mrf.mxu0 }
 0x127   : > { %v2120_v16 = vadd.f32 %v2877_v28, %v2873_v25 }
 0x128   : > { %v2879_v31 = vpop.f32.mrf.mxu0 }
 0x12a   : > { %v2881_v32 = vpop.f32.mrf.mxu0 }
 0x12b   : > { %v2123_v28 = vadd.f32 %v2881_v32, %v2879_v31 }
 0x12c   : > { %v2152_v29 = vpop.f32.mrf.mxu0 }
 0x12e   : > { %v2254_v30 = vpop.f32.mrf.mxu1  ;;  %v2153_v60 = vpop.f32.mrf.mxu0 }
 0x12f   : > { %v2154_v63 = vadd.f32 %v2153_v60, %v2152_v29  ;;  %v2117_v60 = vadd.f32 %v2116_v39, %v2115_v24 }
 0x130   : > { %v1592_v35 = vpop.f32.mrf.mxu1  ;;  %v2155_v20 = vpop.f32.mrf.mxu0 }
 0x131   : > { %v1593_v38 = vadd.f32 %v2154_v63, %v1592_v35 }
 0x132   : > { %v2255_v61 = vpop.f32.mrf.mxu1  ;;  %v2156_v49 = vpop.f32.mrf.mxu0 }
 0x133   : > { %v2157_v27 = vadd.f32 %v2156_v49, %v2155_v20  ;;  %v1623_v46 = vadd.f32 %v1593_v38, %v1234_v14  ;;  %v2065_v38 = vadd.f32 %v2851_v4, %v2847_v1  ;;  %v2068_v1 = vadd.f32 %v2857_v8, %v2853_v6 }
 0x134   : > { %v1595_v56 = vpop.f32.mrf.mxu1  ;;  %v2158_v13 = vpop.f32.mrf.mxu0  ;;  %v1250_v49 = vadd.f32 %v2869_v22, %v1185_v5  ;;  %v2071_v6 = vadd.f32 %v2863_v11, %v2859_v9 }
 0x135   : > { %v1596_v43 = vadd.f32 %v2157_v27, %v1595_v56  ;;  %v1685_v21 = vmul.f32 %v1623_v46, %v1623_v46  ;;  %v979_v0 = vadd.f32 %v2065_v38, %v2861_v10  ;;  %v984_v10 = vadd.f32 %v2843_v58, %v2068_v1 }
 0x136   : > { %v2159_v55 = vpop.f32.mrf.mxu0  ;;  %v2258_v51 = vpop.f32.mrf.mxu1  ;;  %v987_v9 = vadd.f32 %v2855_v7, %v2071_v6 }
 0x137   : > { %v1624_v3 = vadd.f32 %v1596_v43, %v1237_v59  ;;  %v2160_v17 = vadd.f32 %v2159_v55, %v2158_v13  ;;  %v1188_v24 = vadd.f32 %v2117_v60, %v979_v0  ;;  %v1193_v14 = vadd.f32 %v2120_v16, %v984_v10 }
 0x138   : > { %v2161_v45 = vpop.f32.mrf.mxu0  ;;  %v1608_v57 = vpop.f32.mrf.mxu1 }
 0x139   : > { %v2012_v18 = vpack.c.bf16 %v1624_v3, %v1623_v46  ;;  %v1686_v37 = vmul.f32 %v1624_v3, %v1624_v3  ;;  %v1601_v19 = vadd.f32 %v2254_v30, %v2160_v17  ;;  %v1671_v23 = vadd.f32 %v1624_v3, %v1623_v46 }
 0x13a   : > { %v2162_v35 = vpop.f32.mrf.mxu0  ;;  %v2259_v48 = vpop.f32.mrf.mxu1  ;;  %v1253_v25 = vadd.f32 %v2875_v26, %v1188_v24  ;;  %v1196_v17 = vadd.f32 %v2123_v28, %v987_v9  ;;  %v1258_v26 = vadd.f32 %v2867_v36, %v1193_v14 }
 0x13b   : > { %2013 = vst [vmem:[%s2889_s28] sm:$0xff] %v2012_v18   ;;  %v1625_v29 = vadd.f32 %v1601_v19, %v1242_v15  ;;  %v2163_v41 = vadd.f32 %v2162_v35, %v2161_v45  ;;  %v1693_v63 = vadd.f32 %v1686_v37, %v1685_v21  ;;  %v2934_v19 = vld [vmem:[#allocation3_spill] sm:$0xff] }
 0x13c   : > { %v2164_v12 = vpop.f32.mrf.mxu0  ;;  %v1611_v22 = vpop.f32.mrf.mxu1  ;;  %v1261_v50 = vadd.f32 %v2934_v19, %v1196_v17 }
 0x13d   : > { %v1672_v30 = vadd.f32 %v1671_v23, %v1625_v29  ;;  %v1687_v20 = vmul.f32 %v1625_v29, %v1625_v29  ;;  %v1604_v33 = vadd.f32 %v2255_v61, %v2163_v41 }
 0x13e   : > { %v2165_v2 = vpop.f32.mrf.mxu0 }
 0x13f   : > { %v1694_v4 = vadd.f32 %v1693_v63, %v1687_v20  ;;  %v1626_v34 = vadd.f32 %v1604_v33, %v1245_v54  ;;  %v2166_v40 = vadd.f32 %v2165_v2, %v2164_v12 }
 0x140   : > { %v2167_v39 = vpop.f32.mrf.mxu0 }
 0x141   : > { %v2017_v56 = vpack.c.bf16 %v1626_v34, %v1625_v29  ;;  %v1688_v61 = vmul.f32 %v1626_v34, %v1626_v34  ;;  %v1609_v62 = vadd.f32 %v2166_v40, %v1608_v57  ;;  %v1673_v47 = vadd.f32 %v1672_v30, %v1626_v34 }
 0x142   : > { %v2168_v8 = vpop.f32.mrf.mxu0 }
 0x143   : > { %2029 = vst [vmem:[%s2889_s28 + $0x8] sm:$0xff] %v2017_v56   ;;  %v1627_v27 = vadd.f32 %v1609_v62, %v1250_v49  ;;  %v2169_v13 = vadd.f32 %v2168_v8, %v2167_v39  ;;  %v1695_v58 = vadd.f32 %v1694_v4, %v1688_v61 }
 0x144   : > { %v2170_v42 = vpop.f32.mrf.mxu0 }
 0x145   : > { %v1674_v59 = vadd.f32 %v1673_v47, %v1627_v27  ;;  %v1689_v43 = vmul.f32 %v1627_v27, %v1627_v27  ;;  %v1612_v44 = vadd.f32 %v2169_v13, %v1611_v22 }
 0x146   : > { %v2171_v11 = vpop.f32.mrf.mxu0 }
 0x147   : > { %v1696_v55 = vadd.f32 %v1695_v58, %v1689_v43  ;;  %v1628_v46 = vadd.f32 %v1612_v44, %v1253_v25  ;;  %v2172_v3 = vadd.f32 %v2171_v11, %v2170_v42 }
 0x148   : > { %v2173_v52 = vpop.f32.mrf.mxu0 }
 0x149   : > { %v2022_v53 = vpack.c.bf16 %v1628_v46, %v1627_v27  ;;  %v1690_v45 = vmul.f32 %v1628_v46, %v1628_v46  ;;  %v1617_v31 = vadd.f32 %v2258_v51, %v2172_v3  ;;  %v1675_v15 = vadd.f32 %v1674_v59, %v1628_v46 }
 0x14a   : > { %v2174_v32 = vpop.f32.mrf.mxu0 }
 0x14b   : > { %2030 = vst [vmem:[%s2889_s28 + $0x10] sm:$0xff] %v2022_v53   ;;  %v1629_v18 = vadd.f32 %v1617_v31, %v1258_v26  ;;  %v2175_v37 = vadd.f32 %v2174_v32, %v2173_v52  ;;  %v1697_v7 = vadd.f32 %v1696_v55, %v1690_v45 }
 0x14d   : > { %v1676_v38 = vadd.f32 %v1675_v15, %v1629_v18  ;;  %v1691_v35 = vmul.f32 %v1629_v18, %v1629_v18  ;;  %v1620_v21 = vadd.f32 %v2259_v48, %v2175_v37 }
 0x14f   : > { %v1698_v23 = vadd.f32 %v1697_v7, %v1691_v35  ;;  %v1630_v29 = vadd.f32 %v1620_v21, %v1261_v50 }
 0x151   : > { %v2027_v41 = vpack.c.bf16 %v1630_v29, %v1629_v18  ;;  %v1677_v36 = vadd.f32 %v1676_v38, %v1630_v29  ;;  %v1692_v54 = vmul.f32 %v1630_v29, %v1630_v29 }
 0x153   : > { %2031 = vst [vmem:[%s2889_s28 + $0x18] sm:$0xff] %v2027_v41   ;;  %v1678_v51 = vrot.slane %v1677_v36, 4  ;;  %v1699_v60 = vadd.f32 %v1698_v23, %v1692_v54 }
 0x155   : > { %v1679_v5 = vadd.f32 %v1678_v51, %v1677_v36  ;;  %v1700_v12 = vrot.slane %v1699_v60, 4 }
 0x157   : > { %v1680_v57 = vrot.slane %v1679_v5, 2  ;;  %v1701_v63 = vadd.f32 %v1700_v12, %v1699_v60 }
 0x159   : > { %v1681_v30 = vadd.f32 %v1680_v57, %v1679_v5  ;;  %v1702_v20 = vrot.slane %v1701_v63, 2 }
 0x15b   : > { %v1682_v33 = vrot.slane %v1681_v30, 1  ;;  %v1703_v0 = vadd.f32 %v1702_v20, %v1701_v63 }
 0x15d   : > { %v1683_v1 = vadd.f32 %v1682_v33, %v1681_v30  ;;  %v1704_v2 = vrot.slane %v1703_v0, 1 }
 0x15f   : > { %1684 = vst [vmem:[%s265_s30] sm:$0x1] %v1683_v1  ;;  %v1705_v4 = vadd.f32 %v1704_v2, %v1703_v0 }
 0x161   : > { %1706 = vst [vmem:[%s268_s9] sm:$0x1] %v1705_v4 }
 0x162 PF: > { %s17_s21 = sadd.s32 1, %s2347_s21  }
 0x163   : > { %p14_p4 = scmp.ge.s32.totalorder %s17_s21, 4  }
 0x165   :  { %16 = sbr.rel (!%p14_p4) target bundleno = 1 (0x1), region = 97 }

</bundles_post_ra>
